<compile_context>
chip_gen: v7x
topology: tpu7x:2x2x1
jax: 0.10.0
libtpu: 0.0.40
codegen_flags: <defaults>
</compile_context>

<pallas_src>
import jax
import jax.numpy as jnp
from jax import lax
from jax.experimental import pallas as pl
from jax.experimental.pallas import tpu as pltpu

FEATURE_DIM = 32          # small synthetic feature_dim (module default is 256)
ATTN_HIDDEN = 64          # fixed by the module (Conv2d(C, 64, 1))
TEMPERATURE = 0.1
BASE_TEMPERATURE = 0.07
SIM_THRESHOLD = 0.7
MAX_SAMPLES = 1024

# bf16 normalized features for the NxN Gram matmul (native MXU path, half the
# VMEM / traffic).  Set to jnp.float32 if exact torch-f32 parity around the
# hard 0.7 similarity threshold is required.
FEAT_DTYPE = jnp.bfloat16


# --------------------------- fused per-image kernel --------------------------
def _make_kernel(C, A, N, TC, NBLK):
    inv_t = 1.0 / TEMPERATURE
    scale = TEMPERATURE / BASE_TEMPERATURE

    def kernel(x_ref, labr_ref, spr_ref, spc_ref,
               w1f_ref, b1f_ref, w2f_ref, b2f_ref,
               loss_ref, flag_ref, f_scr, row_scr):
        # ---- stage 1: fused 1x1 convs (projection + attention) on the MXU ---
        xt = x_ref[0]                                                # (C, N) bf16
        h = jnp.dot(w1f_ref[...], xt, preferred_element_type=jnp.float32)
        h = jnp.maximum(h + b1f_ref[...], 0.0)                       # (C+A, N) f32
        out2 = jnp.dot(w2f_ref[...], h.astype(jnp.bfloat16),
                       preferred_element_type=jnp.float32) + b2f_ref[...]
        p = out2[:C, :]                                              # (C, N) projection
        logit = out2[C:C + 1, :]                                     # (1, N) attention logit

        # F.normalize(p=2) over channels: rsqrt + multiply, no divide
        sumsq = jnp.sum(p * p, axis=0, keepdims=True)                # (1, N)
        inv_nrm = lax.rsqrt(jnp.maximum(sumsq, 1e-24))
        feat = (p * inv_nrm).astype(FEAT_DTYPE)                      # (C, N)
        w = jax.nn.sigmoid(logit)                                    # (1, N) pixel weights

        valid_f = (labr_ref[0] == 1).astype(jnp.float32)             # (1, N)
        sp_f = spr_ref[0].astype(jnp.float32)                        # (1, N)
        sp_c = spc_ref[0].astype(jnp.float32)                        # (N, 1)

        f_scr[...] = feat
        row_scr[0:1, :] = sp_f
        row_scr[1:2, :] = valid_f
        row_scr[2:3, :] = w

        ii = lax.broadcasted_iota(jnp.int32, (N, TC), 0)             # hoisted out of loop
        jj0 = lax.broadcasted_iota(jnp.int32, (N, TC), 1)

        # ---- stage 2: flash-style column-tiled contrastive accumulation -----
        # Per-row accumulators; valid_i and w_i are factored out of the
        # (N, TC) maps and re-applied after the loop with small dot products,
        # so neither log_prob nor any column-form (N, N) weight map exists.
        def body(ci, carry):
            den, a_acc, b_acc, c_acc = carry
            off = pl.multiple_of(ci * TC, TC)
            f_blk = f_scr[:, pl.ds(off, TC)]                         # (C, TC)
            r_blk = row_scr[0:3, pl.ds(off, TC)]                     # (3, TC) f32
            sp_r = r_blk[0:1, :]                                     # sp_j
            vld_r = r_blk[1:2, :] > 0.5                              # valid_j
            w_r = r_blk[2:3, :]                                      # w_j

            s = lax.dot_general(feat, f_blk, (((0,), (0,)), ((), ())),
                                preferred_element_type=jnp.float32)  # (N, TC) Gram tile
            s_scaled = s * inv_t
            e = jnp.where(vld_r, jnp.exp(s_scaled), 0.0)             # denom over valid cols
            den = den + jnp.sum(e, axis=1, keepdims=True)

            rest = ((sp_r == sp_c) & (s > SIM_THRESHOLD)
                    & vld_r & (ii != jj0 + off))                     # pos mask / valid_i
            m = jnp.where(rest, w_r, 0.0)                            # pos * w_j
            a_acc = a_acc + jnp.sum(m * s_scaled, axis=1, keepdims=True)
            b_acc = b_acc + jnp.sum(m, axis=1, keepdims=True)
            c_acc = c_acc + jnp.sum(rest.astype(jnp.float32), axis=1,
                                    keepdims=True)
            return den, a_acc, b_acc, c_acc

        zcol = jnp.zeros((N, 1), jnp.float32)
        den, a_acc, b_acc, c_acc = lax.fori_loop(
            0, NBLK, body, (zcol, zcol, zcol, zcol), unroll=NBLK <= 4)

        # ---- finalize: re-apply the factored row terms with (1,N)x(N,1) dots
        log_den = jnp.log(jnp.maximum(den, 1e-30))                   # (N, 1)
        vw = valid_f * w                                             # valid_i * w_i
        ws_tot = jnp.dot(vw, a_acc, preferred_element_type=jnp.float32)[0, 0]
        w_sum = jnp.dot(vw, b_acc, preferred_element_type=jnp.float32)[0, 0]
        w_logd = jnp.dot(vw, b_acc * log_den,
                         preferred_element_type=jnp.float32)[0, 0]
        pos_cnt = jnp.dot(valid_f, c_acc,
                          preferred_element_type=jnp.float32)[0, 0]

        has_pos = pos_cnt > 0.0
        loss_b = jnp.where(
            has_pos,
            -scale * (ws_tot - w_logd) / jnp.maximum(w_sum, 1e-30),
            0.0)
        loss_ref[...] = jnp.full(loss_ref.shape, loss_b, jnp.float32)
        flag_ref[...] = jnp.full(flag_ref.shape,
                                 has_pos.astype(jnp.float32), jnp.float32)

    return kernel


# --------------------------------- wrapper -----------------------------------
def init_params(key, c=FEATURE_DIM, a=ATTN_HIDDEN):
    ks = jax.random.split(key, 4)
    s = 0.1
    return dict(
        w1=jax.random.normal(ks[0], (c, c), jnp.float32) * s,   # (C_in, C_out)
        b1=jnp.zeros((c,), jnp.float32),
        w2=jax.random.normal(ks[1], (c, c), jnp.float32) * s,
        b2=jnp.zeros((c,), jnp.float32),
        wa1=jax.random.normal(ks[2], (c, a), jnp.float32) * s,
        ba1=jnp.zeros((a,), jnp.float32),
        wa2=jax.random.normal(ks[3], (a,), jnp.float32) * s,
        ba2=jnp.zeros((1,), jnp.float32),
    )


def _full_spec(shape):
    nd = len(shape)
    return pl.BlockSpec(shape, lambda *_, _nd=nd: (0,) * _nd)


def pixel_contrastive_loss(feats_nchw, labels, superpixel, params):
    B, C, H, W = feats_nchw.shape
    A = ATTN_HIDDEN
    N = H * W
    assert C % 16 == 0, "channel dim must be sublane-aligned for bf16 tiles"
    # TODO(synk): ragged H*W (not a multiple of 128) would need in-kernel masking.
    assert N % 128 == 0

    # column-tile width for the contrastive loop (bounds (N, TC) temporaries)
    if N <= 512:
        TC = N
    else:
        TC = next(t for t in (512, 384, 256, 128) if N % t == 0)
    NBLK = N // TC

    # fused first-stage weight: rows [:C] projection conv1, rows [C:] attention conv1
    w1f = jnp.concatenate([params["w1"], params["wa1"]],
                          axis=1).T.astype(jnp.bfloat16)              # (C+A, C)
    b1f = jnp.concatenate([params["b1"], params["ba1"]], axis=0).reshape(C + A, 1)

    # fused second-stage weight: rows [:C] = [w2 | 0], row C = [0 | wa2], rest 0
    C_pad = C + 8
    w2f = jnp.zeros((C_pad, C + A), jnp.float32)
    w2f = w2f.at[:C, :C].set(params["w2"].T)
    w2f = w2f.at[C, C:].set(params["wa2"])
    w2f = w2f.astype(jnp.bfloat16)                                    # (C+8, C+A)
    b2f = jnp.zeros((C_pad, 1), jnp.float32)
    b2f = b2f.at[:C, 0].set(params["b2"])
    b2f = b2f.at[C, 0].set(params["ba2"][0])

    # channels-first kept (pure reshape); bf16 input halves kernel DMA bytes
    x = feats_nchw.reshape(B, C, N).astype(jnp.bfloat16)
    lab_row = labels.reshape(B, 1, N).astype(jnp.int32)
    sp_row = superpixel.reshape(B, 1, N).astype(jnp.int32)
    sp_col = superpixel.reshape(B, N, 1).astype(jnp.int32)

    kernel = _make_kernel(C, A, N, TC, NBLK)

    losses, flags = pl.pallas_call(
        kernel,
        out_shape=(jax.ShapeDtypeStruct((B, 1, 1), jnp.float32),
                   jax.ShapeDtypeStruct((B, 1, 1), jnp.float32)),
        grid=(B,),
        in_specs=[pl.BlockSpec((1, C, N), lambda b: (b, 0, 0)),
                  pl.BlockSpec((1, 1, N), lambda b: (b, 0, 0)),
                  pl.BlockSpec((1, 1, N), lambda b: (b, 0, 0)),
                  pl.BlockSpec((1, N, 1), lambda b: (b, 0, 0)),
                  _full_spec((C + A, C)), _full_spec((C + A, 1)),
                  _full_spec((C_pad, C + A)), _full_spec((C_pad, 1))],
        out_specs=(pl.BlockSpec((1, 1, 1), lambda b: (b, 0, 0)),
                   pl.BlockSpec((1, 1, 1), lambda b: (b, 0, 0))),
        scratch_shapes=[pltpu.VMEM((C, N), FEAT_DTYPE),      # normalized features
                        pltpu.VMEM((8, N), jnp.float32)],    # sp / valid / w rows
        compiler_params=pltpu.CompilerParams(
            dimension_semantics=("parallel",),
            vmem_limit_bytes=32 * 1024 * 1024),   # safe on v5e/v6e/v7x alike
    )(x, lab_row, sp_row, sp_col, w1f, b1f, w2f, b2f)

    loss_vec = losses[:, 0, 0]
    flag_vec = flags[:, 0, 0]
    n_loss = jnp.sum(flag_vec)
    total = jnp.sum(loss_vec)
    return jnp.where(n_loss > 0, total / n_loss, 0.0)


if __name__ == "__main__":
    key = jax.random.PRNGKey(0)
    kf, kl, ks, kp = jax.random.split(key, 4)
    B, C, H, W = 2, FEATURE_DIM, 16, 16
    feats = jax.random.normal(kf, (B, C, H, W), jnp.float32)
    labels = (jax.random.uniform(kl, (B, H, W)) < 0.5).astype(jnp.int32)
    superpixel = jax.random.randint(ks, (B, H, W), 0, 8, dtype=jnp.int32)
    params = init_params(kp)

    loss = pixel_contrastive_loss(feats, labels, superpixel, params)
    jax.block_until_ready(loss)
    print("KERNEL_OK")
</pallas_src>

<mosaic_0001>
module attributes {stable_mosaic.version = 11 : i64} {
  func.func @kernel(%arg0: i32, %arg1: memref<1x32x256xbf16, #tpu.memory_space<vmem>>, %arg2: memref<1x1x256xi32, #tpu.memory_space<vmem>>, %arg3: memref<1x1x256xi32, #tpu.memory_space<vmem>>, %arg4: memref<1x256x1xi32, #tpu.memory_space<vmem>>, %arg5: memref<96x32xbf16, #tpu.memory_space<vmem>>, %arg6: memref<96x1xf32, #tpu.memory_space<vmem>>, %arg7: memref<40x96xbf16, #tpu.memory_space<vmem>>, %arg8: memref<40x1xf32, #tpu.memory_space<vmem>>, %arg9: memref<1x1x1xf32, #tpu.memory_space<vmem>>, %arg10: memref<1x1x1xf32, #tpu.memory_space<vmem>>, %arg11: memref<32x256xbf16, #tpu.memory_space<vmem>>, %arg12: memref<8x256xf32, #tpu.memory_space<vmem>>) attributes {dimension_semantics = [#tpu.dimension_semantics<parallel>], iteration_bounds = array<i64: 2>, scalar_prefetch = 0 : i64, scratch_operands = 2 : i64, tpu.core_type = #tpu.core_type<tc>, window_params = [{transform_indices = @transform_0, window_bounds = array<i64: 1, 32, 256>}, {transform_indices = @transform_1, window_bounds = array<i64: 1, 1, 256>}, {transform_indices = @transform_2, window_bounds = array<i64: 1, 1, 256>}, {transform_indices = @transform_3, window_bounds = array<i64: 1, 256, 1>}, {pipeline_mode = #tpu.pipeline_mode<synchronous>, transform_indices = @transform_4, window_bounds = array<i64: 96, 32>}, {pipeline_mode = #tpu.pipeline_mode<synchronous>, transform_indices = @transform_5, window_bounds = array<i64: 96, 1>}, {pipeline_mode = #tpu.pipeline_mode<synchronous>, transform_indices = @transform_6, window_bounds = array<i64: 40, 96>}, {pipeline_mode = #tpu.pipeline_mode<synchronous>, transform_indices = @transform_7, window_bounds = array<i64: 40, 1>}, {transform_indices = @transform_8, window_bounds = array<i64: 1, 1, 1>}, {transform_indices = @transform_9, window_bounds = array<i64: 1, 1, 1>}]} {
    %c0 = arith.constant 0 : index
    %c0_0 = arith.constant 0 : index
    %c0_1 = arith.constant 0 : index
    %0 = vector.load %arg1[%c0, %c0_0, %c0_1] : memref<1x32x256xbf16, #tpu.memory_space<vmem>>, vector<1x32x256xbf16>
    %1 = vector.shape_cast %0 : vector<1x32x256xbf16> to vector<32x256xbf16>
    %c0_2 = arith.constant 0 : index
    %c0_3 = arith.constant 0 : index
    %2 = vector.load %arg5[%c0_2, %c0_3] : memref<96x32xbf16, #tpu.memory_space<vmem>>, vector<96x32xbf16>
    %cst = arith.constant dense<0.000000e+00> : vector<96x256xf32>
    %3 = tpu.matmul %2, %1, %cst {dimension_numbers = #tpu.dot_dimension_numbers<[1], [0], [0], [1], [0, 0, 1, 1], [], []>} : vector<96x32xbf16>, vector<32x256xbf16>, vector<96x256xf32> -> vector<96x256xf32>
    %c0_4 = arith.constant 0 : index
    %c0_5 = arith.constant 0 : index
    %4 = vector.load %arg6[%c0_4, %c0_5] : memref<96x1xf32, #tpu.memory_space<vmem>>, vector<96x1xf32>
    %5 = vector.broadcast %4 : vector<96x1xf32> to vector<96x256xf32>
    %6 = arith.addf %3, %5 : vector<96x256xf32>
    %cst_6 = arith.constant 0.000000e+00 : f32
    %7 = vector.broadcast %cst_6 : f32 to vector<96x256xf32>
    %8 = arith.maximumf %6, %7 : vector<96x256xf32>
    %c0_7 = arith.constant 0 : index
    %c0_8 = arith.constant 0 : index
    %9 = vector.load %arg7[%c0_7, %c0_8] : memref<40x96xbf16, #tpu.memory_space<vmem>>, vector<40x96xbf16>
    %10 = arith.truncf %8 : vector<96x256xf32> to vector<96x256xbf16>
    %cst_9 = arith.constant dense<0.000000e+00> : vector<40x256xf32>
    %11 = tpu.matmul %9, %10, %cst_9 {dimension_numbers = #tpu.dot_dimension_numbers<[1], [0], [0], [1], [0, 0, 1, 1], [], []>} : vector<40x96xbf16>, vector<96x256xbf16>, vector<40x256xf32> -> vector<40x256xf32>
    %c0_10 = arith.constant 0 : index
    %c0_11 = arith.constant 0 : index
    %12 = vector.load %arg8[%c0_10, %c0_11] : memref<40x1xf32, #tpu.memory_space<vmem>>, vector<40x1xf32>
    %13 = vector.broadcast %12 : vector<40x1xf32> to vector<40x256xf32>
    %14 = arith.addf %11, %13 : vector<40x256xf32>
    %15 = vector.extract_strided_slice %14 {offsets = [0, 0], sizes = [32, 256], strides = [1, 1]} : vector<40x256xf32> to vector<32x256xf32>
    %16 = vector.extract_strided_slice %14 {offsets = [32, 0], sizes = [1, 256], strides = [1, 1]} : vector<40x256xf32> to vector<1x256xf32>
    %17 = arith.mulf %15, %15 : vector<32x256xf32>
    %cst_12 = arith.constant dense<0.000000e+00> : vector<256xf32>
    %18 = vector.multi_reduction <add>, %17, %cst_12 [0] : vector<32x256xf32> to vector<256xf32>
    %19 = vector.shape_cast %18 : vector<256xf32> to vector<1x256xf32>
    %cst_13 = arith.constant 1.000000e-24 : f32
    %20 = vector.broadcast %cst_13 : f32 to vector<1x256xf32>
    %21 = arith.maximumf %19, %20 : vector<1x256xf32>
    %22 = math.rsqrt %21 : vector<1x256xf32>
    %23 = vector.broadcast %22 : vector<1x256xf32> to vector<32x256xf32>
    %24 = arith.mulf %15, %23 : vector<32x256xf32>
    %25 = arith.truncf %24 : vector<32x256xf32> to vector<32x256xbf16>
    %26 = arith.negf %16 : vector<1x256xf32>
    %27 = math.exp %26 : vector<1x256xf32>
    %cst_14 = arith.constant 1.000000e+00 : f32
    %28 = vector.broadcast %cst_14 : f32 to vector<1x256xf32>
    %29 = arith.addf %28, %27 : vector<1x256xf32>
    %30 = arith.divf %28, %29 : vector<1x256xf32>
    %c0_15 = arith.constant 0 : index
    %c0_16 = arith.constant 0 : index
    %c0_17 = arith.constant 0 : index
    %31 = vector.load %arg2[%c0_15, %c0_16, %c0_17] : memref<1x1x256xi32, #tpu.memory_space<vmem>>, vector<1x1x256xi32>
    %32 = vector.shape_cast %31 : vector<1x1x256xi32> to vector<1x256xi32>
    %c1_i32 = arith.constant 1 : i32
    %33 = vector.broadcast %c1_i32 : i32 to vector<1x256xi32>
    %34 = arith.cmpi eq, %32, %33 : vector<1x256xi32>
    %35 = arith.extui %34 : vector<1x256xi1> to vector<1x256xi32>
    %36 = arith.sitofp %35 : vector<1x256xi32> to vector<1x256xf32>
    %c0_18 = arith.constant 0 : index
    %c0_19 = arith.constant 0 : index
    %c0_20 = arith.constant 0 : index
    %37 = vector.load %arg3[%c0_18, %c0_19, %c0_20] : memref<1x1x256xi32, #tpu.memory_space<vmem>>, vector<1x1x256xi32>
    %38 = vector.shape_cast %37 : vector<1x1x256xi32> to vector<1x256xi32>
    %39 = arith.sitofp %38 : vector<1x256xi32> to vector<1x256xf32>
    %c0_21 = arith.constant 0 : index
    %c0_22 = arith.constant 0 : index
    %c0_23 = arith.constant 0 : index
    %40 = vector.load %arg4[%c0_21, %c0_22, %c0_23] : memref<1x256x1xi32, #tpu.memory_space<vmem>>, vector<1x256x1xi32>
    %41 = vector.shape_cast %40 : vector<1x256x1xi32> to vector<256x1xi32>
    %42 = arith.sitofp %41 : vector<256x1xi32> to vector<256x1xf32>
    %c0_24 = arith.constant 0 : index
    %c0_25 = arith.constant 0 : index
    %43 = vector.load %arg11[%c0_24, %c0_25] : memref<32x256xbf16, #tpu.memory_space<vmem>>, vector<32x256xbf16>
    tpu.vector_store %arg11[%c0_24, %c0_25], %25 {strides = array<i32>} : memref<32x256xbf16, #tpu.memory_space<vmem>>, vector<32x256xbf16>,
    %c0_26 = arith.constant 0 : index
    %c0_27 = arith.constant 0 : index
    %44 = vector.load %arg12[%c0_26, %c0_27] : memref<8x256xf32, #tpu.memory_space<vmem>>, vector<1x256xf32>
    tpu.vector_store %arg12[%c0_26, %c0_27], %39 {strides = array<i32>} : memref<8x256xf32, #tpu.memory_space<vmem>>, vector<1x256xf32>,
    %c1 = arith.constant 1 : index
    %c0_28 = arith.constant 0 : index
    %45 = vector.load %arg12[%c1, %c0_28] : memref<8x256xf32, #tpu.memory_space<vmem>>, vector<1x256xf32>
    tpu.vector_store %arg12[%c1, %c0_28], %36 {strides = array<i32>} : memref<8x256xf32, #tpu.memory_space<vmem>>, vector<1x256xf32>,
    %c2 = arith.constant 2 : index
    %c0_29 = arith.constant 0 : index
    %46 = vector.load %arg12[%c2, %c0_29] : memref<8x256xf32, #tpu.memory_space<vmem>>, vector<1x256xf32>
    tpu.vector_store %arg12[%c2, %c0_29], %30 {strides = array<i32>} : memref<8x256xf32, #tpu.memory_space<vmem>>, vector<1x256xf32>,
    %47 = tpu.iota {dimensions = array<i32: 0>} : vector<256x256xi32>
    %48 = tpu.iota {dimensions = array<i32: 1>} : vector<256x256xi32>
    %cst_30 = arith.constant 0.000000e+00 : f32
    %49 = vector.broadcast %cst_30 : f32 to vector<256x1xf32>
    %c0_i32 = arith.constant 0 : i32
    %c256_i32 = arith.constant 256 : i32
    %50 = arith.muli %c0_i32, %c256_i32 : i32
    %51 = tpu.assume_multiple %50, 256 : i32
    %c0_31 = arith.constant 0 : index
    %52 = arith.index_cast %51 : i32 to index
    %53 = vector.load %arg11[%c0_31, %52] : memref<32x256xbf16, #tpu.memory_space<vmem>>, vector<32x256xbf16>
    %c0_32 = arith.constant 0 : index
    %54 = arith.index_cast %51 : i32 to index
    %55 = vector.load %arg12[%c0_32, %54] : memref<8x256xf32, #tpu.memory_space<vmem>>, vector<3x256xf32>
    %56 = vector.extract_strided_slice %55 {offsets = [0, 0], sizes = [1, 256], strides = [1, 1]} : vector<3x256xf32> to vector<1x256xf32>
    %57 = vector.extract_strided_slice %55 {offsets = [1, 0], sizes = [1, 256], strides = [1, 1]} : vector<3x256xf32> to vector<1x256xf32>
    %cst_33 = arith.constant 5.000000e-01 : f32
    %58 = vector.broadcast %cst_33 : f32 to vector<1x256xf32>
    %59 = arith.cmpf ogt, %57, %58 : vector<1x256xf32>
    %60 = vector.extract_strided_slice %55 {offsets = [2, 0], sizes = [1, 256], strides = [1, 1]} : vector<3x256xf32> to vector<1x256xf32>
    %cst_34 = arith.constant dense<0.000000e+00> : vector<256x256xf32>
    %61 = tpu.matmul %25, %53, %cst_34 {dimension_numbers = #tpu.dot_dimension_numbers<[0], [0], [1], [1], [0, 1, 1, 1], [], []>} : vector<32x256xbf16>, vector<32x256xbf16>, vector<256x256xf32> -> vector<256x256xf32>
    %cst_35 = arith.constant 1.000000e+01 : f32
    %62 = vector.broadcast %cst_35 : f32 to vector<256x256xf32>
    %63 = arith.mulf %61, %62 : vector<256x256xf32>
    %64 = math.exp %63 : vector<256x256xf32>
    %cst_36 = arith.constant 0.000000e+00 : f32
    %65 = vector.shape_cast %59 : vector<1x256xi1> to vector<1x256xi1>
    %66 = vector.broadcast %65 : vector<1x256xi1> to vector<256x256xi1>
    %67 = vector.broadcast %cst_36 : f32 to vector<256x256xf32>
    %68 = arith.select %66, %64, %67 : vector<256x256xi1>, vector<256x256xf32>
    %cst_37 = arith.constant dense<0.000000e+00> : vector<256xf32>
    %69 = vector.multi_reduction <add>, %68, %cst_37 [1] : vector<256x256xf32> to vector<256xf32>
    %70 = vector.shape_cast %69 : vector<256xf32> to vector<256x1xf32>
    %71 = arith.addf %49, %70 : vector<256x1xf32>
    %72 = vector.broadcast %56 : vector<1x256xf32> to vector<256x256xf32>
    %73 = vector.broadcast %42 : vector<256x1xf32> to vector<256x256xf32>
    %74 = arith.cmpf oeq, %72, %73 : vector<256x256xf32>
    %cst_38 = arith.constant 0.699999988 : f32
    %75 = vector.broadcast %cst_38 : f32 to vector<256x256xf32>
    %76 = arith.cmpf ogt, %61, %75 : vector<256x256xf32>
    %77 = arith.andi %74, %76 : vector<256x256xi1>
    %78 = vector.broadcast %59 : vector<1x256xi1> to vector<256x256xi1>
    %79 = arith.andi %77, %78 : vector<256x256xi1>
    %80 = vector.broadcast %51 : i32 to vector<256x256xi32>
    %81 = arith.addi %48, %80 : vector<256x256xi32>
    %82 = arith.cmpi ne, %47, %81 : vector<256x256xi32>
    %83 = arith.andi %79, %82 : vector<256x256xi1>
    %cst_39 = arith.constant 0.000000e+00 : f32
    %84 = vector.shape_cast %60 : vector<1x256xf32> to vector<1x256xf32>
    %85 = vector.broadcast %84 : vector<1x256xf32> to vector<256x256xf32>
    %86 = vector.broadcast %cst_39 : f32 to vector<256x256xf32>
    %87 = arith.select %83, %85, %86 : vector<256x256xi1>, vector<256x256xf32>
    %88 = arith.mulf %87, %63 : vector<256x256xf32>
    %cst_40 = arith.constant dense<0.000000e+00> : vector<256xf32>
    %89 = vector.multi_reduction <add>, %88, %cst_40 [1] : vector<256x256xf32> to vector<256xf32>
    %90 = vector.shape_cast %89 : vector<256xf32> to vector<256x1xf32>
    %91 = arith.addf %49, %90 : vector<256x1xf32>
    %cst_41 = arith.constant dense<0.000000e+00> : vector<256xf32>
    %92 = vector.multi_reduction <add>, %87, %cst_41 [1] : vector<256x256xf32> to vector<256xf32>
    %93 = vector.shape_cast %92 : vector<256xf32> to vector<256x1xf32>
    %94 = arith.addf %49, %93 : vector<256x1xf32>
    %95 = arith.extui %83 : vector<256x256xi1> to vector<256x256xi32>
    %96 = arith.sitofp %95 : vector<256x256xi32> to vector<256x256xf32>
    %cst_42 = arith.constant dense<0.000000e+00> : vector<256xf32>
    %97 = vector.multi_reduction <add>, %96, %cst_42 [1] : vector<256x256xf32> to vector<256xf32>
    %98 = vector.shape_cast %97 : vector<256xf32> to vector<256x1xf32>
    %99 = arith.addf %49, %98 : vector<256x1xf32>
    %c1_i32_43 = arith.constant 1 : i32
    %cst_44 = arith.constant 1.000000e-30 : f32
    %100 = vector.broadcast %cst_44 : f32 to vector<256x1xf32>
    %101 = arith.maximumf %71, %100 : vector<256x1xf32>
    %102 = math.log %101 : vector<256x1xf32>
    %103 = arith.mulf %36, %30 : vector<1x256xf32>
    %cst_45 = arith.constant dense<0.000000e+00> : vector<1x1xf32>
    %104 = tpu.matmul %103, %91, %cst_45 {dimension_numbers = #tpu.dot_dimension_numbers<[1], [0], [0], [1], [0, 0, 1, 1], [], []>} : vector<1x256xf32>, vector<256x1xf32>, vector<1x1xf32> -> vector<1x1xf32>
    %105 = vector.extract %104[0, 0] : f32 from vector<1x1xf32>
    %cst_46 = arith.constant dense<0.000000e+00> : vector<1x1xf32>
    %106 = tpu.matmul %103, %94, %cst_46 {dimension_numbers = #tpu.dot_dimension_numbers<[1], [0], [0], [1], [0, 0, 1, 1], [], []>} : vector<1x256xf32>, vector<256x1xf32>, vector<1x1xf32> -> vector<1x1xf32>
    %107 = vector.extract %106[0, 0] : f32 from vector<1x1xf32>
    %108 = arith.mulf %94, %102 : vector<256x1xf32>
    %cst_47 = arith.constant dense<0.000000e+00> : vector<1x1xf32>
    %109 = tpu.matmul %103, %108, %cst_47 {dimension_numbers = #tpu.dot_dimension_numbers<[1], [0], [0], [1], [0, 0, 1, 1], [], []>} : vector<1x256xf32>, vector<256x1xf32>, vector<1x1xf32> -> vector<1x1xf32>
    %110 = vector.extract %109[0, 0] : f32 from vector<1x1xf32>
    %cst_48 = arith.constant dense<0.000000e+00> : vector<1x1xf32>
    %111 = tpu.matmul %36, %99, %cst_48 {dimension_numbers = #tpu.dot_dimension_numbers<[1], [0], [0], [1], [0, 0, 1, 1], [], []>} : vector<1x256xf32>, vector<256x1xf32>, vector<1x1xf32> -> vector<1x1xf32>
    %112 = vector.extract %111[0, 0] : f32 from vector<1x1xf32>
    %cst_49 = arith.constant 0.000000e+00 : f32
    %113 = arith.cmpf ogt, %112, %cst_49 : f32
    %114 = arith.subf %105, %110 : f32
    %cst_50 = arith.constant -1.42857146 : f32
    %115 = arith.mulf %cst_50, %114 : f32
    %cst_51 = arith.constant 1.000000e-30 : f32
    %116 = arith.maximumf %107, %cst_51 : f32
    %117 = arith.divf %115, %116 : f32
    %cst_52 = arith.constant 0.000000e+00 : f32
    %118 = arith.select %113, %117, %cst_52 : f32
    %119 = vector.broadcast %118 : f32 to vector<1x1x1xf32>
    %c0_53 = arith.constant 0 : index
    %c0_54 = arith.constant 0 : index
    %c0_55 = arith.constant 0 : index
    %120 = vector.load %arg9[%c0_53, %c0_54, %c0_55] : memref<1x1x1xf32, #tpu.memory_space<vmem>>, vector<1x1x1xf32>
    tpu.vector_store %arg9[%c0_53, %c0_54, %c0_55], %119 {strides = array<i32>} : memref<1x1x1xf32, #tpu.memory_space<vmem>>, vector<1x1x1xf32>,
    %121 = arith.extui %113 : i1 to i32
    %122 = arith.sitofp %121 : i32 to f32
    %123 = vector.broadcast %122 : f32 to vector<1x1x1xf32>
    %c0_56 = arith.constant 0 : index
    %c0_57 = arith.constant 0 : index
    %c0_58 = arith.constant 0 : index
    %124 = vector.load %arg10[%c0_56, %c0_57, %c0_58] : memref<1x1x1xf32, #tpu.memory_space<vmem>>, vector<1x1x1xf32>
    tpu.vector_store %arg10[%c0_56, %c0_57, %c0_58], %123 {strides = array<i32>} : memref<1x1x1xf32, #tpu.memory_space<vmem>>, vector<1x1x1xf32>,
    return
  }
  func.func @transform_0(%arg0: i32) -> (i32, i32, i32) {
    %c0_i32 = arith.constant 0 : i32
    %c0_i32_0 = arith.constant 0 : i32
    %c0_i32_1 = arith.constant 0 : i32
    return %arg0, %c0_i32, %c0_i32_0 : i32, i32, i32
  }
  func.func @transform_1(%arg0: i32) -> (i32, i32, i32) {
    %c0_i32 = arith.constant 0 : i32
    %c0_i32_0 = arith.constant 0 : i32
    %c0_i32_1 = arith.constant 0 : i32
    return %arg0, %c0_i32, %c0_i32_0 : i32, i32, i32
  }
  func.func @transform_2(%arg0: i32) -> (i32, i32, i32) {
    %c0_i32 = arith.constant 0 : i32
    %c0_i32_0 = arith.constant 0 : i32
    %c0_i32_1 = arith.constant 0 : i32
    return %arg0, %c0_i32, %c0_i32_0 : i32, i32, i32
  }
  func.func @transform_3(%arg0: i32) -> (i32, i32, i32) {
    %c0_i32 = arith.constant 0 : i32
    %c0_i32_0 = arith.constant 0 : i32
    %c0_i32_1 = arith.constant 0 : i32
    return %arg0, %c0_i32, %c0_i32_0 : i32, i32, i32
  }
  func.func @transform_4(%arg0: i32) -> (i32, i32) {
    %c0_i32 = arith.constant 0 : i32
    %c0_i32_0 = arith.constant 0 : i32
    %c0_i32_1 = arith.constant 0 : i32
    return %c0_i32, %c0_i32_0 : i32, i32
  }
  func.func @transform_5(%arg0: i32) -> (i32, i32) {
    %c0_i32 = arith.constant 0 : i32
    %c0_i32_0 = arith.constant 0 : i32
    %c0_i32_1 = arith.constant 0 : i32
    return %c0_i32, %c0_i32_0 : i32, i32
  }
  func.func @transform_6(%arg0: i32) -> (i32, i32) {
    %c0_i32 = arith.constant 0 : i32
    %c0_i32_0 = arith.constant 0 : i32
    %c0_i32_1 = arith.constant 0 : i32
    return %c0_i32, %c0_i32_0 : i32, i32
  }
  func.func @transform_7(%arg0: i32) -> (i32, i32) {
    %c0_i32 = arith.constant 0 : i32
    %c0_i32_0 = arith.constant 0 : i32
    %c0_i32_1 = arith.constant 0 : i32
    return %c0_i32, %c0_i32_0 : i32, i32
  }
  func.func @transform_8(%arg0: i32) -> (i32, i32, i32) {
    %c0_i32 = arith.constant 0 : i32
    %c0_i32_0 = arith.constant 0 : i32
    %c0_i32_1 = arith.constant 0 : i32
    return %arg0, %c0_i32, %c0_i32_0 : i32, i32, i32
  }
  func.func @transform_9(%arg0: i32) -> (i32, i32, i32) {
    %c0_i32 = arith.constant 0 : i32
    %c0_i32_0 = arith.constant 0 : i32
    %c0_i32_1 = arith.constant 0 : i32
    return %arg0, %c0_i32, %c0_i32_0 : i32, i32, i32
  }
}

</mosaic_0001>

<bundles_post_ra>
// kernel: tpu_custom_call.1
= control target key start
LH: loop header
LB: loop body
LE: loop exit
PB: predicated region body
PF: predicated region fallthrough
CT: control target
= control target key end

     0   :  { %s4126_s30 = smov 0   ;;  %s7819_s0 = inlined_call_operand.vmem [shape: bf16[2,32,256], index: 0, kind: input, shape index: {}]   ;;  %s7820_s1 = inlined_call_operand.vmem [shape: s32[2,1,256], index: 1, kind: input, shape index: {}]   ;;  %s7821_s2 = inlined_call_operand.vmem [shape: s32[2,1,256], index: 2, kind: input, shape index: {}]   ;;  %s7822_s3 = inlined_call_operand.vmem [shape: s32[2,256,1], index: 3, kind: input, shape index: {}]   ;;  %s7823_s4 = inlined_call_operand.vmem [shape: bf16[96,32], index: 4, kind: input, shape index: {}]   ;;  %s7824_s5 = inlined_call_operand.vmem [shape: f32[96,1], index: 5, kind: input, shape index: {}]   ;;  %s7825_s6 = inlined_call_operand.vmem [shape: bf16[40,96], index: 6, kind: input, shape index: {}]   ;;  %s7826_s7 = inlined_call_operand.vmem [shape: f32[40,1], index: 7, kind: input, shape index: {}]   ;;  %s7827_s8 = inlined_call_operand.vmem [shape: f32[2,1,1], index: 8, kind: output, shape index: {0}]   ;;  %s7828_s9 = inlined_call_operand.vmem [shape: f32[2,1,1], index: 9, kind: output, shape index: {1}]  }
   0x1 LB: > { %s3431_s10 = sadd.s32 4294967295, %s4070_s30   ;;  %p3435_p0 = scmp.ge.s32.totalorder %s4070_s30, 1  ;;  %s4070_s30 = sphi %s4126_s30, %s20_s30  }
   0x2   : > { %p318_p1 = scmp.lt.s32.totalorder %s4070_s30, 3 }
   0x4   : > { %p319_p2 = pnand %p3435_p0, %p318_p1 }
   0x6   : > { %322 = sbr.rel (%p319_p2) target bundleno = 1614 (0x64e), region = 52 }
   0xd   : > { %p368_p3 = scmp.lt.s32.totalorder %s3431_s10, 1  ;;  %v4072_v0 = vmov 0   ;;  %v409_v5 = vld [vmem:[%s7824_s5] sm:$0xff]  ;;  %v411_v6 = vld [vmem:[%s7824_s5 + $0x10] sm:$0xff]  ;;  %v410_v7 = vld [vmem:[%s7824_s5 + $0x8] sm:$0xff]  ;;  %vm531_vm0 = vcmask 261120  }
   0xe   : > { %582 = vmatprep.mubr.bf16.mxu0 %v4072_v0  ;;  %3841 = vset.pattern.permute.xlu0 %v4072_v0  ;;  %v3849_v8 = vld [vmem:[%s7823_s4] sm:$0xff]   ;;  %v412_v9 = vld [vmem:[%s7824_s5 + $0x18] sm:$0xff]  ;;  %v414_v11 = vld [vmem:[%s7824_s5 + $0x28] sm:$0xff]  ;;  %vm727_vm1 = vcmask 785408   ;;  %s4075_s23 = smov 1e-30  }
   0xf   : > { %s8611_s10 = smov (!%p368_p3, %s3431_s10), 1  ;;  %3842 = vset.pattern.permute.xlu1 %v4072_v0  ;;  %769 = vmatprep.mubr.bf16.mxu1 %v4072_v0  ;;  %v413_v10 = vld [vmem:[%s7824_s5 + $0x20] sm:$0xff]  ;;  %v415_v12 = vld [vmem:[%s7824_s5 + $0x30] sm:$0xff]  ;;  %v3850_v13 = vld [vmem:[%s7823_s4 + $0x8] sm:$0xff]  }
  0x10   : > { %s3549_s11 = sshll.u32 %s8611_s10, 5  ;;  %423 = vperm.xlu0 %3841, %v409_v5   ;;  %433 = vperm.xlu1 %3842, %v411_v6   ;;  %v416_v14 = vld [vmem:[%s7824_s5 + $0x38] sm:$0xff]  ;;  %v417_v15 = vld [vmem:[%s7824_s5 + $0x40] sm:$0xff]  ;;  %v418_v16 = vld [vmem:[%s7824_s5 + $0x48] sm:$0xff]  ;;  %s3550_s27 = sshll.u32 %s8611_s10, 8 }
  0x11   : > { %s372_s14 = scalar_lea.vmem %s7819_s0, %s3549_s11  ;;  %v419_v17 = vld [vmem:[%s7824_s5 + $0x50] sm:$0xff]  ;;  %v420_v19 = vld [vmem:[%s7824_s5 + $0x58] sm:$0xff]  ;;  %v684_v20 = vld [vmem:[%s7826_s7] sm:$0xff]  ;;  %s4237_s11 = scalar_lea.vmem %s7822_s3, %s3550_s27 }
  0x12   : > { %v3843_v1 = vld [vmem:[%s372_s14 + $0x4] ss:$8 sps:$4 sm:$0xff]   ;;  %v3845_v2 = vld [vmem:[%s372_s14] ss:$8 sps:$4 sm:$0xff]   ;;  %v3846_v3 = vld [vmem:[%s372_s14 + $0x14] ss:$8 sps:$4 sm:$0xff]   ;;  %s388_s13 = scalar_lea.vmem %s7827_s8, %s8611_s10  ;;  %s391_s18 = scalar_lea.vmem %s7828_s9, %s8611_s10 }
  0x13   : > { %550 = vmatprep.subr.bf16.mxu0 %v3843_v1  ;;  %v3848_v4 = vld [vmem:[%s372_s14 + $0x10] ss:$8 sps:$4 sm:$0xff]   ;;  %v685_v21 = vld [vmem:[%s7826_s7 + $0x8] sm:$0xff]  ;;  %v3853_v25 = vld [vmem:[%s7823_s4 + $0x20] sm:$0xff]   ;;  %s3438_s14 = sshll.u32 %s8611_s10, 1 }
  0x14   : > { %551 = vmatpush1.bf16.msra.mxu0 %v3845_v2  ;;  %428 = vperm.xlu0 %3841, %v410_v7   ;;  %v3851_v18 = vld [vmem:[%s7823_s4 + $0x10] sm:$0xff]   ;;  %v3852_v23 = vld [vmem:[%s7823_s4 + $0x18] sm:$0xff]   ;;  %v3854_v26 = vld [vmem:[%s7823_s4 + $0x28] sm:$0xff]   ;;  %s376_s17 = scalar_lea.vmem %s7820_s1, %s3438_s14  ;;  %s380_s20 = scalar_lea.vmem %s7821_s2, %s3438_s14 }
  0x15   : > { %552 = vmatprep.subr.bf16.mxu0 %v3846_v3  ;;  %438 = vperm.xlu1 %3842, %v412_v9   ;;  %v686_v22 = vld [vmem:[%s7826_s7 + $0x10] sm:$0xff]  ;;  %v687_v24 = vld [vmem:[%s7826_s7 + $0x18] sm:$0xff] }
  0x18   : > { %553 = vmatpush1.bf16.msra.mxu0 %v3848_v4  ;;  %443 = vperm.xlu0 %3841, %v413_v10  }
  0x19   : > { %448 = vperm.xlu1 %3842, %v414_v11  }
  0x1b   : > { %3452 = vmatmul.mubr.msk.bf16.vlgmr.msra.gmra.mrb[0].mxu0 %vm531_vm0, %v3849_v8 }
  0x1c   : > { %592 = vmatprep.mubr.bf16.mxu0 %v4072_v0  ;;  %453 = vperm.xlu0 %3841, %v415_v12  }
  0x1d   : > { %458 = vperm.xlu1 %3842, %v416_v14  }
  0x20   : > { %463 = vperm.xlu0 %3841, %v417_v15  }
  0x21   : > { %468 = vperm.xlu1 %3842, %v418_v16  }
  0x23   : > { %3453 = vmatmul.mubr.msk.bf16.gmra.mrb[4].mxu0 %vm531_vm0, %v3850_v13 }
  0x24   : > { %602 = vmatprep.mubr.bf16.mxu0 %v4072_v0  ;;  %473 = vperm.xlu0 %3841, %v419_v17  }
  0x25   : > { %478 = vperm.xlu1 %3842, %v420_v19  }
  0x28   : > { %691 = vperm.xlu0 %3841, %v684_v20  }
  0x29   : > { %696 = vperm.xlu1 %3842, %v685_v21  }
  0x2b   : > { %3454 = vmatmul.mubr.msk.bf16.gmra.mrb[8].mxu0 %vm531_vm0, %v3851_v18 }
  0x2c   : > { %612 = vmatprep.mubr.bf16.mxu0 %v4072_v0  ;;  %701 = vperm.xlu0 %3841, %v686_v22  }
  0x2d   : > { %706 = vperm.xlu1 %3842, %v687_v24  }
  0x33   : > { %3455 = vmatmul.mubr.msk.bf16.gmra.mrb[12].mxu0 %vm531_vm0, %v3852_v23 }
  0x34   : > { %622 = vmatprep.mubr.bf16.mxu0 %v4072_v0 }
  0x3b   : > { %3456 = vmatmul.mubr.msk.bf16.gmra.mrb[16].mxu0 %vm531_vm0, %v3853_v25 }
  0x3c   : > { %632 = vmatprep.mubr.bf16.mxu0 %v4072_v0 }
  0x43   : > { %3457 = vmatmul.mubr.msk.bf16.gmra.mrb[20].mxu0 %vm531_vm0, %v3854_v26 }
  0x8f   : > { %v424_v27 = vpop.permute.xlu0 %423  ;;  %v434_v36 = vpop.permute.xlu1 %433 }
  0x93   : > { %v429_v31 = vpop.permute.xlu0 %428 }
  0x94   : > { %v439_v47 = vpop.permute.xlu1 %438 }
  0x97   : > { %v444_v58 = vpop.permute.xlu0 %443 }
  0x98   : > { %v449_v63 = vpop.permute.xlu1 %448 }
  0x9b   : > { %v454_v11 = vpop.permute.xlu0 %453 }
  0x9c   : > { %v459_v16 = vpop.permute.xlu1 %458 }
  0xee   : > { %v584_v28 = vpop.f32.mrb[0].mxu0 }
  0xef   : > { %v585_v29 = vadd.f32 %v584_v28, %v424_v27  ;;  %v586_v30 = vpop.f32.mrb[1].mxu0 }
  0xf0   : > { %v587_v32 = vadd.f32 %v586_v30, %v424_v27  ;;  %v588_v33 = vpop.f32.mrb[2].mxu0  ;;  %v464_v27 = vpop.permute.xlu0 %463 }
  0xf1   : > { %v589_v34 = vadd.f32 %v588_v33, %v429_v31  ;;  %v590_v35 = vpop.f32.mrb[3].mxu0  ;;  %v643_v38 = vmax.f32 %v585_v29, 0.0 }
  0xf2   : > { %v591_v37 = vadd.f32 %v590_v35, %v429_v31  ;;  %v644_v40 = vmax.f32 %v587_v32, 0.0  ;;  %v469_v32 = vpop.permute.xlu1 %468 }
  0xf3   : > { %v645_v39 = vmax.f32 %v589_v34, 0.0 }
  0xf4   : > { %v646_v41 = vmax.f32 %v591_v37, 0.0 }
  0xf5   : > { %v672_v42 = vpack.c.bf16 %v645_v39, %v643_v38 }
  0xf6   : > { %v594_v43 = vpop.f32.mrb[4].mxu0  ;;  %v673_v44 = vpack.c.bf16 %v646_v41, %v644_v40 }
  0xf7   : > { %v595_v45 = vadd.f32 %v594_v43, %v434_v36  ;;  %v596_v46 = vpop.f32.mrb[5].mxu0  ;;  %v474_v43 = vpop.permute.xlu0 %473 }
  0xf8   : > { %v597_v48 = vadd.f32 %v596_v46, %v434_v36  ;;  %v598_v49 = vpop.f32.mrb[6].mxu0  ;;  %737 = vmatprep.subr.bf16.mxu1 %v673_v44 }
  0xf9   : > { %v599_v50 = vadd.f32 %v598_v49, %v439_v47  ;;  %v600_v51 = vpop.f32.mrb[7].mxu0  ;;  %738 = vmatpush1.bf16.msra.mxu1 %v672_v42  ;;  %v647_v53 = vmax.f32 %v595_v45, 0.0 }
  0xfa   : > { %v601_v52 = vadd.f32 %v600_v51, %v439_v47  ;;  %v648_v55 = vmax.f32 %v597_v48, 0.0  ;;  %v479_v48 = vpop.permute.xlu1 %478 }
  0xfb   : > { %v649_v54 = vmax.f32 %v599_v50, 0.0 }
  0xfc   : > { %v650_v56 = vmax.f32 %v601_v52, 0.0 }
  0xfd   : > { %v674_v57 = vpack.c.bf16 %v649_v54, %v647_v53 }
  0xfe   : > { %v675_v59 = vpack.c.bf16 %v650_v56, %v648_v55  ;;  %v604_v60 = vpop.f32.mrb[8].mxu0 }
  0xff   : > { %v605_v61 = vadd.f32 %v604_v60, %v444_v58  ;;  %v606_v62 = vpop.f32.mrb[9].mxu0  ;;  %v3855_v60 = vld [vmem:[%s7825_s6] sm:$0xff]  }
 0x100   : > { %v607_v1 = vadd.f32 %v606_v62, %v444_v58  ;;  %v608_v2 = vpop.f32.mrb[10].mxu0  ;;  %739 = vmatprep.subr.bf16.mxu1 %v675_v59  ;;  %v3857_v62 = vld [vmem:[%s7825_s6 + $0x10] ss:$0 sps:$4 sm:$0xff]  }
 0x101   : > { %v609_v3 = vadd.f32 %v608_v2, %v449_v63  ;;  %v610_v4 = vpop.f32.mrb[11].mxu0  ;;  %740 = vmatpush1.bf16.msra.mxu1 %v674_v57  ;;  %v651_v6 = vmax.f32 %v605_v61, 0.0  ;;  %v3856_v61 = vld [vmem:[%s7825_s6 + $0x8] sm:$0xff]  }
 0x102   : > { %v611_v5 = vadd.f32 %v610_v4, %v449_v63  ;;  %v652_v8 = vmax.f32 %v607_v1, 0.0  ;;  %v692_v63 = vpop.permute.xlu0 %691  ;;  %v697_v4 = vpop.permute.xlu1 %696 }
 0x103   : > { %v653_v7 = vmax.f32 %v609_v3, 0.0 }
 0x104   : > { %v654_v9 = vmax.f32 %v611_v5, 0.0 }
 0x105   : > { %v676_v10 = vpack.c.bf16 %v653_v7, %v651_v6 }
 0x106   : > { %v677_v12 = vpack.c.bf16 %v654_v9, %v652_v8  ;;  %v614_v13 = vpop.f32.mrb[12].mxu0 }
 0x107   : > { %v615_v14 = vadd.f32 %v614_v13, %v454_v11  ;;  %v616_v15 = vpop.f32.mrb[13].mxu0 }
 0x108   : > { %v617_v17 = vadd.f32 %v616_v15, %v454_v11  ;;  %v618_v18 = vpop.f32.mrb[14].mxu0  ;;  %741 = vmatprep.subr.bf16.mxu1 %v677_v12  ;;  %v702_v15 = vpop.permute.xlu0 %701 }
 0x109   : > { %v619_v19 = vadd.f32 %v618_v18, %v459_v16  ;;  %v620_v20 = vpop.f32.mrb[15].mxu0  ;;  %742 = vmatpush1.bf16.msra.mxu1 %v676_v10  ;;  %v655_v22 = vmax.f32 %v615_v14, 0.0 }
 0x10a   : > { %v621_v21 = vadd.f32 %v620_v20, %v459_v16  ;;  %v656_v24 = vmax.f32 %v617_v17, 0.0  ;;  %v707_v20 = vpop.permute.xlu1 %706 }
 0x10b   : > { %v657_v23 = vmax.f32 %v619_v19, 0.0 }
 0x10c   : > { %v658_v25 = vmax.f32 %v621_v21, 0.0 }
 0x10d   : > { %v678_v26 = vpack.c.bf16 %v657_v23, %v655_v22 }
 0x10e   : > { %v679_v28 = vpack.c.bf16 %v658_v25, %v656_v24  ;;  %v624_v29 = vpop.f32.mrb[16].mxu0 }
 0x10f   : > { %v625_v30 = vadd.f32 %v624_v29, %v464_v27  ;;  %v626_v31 = vpop.f32.mrb[17].mxu0 }
 0x110   : > { %v627_v33 = vadd.f32 %v626_v31, %v464_v27  ;;  %v628_v34 = vpop.f32.mrb[18].mxu0  ;;  %743 = vmatprep.subr.bf16.mxu1 %v679_v28 }
 0x111   : > { %v629_v35 = vadd.f32 %v628_v34, %v469_v32  ;;  %v630_v36 = vpop.f32.mrb[19].mxu0  ;;  %744 = vmatpush1.bf16.msra.mxu1 %v678_v26  ;;  %v659_v38 = vmax.f32 %v625_v30, 0.0 }
 0x112   : > { %v631_v37 = vadd.f32 %v630_v36, %v469_v32  ;;  %v660_v40 = vmax.f32 %v627_v33, 0.0 }
 0x113   : > { %v661_v39 = vmax.f32 %v629_v35, 0.0 }
 0x114   : > { %v662_v41 = vmax.f32 %v631_v37, 0.0 }
 0x115   : > { %v680_v42 = vpack.c.bf16 %v661_v39, %v659_v38 }
 0x116   : > { %v681_v44 = vpack.c.bf16 %v662_v41, %v660_v40  ;;  %v634_v45 = vpop.f32.mrb[20].mxu0 }
 0x117   : > { %v635_v46 = vadd.f32 %v634_v45, %v474_v43  ;;  %v636_v47 = vpop.f32.mrb[21].mxu0 }
 0x118   : > { %v637_v49 = vadd.f32 %v636_v47, %v474_v43  ;;  %v638_v50 = vpop.f32.mrb[22].mxu0  ;;  %745 = vmatprep.subr.bf16.mxu1 %v681_v44 }
 0x119   : > { %v639_v51 = vadd.f32 %v638_v50, %v479_v48  ;;  %v640_v52 = vpop.f32.mrb[23].mxu0  ;;  %746 = vmatpush1.bf16.msra.mxu1 %v680_v42  ;;  %v663_v54 = vmax.f32 %v635_v46, 0.0 }
 0x11a   : > { %v641_v53 = vadd.f32 %v640_v52, %v479_v48  ;;  %v664_v56 = vmax.f32 %v637_v49, 0.0 }
 0x11b   : > { %v665_v55 = vmax.f32 %v639_v51, 0.0 }
 0x11c   : > { %v666_v57 = vmax.f32 %v641_v53, 0.0 }
 0x11d   : > { %v682_v58 = vpack.c.bf16 %v665_v55, %v663_v54 }
 0x11e   : > { %v683_v59 = vpack.c.bf16 %v666_v57, %v664_v56 }
 0x120   : > { %747 = vmatprep.subr.bf16.mxu1 %v683_v59 }
 0x121   : > { %748 = vmatpush1.bf16.msra.mxu1 %v682_v58 }
 0x124   : > { %3461 = vmatmul.mubr.msk.bf16.vlgmr.msra.gmra.mrb[0].mxu1 %vm727_vm1, %v3855_v60 }
 0x125   : > { %779 = vmatprep.mubr.bf16.mxu1 %v4072_v0 }
 0x12c   : > { %3462 = vmatmul.mubr.msk.bf16.gmra.mrb[4].mxu1 %vm727_vm1, %v3856_v61 }
 0x12d   : > { %789 = vmatprep.mubr.bf16.mxu1 %v4072_v0 }
 0x134   : > { %3463 = vmatmul.mubr.msk.bf16.gmra.mrb[8].mxu1 %vm727_vm1, %v3857_v62  ;;  %v874_v62 = vld [vmem:[%s4237_s11 + $0x80] sm:$0xff] }
 0x135   : > { %1112 = vmatprep.mubr.bf16.mxu1 %v4072_v0 }
 0x1f7   : > { %v771_v1 = vpop.f32.mrb[0].mxu1 }
 0x1f8   : > { %v772_v2 = vadd.f32 %v771_v1, %v692_v63  ;;  %v773_v3 = vpop.f32.mrb[1].mxu1  ;;  %v858_v1 = vld [vmem:[%s4237_s11] sm:$0xff] }
 0x1f9   : > { %v774_v5 = vadd.f32 %v773_v3, %v692_v63  ;;  %v775_v6 = vpop.f32.mrb[2].mxu1  ;;  %v906_v63 = vcvt.s32.f32 %v874_v62  ;;  %v890_v3 = vcvt.s32.f32 %v858_v1  ;;  %v887_v1 = vld [vmem:[%s4237_s11 + $0xe8] sm:$0xff] }
 0x1fa   : > { %v776_v7 = vadd.f32 %v775_v6, %v697_v4  ;;  %v777_v8 = vpop.f32.mrb[3].mxu1  ;;  %v798_v10 = vmul.f32 %v772_v2, %v772_v2  ;;  %v876_v6 = vld [vmem:[%s4237_s11 + $0x90] sm:$0xff] }
 0x1fb   : > { %v778_v9 = vadd.f32 %v777_v8, %v697_v4  ;;  %v799_v12 = vmul.f32 %v774_v5, %v774_v5 }
 0x1fc   : > { %v800_v11 = vmul.f32 %v776_v7, %v776_v7 }
 0x1fd   : > { %v801_v13 = vmul.f32 %v778_v9, %v778_v9 }
 0x1fe   : > { %v806_v14 = vadd.f32 %v800_v11, %v798_v10  ;;  %v908_v10 = vcvt.s32.f32 %v876_v6  ;;  %v872_v6 = vld [vmem:[%s4237_s11 + $0x70] sm:$0xff] }
 0x1ff   : > { %v815_v16 = vadd.f32 %v801_v13, %v799_v12  ;;  %v781_v17 = vpop.f32.mrb[4].mxu1  ;;  %v860_v12 = vld [vmem:[%s4237_s11 + $0x10] sm:$0xff]  ;;  %v859_v13 = vld [vmem:[%s4237_s11 + $0x8] sm:$0xff] }
 0x200   : > { %v782_v18 = vadd.f32 %v781_v17, %v702_v15  ;;  %v783_v19 = vpop.f32.mrb[5].mxu1  ;;  %v877_v17 = vld [vmem:[%s4237_s11 + $0x98] sm:$0xff] }
 0x201   : > { %v784_v21 = vadd.f32 %v783_v19, %v702_v15  ;;  %v785_v22 = vpop.f32.mrb[6].mxu1  ;;  %v891_v15 = vcvt.s32.f32 %v859_v13  ;;  %v909_v19 = vcvt.s32.f32 %v877_v17 }
 0x202   : > { %v802_v23 = vmul.f32 %v782_v18, %v782_v18  ;;  %v786_v24 = vadd.f32 %v785_v22, %v707_v20  ;;  %v787_v25 = vpop.f32.mrb[7].mxu1 }
 0x203   : > { %v803_v26 = vmul.f32 %v784_v21, %v784_v21  ;;  %v788_v27 = vadd.f32 %v787_v25, %v707_v20  ;;  %v862_v20 = vld [vmem:[%s4237_s11 + $0x20] sm:$0xff]  ;;  %v879_v25 = vld [vmem:[%s4237_s11 + $0xa8] sm:$0xff] }
 0x204   : > { %v807_v28 = vadd.f32 %v806_v14, %v802_v23  ;;  %v804_v29 = vmul.f32 %v786_v24, %v786_v24  ;;  %v892_v14 = vcvt.s32.f32 %v860_v12  ;;  %v894_v22 = vcvt.s32.f32 %v862_v20  ;;  %v873_v12 = vld [vmem:[%s4237_s11 + $0x78] sm:$0xff] }
 0x205   : > { %v816_v30 = vadd.f32 %v815_v16, %v803_v26  ;;  %v805_v31 = vmul.f32 %v788_v27, %v788_v27  ;;  %v878_v16 = vld [vmem:[%s4237_s11 + $0xa0] sm:$0xff]  ;;  %v905_v13 = vcvt.s32.f32 %v873_v12 }
 0x206   : > { %v808_v32 = vadd.f32 %v807_v28, %v804_v29  ;;  %v864_v28 = vld [vmem:[%s4237_s11 + $0x30] sm:$0xff]  ;;  %v863_v29 = vld [vmem:[%s4237_s11 + $0x28] sm:$0xff] }
 0x207   : > { %v817_v33 = vadd.f32 %v816_v30, %v805_v31  ;;  %v926_v30 = vlaneseq  ;;  %v896_v31 = vcvt.s32.f32 %v864_v28 }
 0x208   : > { %v809_v34 = vrot.slane %v808_v32, 4 }
 0x209   : > { %v818_v35 = vrot.slane %v817_v33, 4  ;;  %vm4268_vm2 = vcmp.lt.s32.totalorder %v926_v30, 256 }
 0x20a   : > { %v810_v36 = vadd.f32 %v809_v34, %v808_v32  ;;  %v895_v32 = vcvt.s32.f32 %v863_v29  ;;  %v856_v34 = vld [vmem:[%s380_s20] sm:$0x3] }
 0x20b   : > { %v819_v37 = vadd.f32 %v818_v35, %v817_v33  ;;  %v852_v33 = vld [vmem:[%s376_s17] sm:$0x3] }
 0x20c   : > { %v811_v38 = vrot.slane %v810_v36, 2  ;;  %vm853_vm3 = vcmp.eq.s32.totalorder %v852_v33, 1 }
 0x20d   : > { %v820_v39 = vrot.slane %v819_v37, 2 }
 0x20e   : > { %v812_v40 = vadd.f32 %v811_v38, %v810_v36  ;;  %v882_v36 = vld [vmem:[%s4237_s11 + $0xc0] sm:$0xff]  ;;  %v857_v38 = vcvt.s32.f32 %v856_v34 }
 0x20f   : > { %v821_v41 = vadd.f32 %v820_v39, %v819_v37  ;;  %v881_v37 = vld [vmem:[%s4237_s11 + $0xb8] sm:$0xff]  ;;  %v7831_v39 = vmov 0.0  }
 0x210   : > { %v813_v42 = vrot.slane %v812_v40, 1  ;;  %930 = vst.msk [vmem:[#allocation3] ss:$8 sm:$0x3] %vm4268_vm2, %v857_v38 }
 0x211   : > { %v822_v43 = vrot.slane %v821_v41, 1 }
 0x212   : > { %v814_v44 = vadd.f32 %v813_v42, %v812_v40  ;;  %v4275_v40 = vsel %vm853_vm3, 1.0, %v7831_v39  ;;  %v913_v42 = vcvt.s32.f32 %v881_v37  ;;  %v4323_v37 = vshrl.u32 %v926_v30, 7 }
 0x213   : > { %v823_v45 = vadd.f32 %v822_v43, %v821_v41  ;;  %7960 = vst [vmem:[#allocation4_spill] sm:$0xff] %v4275_v40  ;;  %933 = vst.msk [vmem:[#allocation3 + $0x1] ss:$8 sm:$0x3] %vm4268_vm2, %v4275_v40  ;;  %v914_v41 = vcvt.s32.f32 %v882_v36  ;;  %v866_v43 = vld [vmem:[%s4237_s11 + $0x40] sm:$0xff] }
 0x214   : > { %v824_v46 = vmax.f32 %v814_v44, 1e-24  ;;  %v865_v44 = vld [vmem:[%s4237_s11 + $0x38] sm:$0xff] }
 0x215   : > { %v825_v47 = vmax.f32 %v823_v45, 1e-24  ;;  %v898_v45 = vcvt.s32.f32 %v866_v43 }
 0x216   : > { %3858 = vrsqrt.f32 %v824_v46  ;;  %v897_v46 = vcvt.s32.f32 %v865_v44 }
 0x217   : > { %3860 = vrsqrt.f32 %v825_v47  ;;  %v884_v47 = vld [vmem:[%s4237_s11 + $0xd0] sm:$0xff] }
 0x220   : > { %v3859_v48 = vpop.eup %3858 }
 0x221   : > { %v3861_v49 = vpop.eup %3860  ;;  %v832_v50 = vmul.f32 %v3859_v48, %v782_v18  ;;  %v834_v51 = vmul.f32 %v3859_v48, %v786_v24  ;;  %v828_v52 = vmul.f32 %v3859_v48, %v772_v2  ;;  %v830_v53 = vmul.f32 %v3859_v48, %v776_v7  ;;  %v4241_v2 = vpop.f32.mrb[8].mxu1  ;;  %v875_v7 = vld [vmem:[%s4237_s11 + $0x88] sm:$0xff]  ;;  %v880_v24 = vld [vmem:[%s4237_s11 + $0xb0] sm:$0xff] }
 0x222   : > { %v835_v54 = vmul.f32 %v3861_v49, %v788_v27  ;;  %v829_v55 = vmul.f32 %v3861_v49, %v774_v5  ;;  %v831_v56 = vmul.f32 %v3861_v49, %v778_v9  ;;  %v833_v57 = vmul.f32 %v3861_v49, %v784_v21  ;;  %v4243_v4 = vpop.f32.mrb[9].mxu1  ;;  %v688_v5 = vld [vmem:[%s7826_s7 + $0x20] sm:$0xff]  ;;  %v861_v21 = vld [vmem:[%s4237_s11 + $0x18] sm:$0xff]  ;;  %v883_v48 = vld [vmem:[%s4237_s11 + $0xc8] sm:$0xff] }
 0x223   : > { %v838_v58 = vpack.c.bf16 %v834_v51, %v832_v50  ;;  %v836_v59 = vpack.c.bf16 %v830_v53, %v828_v52  ;;  %v795_v8 = vpop.f32.mrb[10].mxu1  ;;  %v907_v11 = vcvt.s32.f32 %v875_v7  ;;  %v910_v18 = vcvt.s32.f32 %v878_v16  ;;  %v868_v51 = vld [vmem:[%s4237_s11 + $0x50] sm:$0xff]  ;;  %v867_v52 = vld [vmem:[%s4237_s11 + $0x48] sm:$0xff] }
 0x224   : > { %v837_v60 = vpack.c.bf16 %v831_v56, %v829_v55  ;;  %v839_v61 = vpack.c.bf16 %v835_v54, %v833_v57  ;;  %v796_v9 = vpop.f32.mrb[11].mxu1  ;;  %v893_v23 = vcvt.s32.f32 %v861_v21  ;;  %v912_v26 = vcvt.s32.f32 %v880_v24  ;;  %v886_v55 = vld [vmem:[%s4237_s11 + $0xe0] sm:$0xff]  ;;  %v885_v56 = vld [vmem:[%s4237_s11 + $0xd8] sm:$0xff]  ;;  %v871_v7 = vld [vmem:[%s4237_s11 + $0x68] sm:$0xff] }
 0x225   : > { %1000 = vxpose.xlu0.c.b16.start [1/2] (short) %v836_v59, 128  ;;  %v911_v27 = vcvt.s32.f32 %v879_v25  ;;  %v916_v49 = vcvt.s32.f32 %v884_v47  ;;  %v915_v50 = vcvt.s32.f32 %v883_v48  ;;  %v900_v53 = vcvt.s32.f32 %v868_v51 }
 0x226   : > { %1016 = vxpose.xlu1.c.b16.start [1/2] (short) %v837_v60, 128  ;;  %1080 = vmatprep.subr.bf16.mxu1 %v837_v60  ;;  %v899_v54 = vcvt.s32.f32 %v867_v52  ;;  %v918_v57 = vcvt.s32.f32 %v886_v55  ;;  %v869_v60 = vld [vmem:[%s4237_s11 + $0x58] sm:$0xff]  ;;  %v904_v8 = vcvt.s32.f32 %v872_v6  ;;  %v903_v9 = vcvt.s32.f32 %v871_v7 }
 0x227   : > { %1081 = vmatpush1.bf16.msra.mxu1 %v836_v59  ;;  %v870_v59 = vld [vmem:[%s4237_s11 + $0x60] sm:$0xff]  ;;  %v901_v62 = vcvt.s32.f32 %v869_v60  ;;  %v4329_v48 = vsub.s32 1, %v4323_v37 }
 0x228   : > { %1082 = vmatprep.subr.bf16.mxu1 %v839_v61 }
 0x229   : > { %1001 = vxpose.xlu0.c.b16.end [2/2] (short) %v838_v58, 128  ;;  %7961 = vst [vmem:[#allocation5_spill] sm:$0xff] %v4329_v48 }
 0x22a   : > { %1017 = vxpose.xlu1.c.b16.end [2/2] (short) %v839_v61, 128  ;;  %v902_v61 = vcvt.s32.f32 %v870_v59 }
 0x22b   : > { %1083 = vmatpush1.bf16.msra.mxu1 %v838_v58  ;;  %v917_v58 = vcvt.s32.f32 %v885_v56 }
 0x246   : > { %1759 = vperm.xlu1 %3842, %v906_v63   ;;  %v888_v63 = vld [vmem:[%s4237_s11 + $0xf0] sm:$0xff] }
 0x24a   : > { %1679 = vperm.xlu1 %3842, %v890_v3   ;;  %711 = vperm.xlu0 %3841, %v688_v5   ;;  %v920_v3 = vcvt.s32.f32 %v888_v63  ;;  %v919_v5 = vcvt.s32.f32 %v887_v1 }
 0x24e   : > { %1769 = vperm.xlu1 %3842, %v908_v10   ;;  %1764 = vperm.xlu0 %3841, %v907_v11   ;;  %v889_v10 = vld [vmem:[%s4237_s11 + $0xf8] sm:$0xff] }
 0x24f   : > { %v921_v11 = vcvt.s32.f32 %v889_v10 }
 0x252   : > { %1689 = vperm.xlu1 %3842, %v892_v14   ;;  %1684 = vperm.xlu0 %3841, %v891_v15  }
 0x256   : > { %1779 = vperm.xlu1 %3842, %v910_v18   ;;  %1774 = vperm.xlu0 %3841, %v909_v19  }
 0x25a   : > { %1699 = vperm.xlu1 %3842, %v894_v22   ;;  %1694 = vperm.xlu0 %3841, %v893_v23  }
 0x25e   : > { %1789 = vperm.xlu1 %3842, %v912_v26   ;;  %1784 = vperm.xlu0 %3841, %v911_v27  }
 0x262   : > { %1709 = vperm.xlu1 %3842, %v896_v31   ;;  %1704 = vperm.xlu0 %3841, %v895_v32  }
 0x266   : > { %1799 = vperm.xlu1 %3842, %v914_v41   ;;  %1794 = vperm.xlu0 %3841, %v913_v42  }
 0x26a   : > { %1719 = vperm.xlu1 %3842, %v898_v45   ;;  %1714 = vperm.xlu0 %3841, %v897_v46  }
 0x26e   : > { %1809 = vperm.xlu1 %3842, %v916_v49   ;;  %1804 = vperm.xlu0 %3841, %v915_v50  }
 0x272   : > { %1729 = vperm.xlu1 %3842, %v900_v53   ;;  %1724 = vperm.xlu0 %3841, %v899_v54  }
 0x276   : > { %1819 = vperm.xlu1 %3842, %v918_v57   ;;  %1814 = vperm.xlu0 %3841, %v917_v58  }
 0x27a   : > { %1739 = vperm.xlu1 %3842, %v902_v61   ;;  %1734 = vperm.xlu0 %3841, %v901_v62  }
 0x27e   : > { %1829 = vperm.xlu1 %3842, %v920_v3   ;;  %1824 = vperm.xlu0 %3841, %v919_v5   ;;  %v4369_v5 = vsub.s32 0, %v4323_v37 }
 0x280   : > { %7969 = vst [vmem:[#allocation13_spill] sm:$0xff] %v4369_v5 }
 0x282   : > { %1749 = vperm.xlu1 %3842, %v904_v8   ;;  %1744 = vperm.xlu0 %3841, %v903_v9  }
 0x286   : > { %1834 = vperm.xlu0 %3841, %v921_v11  }
 0x28a   : > { %1754 = vperm.xlu0 %3841, %v905_v13   ;;  %v4384_v13 = vand.u32 127, %v926_v30  ;;  %v2226_v30 = vsub.s32 2, %v4323_v37 }
 0x28b   : > { %v1008_v14 = vpop.trf.xlu0 }
 0x28c   : > { %3467 = vmatmul.mubr.msk.bf16.vlgmr.msra.gmra.mrb[12].mxu1 %vm531_vm0, %v1008_v14  ;;  %v1024_v25 = vpop.trf.xlu1  ;;  %vm2096_vm14 = vcmp.ne.s32.totalorder %v4323_v37, %v4384_v13 }
 0x28d   : > { %1122 = vmatprep.mubr.bf16.mxu1 %v4072_v0 }
 0x28f   : > { %v1009_v15 = vpop.trf.xlu0 }
 0x290   : > { %v1025_v28 = vpop.trf.xlu1 }
 0x293   : > { %v1010_v16 = vpop.trf.xlu0 }
 0x294   : > { %3468 = vmatmul.mubr.msk.bf16.gmra.mrb[16].mxu1 %vm531_vm0, %v1009_v15  ;;  %v1026_v33 = vpop.trf.xlu1 }
 0x295   : > { %1132 = vmatprep.mubr.bf16.mxu1 %v4072_v0 }
 0x297   : > { %v1011_v17 = vpop.trf.xlu0 }
 0x298   : > { %v1027_v38 = vpop.trf.xlu1 }
 0x29b   : > { %v1012_v18 = vpop.trf.xlu0 }
 0x29c   : > { %3469 = vmatmul.mubr.msk.bf16.gmra.mrb[20].mxu1 %vm531_vm0, %v1010_v16  ;;  %v1028_v46 = vpop.trf.xlu1 }
 0x29d   : > { %1142 = vmatprep.mubr.bf16.mxu1 %v4072_v0 }
 0x29f   : > { %v1013_v19 = vpop.trf.xlu0 }
 0x2a0   : > { %v1029_v51 = vpop.trf.xlu1 }
 0x2a3   : > { %v1014_v20 = vpop.trf.xlu0 }
 0x2a4   : > { %3470 = vmatmul.mubr.msk.bf16.gmra.mrb[24].mxu1 %vm531_vm0, %v1011_v17  ;;  %v1030_v52 = vpop.trf.xlu1 }
 0x2a5   : > { %1152 = vmatprep.mubr.bf16.mxu1 %v4072_v0 }
 0x2a7   : > { %v1015_v21 = vpop.trf.xlu0 }
 0x2a8   : > { %v1031_v35 = vpop.trf.xlu1 }
 0x2ac   : > { %3471 = vmatmul.mubr.msk.bf16.gmra.mrb[28].mxu1 %vm531_vm0, %v1012_v18 }
 0x2ad   : > { %1162 = vmatprep.mubr.bf16.mxu1 %v4072_v0 }
 0x2b4   : > { %3472 = vmatmul.mubr.msk.bf16.gmra.mrb[32].mxu1 %vm531_vm0, %v1013_v19  ;;  %v4393_v19 = vadd.s32 8, %v4323_v37 }
 0x2b5   : > { %1172 = vmatprep.mubr.bf16.mxu1 %v4072_v0 }
 0x2b6   : > { %vm2098_vm1 = vcmp.ne.s32.totalorder %v4393_v19, %v4384_v13 }
 0x2bc   : > { %3473 = vmatmul.mubr.msk.bf16.gmra.mrb[36].mxu1 %vm531_vm0, %v1014_v20 }
 0x2bd   : > { %1182 = vmatprep.mubr.bf16.mxu1 %v4072_v0 }
 0x2c4   : > { %3474 = vmatmul.mubr.msk.bf16.gmra.mrb[40].mxu1 %vm531_vm0, %v1015_v21  ;;  %v7991_v21 = vmov 0 }
 0x2c5   : > { %1192 = vmatprep.mubr.bf16.mxu1 %v4072_v0  ;;  %v4348_v53 = vpop.permute.xlu1 %1759 }
 0x2c9   : > { %v712_v22 = vpop.permute.xlu0 %711  ;;  %v1680_v55 = vpop.permute.xlu1 %1679 }
 0x2ca   : > { %v792_v23 = vadd.f32 %v4241_v2, %v712_v22  ;;  %v794_v24 = vadd.f32 %v4243_v4, %v712_v22  ;;  %v4074_v4 = vmov 1966171168  }
 0x2cb   : > { %v939_v34 = vunpack.c.l.s4 %v4074_v4 }
 0x2cc   : > { %v3464_v26 = vmul.f32 -1.442695, %v792_v23  ;;  %v3465_v27 = vmul.f32 -1.442695, %v794_v24  ;;  %3475 = vmatmul.mubr.msk.bf16.gmra.mrb[44].mxu1 %vm531_vm0, %v1024_v25 }
 0x2cd   : > { %1202 = vmatprep.mubr.bf16.mxu1 %v4072_v0  ;;  %v940_v36 = vunpack.c.0.s8 %v939_v34  ;;  %v4350_v54 = vpop.permute.xlu0 %1764  ;;  %v4354_v57 = vpop.permute.xlu1 %1769 }
 0x2ce   : > { %3862 = vpow2.f32 %v3464_v26  ;;  %7964 = vst [vmem:[#allocation8_spill] sm:$0xff] %v4350_v54  ;;  %7965 = vst [vmem:[#allocation9_spill] sm:$0xff] %v4354_v57 }
 0x2cf   : > { %3864 = vpow2.f32 %v3465_v27  ;;  %v943_v42 = vsub.s32 %v940_v36, %v4323_v37 }
 0x2d1   : > { %v4352_v56 = vpop.permute.xlu0 %1684  ;;  %v4358_v59 = vpop.permute.xlu1 %1689 }
 0x2d4   : > { %3476 = vmatmul.mubr.msk.bf16.gmra.mrb[48].mxu1 %vm531_vm0, %v1025_v28  ;;  %v4990_v28 = vadd.s32 200, %v4323_v37 }
 0x2d5   : > { %1212 = vmatprep.mubr.bf16.mxu1 %v4072_v0  ;;  %v4356_v58 = vpop.permute.xlu0 %1774  ;;  %v4362_v61 = vpop.permute.xlu1 %1779 }
 0x2d6   : > { %7966 = vst [vmem:[#allocation10_spill] sm:$0xff] %v4356_v58  ;;  %7967 = vst [vmem:[#allocation11_spill] sm:$0xff] %v4362_v61 }
 0x2d7   : > { %8055 = vst [vmem:[#allocation34_spill] sm:$0xff] %v4990_v28 }
 0x2d8   : > { %v3863_v29 = vpop.eup %3862 }
 0x2d9   : > { %v3865_v31 = vpop.eup %3864  ;;  %v846_v32 = vadd.f32 1.0, %v3863_v29  ;;  %v4360_v60 = vpop.permute.xlu0 %1694 }
 0x2da   : > { %v847_v2 = vadd.f32 1.0, %v3865_v31  ;;  %v4366_v3 = vpop.permute.xlu1 %1699 }
 0x2db   : > { %3866 = vrcp.f32 %v846_v32 }
 0x2dc   : > { %3868 = vrcp.f32 %v847_v2  ;;  %3477 = vmatmul.mubr.msk.bf16.gmra.mrb[52].mxu1 %vm531_vm0, %v1026_v33 }
 0x2dd   : > { %1222 = vmatprep.mubr.bf16.mxu1 %v4072_v0  ;;  %v4364_v63 = vpop.permute.xlu0 %1784 }
 0x2de   : > { %7968 = vst [vmem:[#allocation12_spill] sm:$0xff] %v4364_v63  ;;  %v4380_v10 = vpop.permute.xlu1 %1789 }
 0x2df   : > { %7970 = vst [vmem:[#allocation14_spill] sm:$0xff] %v4380_v10 }
 0x2e1   : > { %v4375_v8 = vpop.permute.xlu0 %1704 }
 0x2e2   : > { %v4424_v31 = vpop.permute.xlu1 %1709 }
 0x2e4   : > { %3478 = vmatmul.mubr.msk.bf16.gmra.mrb[56].mxu1 %vm531_vm0, %v1027_v38  ;;  %v4457_v38 = vadd.s32 16, %v4323_v37 }
 0x2e5   : > { %v3867_v41 = vpop.eup %3866  ;;  %1232 = vmatprep.mubr.bf16.mxu1 %v4072_v0  ;;  %v4408_v26 = vpop.permute.xlu0 %1794 }
 0x2e6   : > { %v3869_v43 = vpop.eup %3868  ;;  %7973 = vst [vmem:[#allocation15_spill] sm:$0xff] %v4408_v26 }
 0x2e7   : > { %v937_v44 = vcombine.low %v3867_v41, %v3869_v43 }
 0x2e9   : > { %v944_v45 = vrot.slane %v937_v44, %v943_v42 }
 0x2eb   : > { %v951_v47 = vrot.slane %v944_v45, %v943_v42  ;;  %v8067_v45 = vmov 0 }
 0x2ec   : > { %3479 = vmatmul.mubr.msk.bf16.gmra.mrb[60].mxu1 %vm531_vm0, %v1028_v46 }
 0x2ed   : > { %954 = vst.msk [vmem:[#allocation3 + $0x2] ss:$8 sm:$0x3] %vm4268_vm2, %v951_v47  ;;  %v4335_v49 = vmul.f32 %v4275_v40, %v951_v47  ;;  %1242 = vmatprep.mubr.bf16.mxu1 %v4072_v0 }
 0x2ef   : > { %7962 = vst [vmem:[#allocation6_spill] sm:$0xff] %v4335_v49  ;;  %v4340_v50 = vrot.slane %v4335_v49, %v4329_v48 }
 0x2f1   : > { %7963 = vst [vmem:[#allocation7_spill] sm:$0xff] %v4340_v50  ;;  %3044 = vmatprep.mubr.f32.mxu0 %v4340_v50 }
 0x2f4   : > { %3480 = vmatmul.mubr.msk.bf16.gmra.mrb[64].mxu1 %vm531_vm0, %v1029_v51  ;;  %v996_v62 = vld [vmem:[#allocation3] sm:$0x7]  ;;  %v997_v1 = vld [vmem:[#allocation3 + $0x8] sm:$0x7] }
 0x2f5   : > { %1252 = vmatprep.mubr.bf16.mxu1 %v4072_v0  ;;  %vm998_vm4 = vcmp.gt.f32.partialorder %v996_v62, 0.5  ;;  %vm999_vm5 = vcmp.gt.f32.partialorder %v997_v1, 0.5  ;;  %v4372_v6 = vrot.slane %v996_v62, %v4369_v5  ;;  %v4378_v9 = vrot.slane %v997_v1, %v4369_v5 }
 0x2f6   : > { %v1465_v7 = vsel %vm998_vm4, 1, %v4072_v0  ;;  %v1466_v11 = vsel %vm999_vm5, 1, %v4072_v0  ;;  %v4437_v33 = vrot.slane %v996_v62, %v2226_v30  ;;  %v4439_v4 = vrot.slane %v997_v1, %v2226_v30 }
 0x2f7   : > { %v1470_v14 = vrot.slane %v1465_v7, %v4329_v48  ;;  %vm1837_vm7 = vcmp.eq.f32.partialorder %v4372_v6, %v1680_v55  ;;  %vm1838_vm10 = vcmp.eq.f32.partialorder %v4378_v9, %v1680_v55  ;;  %vm1839_vm15 = vcmp.eq.f32.partialorder %v4372_v6, %v4352_v56  ;;  %v4505_v7 = vpop.permute.xlu1 %1799 }
 0x2f8   : > { %vm1841_vm5 = vcmp.eq.f32.partialorder %v4372_v6, %v4358_v59  ;;  %v4503_v1 = vadd.s32 24, %v4323_v37  ;;  %7986 = vst [vmem:[#allocation16_spill] sm:$0xff] %v4505_v7  ;;  %v4528_v30 = vadd.s32 32, %v4323_v37 }
 0x2f9   : > { %vm4410_vm12 = vcmp.eq.s32.totalorder %v1470_v14, 1 }
 0x2fc   : > { %3481 = vmatmul.mubr.msk.bf16.gmra.mrb[68].mxu1 %vm531_vm0, %v1030_v52  ;;  %v4493_v52 = vpop.permute.xlu0 %1714 }
 0x2fd   : > { %1262 = vmatprep.mubr.bf16.mxu1 %v4072_v0  ;;  %v1474_v0 = vrot.slane %v1466_v11, %v4329_v48  ;;  %v4631_v11 = vadd.s32 48, %v4323_v37  ;;  %v4666_v48 = vadd.s32 80, %v4323_v37 }
 0x2ff   : > { %vm4433_vm2 = vcmp.eq.s32.totalorder %v1474_v0, 1 }
 0x304   : > { %3482 = vmatmul.mubr.msk.bf16.gmra.mrb[72].mxu1 %vm531_vm0, %v1031_v35 }
 0x35f   : > { %v1114_v12 = vpop.f32.mrb[12].mxu1 }
 0x360   : > { %v4387_v15 = vmul.f32 10.0, %v1114_v12  ;;  %vm1901_vm6 = vcmp.gt.f32.partialorder %v1114_v12, 0.7  ;;  %v1116_v16 = vpop.f32.mrb[13].mxu1 }
 0x361   : > { %v4390_v17 = vmul.f32 10.0, %v1116_v16  ;;  %vm1902_vm8 = vcmp.gt.f32.partialorder %v1116_v16, 0.7  ;;  %v1118_v18 = vpop.f32.mrb[14].mxu1  ;;  %vm4398_vm9 = vmand %vm1837_vm7, %vm1901_vm6  ;;  %vm1842_vm6 = vcmp.eq.f32.partialorder %v4378_v9, %v4358_v59  ;;  %vm1840_vm7 = vcmp.eq.f32.partialorder %v4378_v9, %v4352_v56 }
 0x362   : > { %v1337_v20 = vmul.f32 1.442695, %v4387_v15  ;;  %v4402_v22 = vmul.f32 10.0, %v1118_v18  ;;  %v1120_v23 = vpop.f32.mrb[15].mxu1  ;;  %vm1903_vm11 = vcmp.gt.f32.partialorder %v1118_v18, 0.7  ;;  %vm4415_vm13 = vmand %vm1838_vm10, %vm1902_vm8 }
 0x363   : > { %v1339_v24 = vmul.f32 1.442695, %v4390_v17  ;;  %v4406_v25 = vmul.f32 10.0, %v1120_v23  ;;  %vm2029_vm0 = vmand %vm4398_vm9, %vm4410_vm12  ;;  %vm1904_vm4 = vcmp.gt.f32.partialorder %v1120_v23, 0.7 }
 0x364   : > { %3870 = vpow2.f32 %v1337_v20  ;;  %v1341_v29 = vmul.f32 1.442695, %v4402_v22  ;;  %vm4442_vm3 = vmand %vm1839_vm15, %vm1903_vm11  ;;  %vm1843_vm15 = vcmp.eq.f32.partialorder %v4372_v6, %v4360_v60 }
 0x365   : > { %3872 = vpow2.f32 %v1339_v24  ;;  %v1343_v32 = vmul.f32 1.442695, %v4406_v25  ;;  %vm7829_vm8 = vmand %vm4415_vm13, %vm4433_vm2 }
 0x366   : > { %3874 = vpow2.f32 %v1341_v29  ;;  %vm4467_vm10 = vmand %vm2029_vm0, %vm2096_vm14  ;;  %v2233_v42 = vsel %vm7829_vm8, %v4439_v4, 0.0 }
 0x367   : > { %v1124_v36 = vpop.f32.mrb[16].mxu1  ;;  %3876 = vpow2.f32 %v1343_v32  ;;  %vm4482_vm9 = vmand %vm1840_vm7, %vm1904_vm4  ;;  %v2232_v46 = vsel %vm4467_vm10, %v4437_v33, 0.0  ;;  %v2297_v0 = vmul.f32 %v2233_v42, %v4390_v17 }
 0x368   : > { %v4477_v43 = vmul.f32 10.0, %v1124_v36  ;;  %vm1905_vm11 = vcmp.gt.f32.partialorder %v1124_v36, 0.7  ;;  %v1126_v44 = vpop.f32.mrb[17].mxu1  ;;  %vm2031_vm0 = vmand %vm4442_vm3, %vm4410_vm12  ;;  %v2488_v35 = vadd.f32 %v2233_v42, %v2232_v46  ;;  %v2296_v16 = vmul.f32 %v2232_v46, %v4387_v15  ;;  %v4570_v42 = vpop.permute.xlu0 %1804 }
 0x369   : > { %v4489_v47 = vmul.f32 10.0, %v1126_v44  ;;  %v1128_v51 = vpop.f32.mrb[18].mxu1  ;;  %vm4511_vm4 = vmand %vm1841_vm5, %vm1905_vm11  ;;  %vm1906_vm7 = vcmp.gt.f32.partialorder %v1126_v44, 0.7  ;;  %vm2100_vm5 = vcmp.ne.s32.totalorder %v4457_v38, %v4384_v13  ;;  %7993 = vst [vmem:[#allocation17_spill] sm:$0xff] %v4570_v42  ;;  %v4713_v44 = vadd.s32 120, %v4323_v37 }
 0x36a   : > { %v1345_v55 = vmul.f32 1.442695, %v4477_v43  ;;  %v4500_v56 = vmul.f32 10.0, %v1128_v51  ;;  %v1130_v62 = vpop.f32.mrb[19].mxu1  ;;  %2489 = vadd.xlane.f32.xlu0 %v2488_v35  ;;  %vm7830_vm8 = vmand %vm4482_vm9, %vm4433_vm2  ;;  %vm1907_vm14 = vcmp.gt.f32.partialorder %v1128_v51, 0.7  ;;  %v2360_v24 = vadd.f32 %v2297_v0, %v2296_v16  ;;  %v4589_v35 = vpop.permute.xlu1 %1719 }
 0x36b   : > { %v1347_v12 = vmul.f32 1.442695, %v4489_v47  ;;  %v4516_v14 = vmul.f32 10.0, %v1130_v62  ;;  %vm4538_vm11 = vmand %vm2031_vm0, %vm2098_vm1  ;;  %v2235_v17 = vsel %vm7830_vm8, %v4439_v4, 0.0  ;;  %vm1908_vm3 = vcmp.gt.f32.partialorder %v1130_v62, 0.7 }
 0x36c   : > { %v1349_v18 = vmul.f32 1.442695, %v4500_v56  ;;  %3878 = vpow2.f32 %v1345_v55  ;;  %vm4553_vm1 = vmand %vm1842_vm6, %vm1906_vm7  ;;  %v2234_v23 = vsel %vm4538_vm11, %v4437_v33, 0.0  ;;  %v2299_v34 = vmul.f32 %v2235_v17, %v4406_v25  ;;  %v4670_v50 = vpop.permute.xlu0 %1724 }
 0x36d   : > { %v1351_v20 = vmul.f32 1.442695, %v4516_v14  ;;  %3880 = vpow2.f32 %v1347_v12  ;;  %v7992_v21 = vsel %vm4553_vm1, 4294967295, %v7991_v21  ;;  %vm2033_vm0 = vmand %vm4511_vm4, %vm4410_vm12  ;;  %v2491_v32 = vadd.f32 %v2235_v17, %v2234_v23 }
 0x36e   : > { %v3871_v19 = vpop.eup %3870  ;;  %3882 = vpow2.f32 %v1349_v18  ;;  %v2298_v59 = vmul.f32 %v2234_v23, %v4402_v22  ;;  %vm4576_vm7 = vmand %vm1843_vm15, %vm1907_vm14  ;;  %2361 = vadd.xlane.f32.xlu0 %v2360_v24  ;;  %v4603_v0 = vadd.s32 40, %v4323_v37  ;;  %vm2102_vm14 = vcmp.ne.s32.totalorder %v4503_v1, %v4384_v13 }
 0x36f   : > { %v3873_v29 = vpop.eup %3872  ;;  %v4566_v36 = vpop.f32.mrb[20].mxu1  ;;  %3884 = vpow2.f32 %v1351_v20  ;;  %v1477_v46 = vsel %vm4410_vm12, %v3871_v19, 0.0  ;;  %2492 = vadd.xlane.f32.xlu1 %v2491_v32  ;;  %vm7838_vm15 = vmand %vm4553_vm1, %vm4433_vm2  ;;  %v7996_v20 = vmov 0  ;;  %vm7998_vm4 = vcmp.eq.f32.partialorder %v4378_v9, %v4360_v60 }
 0x370   : > { %v4581_v22 = vmul.f32 10.0, %v4566_v36  ;;  %v4583_v25 = vpop.f32.mrb[21].mxu1  ;;  %v1478_v51 = vsel %vm4433_vm2, %v3873_v29, 0.0  ;;  %v2363_v55 = vadd.f32 %v2299_v34, %v2298_v59  ;;  %v3875_v17 = vpop.eup %3874  ;;  %vm4615_vm8 = vmand %vm2033_vm0, %vm2100_vm5  ;;  %v2237_v19 = vsel %vm7838_vm15, %v4439_v4, 0.0 }
 0x371   : > { %v4596_v12 = vmul.f32 10.0, %v4583_v25  ;;  %v4598_v16 = vpop.f32.mrb[22].mxu1  ;;  %v4600_v18 = vadd.f32 %v1478_v51, %v1477_v46  ;;  %v7997_v20 = vsel %vm4615_vm8, 4294967295, %v7996_v20  ;;  %v3877_v24 = vpop.eup %3876  ;;  %vm4637_vm5 = vmand %vm7998_vm4, %vm1908_vm3  ;;  %v7999_v29 = vmov 0 }
 0x372   : > { %v1353_v23 = vmul.f32 1.442695, %v4581_v22  ;;  %v4628_v38 = vpop.f32.mrb[23].mxu1  ;;  %v8000_v29 = vsel %vm4637_vm5, 4294967295, %v7999_v29  ;;  %v2236_v32 = vsel %vm4615_vm8, %v4437_v33, 0.0  ;;  %v4646_v34 = vadd.s32 56, %v4323_v37  ;;  %vm2035_vm3 = vmand %vm4576_vm7, %vm4410_vm12 }
 0x373   : > { %v1355_v59 = vmul.f32 1.442695, %v4596_v12  ;;  %v4649_v46 = vadd.s32 64, %v4323_v37  ;;  %v2494_v60 = vadd.f32 %v2237_v19, %v2236_v32  ;;  %v4658_v62 = vadd.s32 96, %v4323_v37  ;;  %2364 = vadd.xlane.f32.xlu1 %v2363_v55  ;;  %vm7845_vm0 = vmand %vm4637_vm5, %vm4433_vm2 }
 0x374   : > { %3886 = vpow2.f32 %v1353_v23  ;;  %v4661_v51 = vadd.s32 72, %v4323_v37  ;;  %v2300_v39 = vmul.f32 %v2236_v32, %v4477_v43  ;;  %v2301_v40 = vmul.f32 %v2237_v19, %v4489_v47  ;;  %v4686_v23 = vpop.permute.xlu1 %1809  ;;  %vm4696_vm6 = vmand %vm2035_vm3, %vm2102_vm14 }
 0x375   : > { %3888 = vpow2.f32 %v1355_v59  ;;  %2495 = vadd.xlane.f32.xlu0 %v2494_v60  ;;  %vm1909_vm15 = vcmp.gt.f32.partialorder %v4566_v36, 0.7  ;;  %v1479_v43 = vsel %vm4410_vm12, %v3875_v17, 0.0  ;;  %v1480_v47 = vsel %vm4433_vm2, %v3877_v24, 0.0  ;;  %8001 = vst [vmem:[#allocation18_spill] sm:$0xff] %v4686_v23 }
 0x376   : > { %v4682_v55 = vadd.s32 112, %v4323_v37  ;;  %v3879_v19 = vpop.eup %3878  ;;  %v8002_v17 = vmov 0  ;;  %v2239_v24 = vsel %vm7845_vm0, %v4439_v4, 0.0  ;;  %v2366_v32 = vadd.f32 %v2301_v40, %v2300_v39 }
 0x377   : > { %v8003_v17 = vsel %vm4696_vm6, 4294967295, %v8002_v17  ;;  %v4706_v59 = vpop.f32.mrb[24].mxu1  ;;  %v4708_v1 = vadd.f32 %v1480_v47, %v1479_v43  ;;  %v3881_v60 = vpop.eup %3880  ;;  %v2238_v49 = vsel %vm4696_vm6, %v4437_v33, 0.0  ;;  %v4719_v5 = vmul.f32 10.0, %v4598_v16 }
 0x378   : > { %vm1911_vm7 = vcmp.gt.f32.partialorder %v4598_v16, 0.7  ;;  %v2303_v39 = vmul.f32 %v2239_v24, %v4516_v14  ;;  %v4723_v40 = vpop.f32.mrb[25].mxu1  ;;  %v3883_v43 = vpop.eup %3882  ;;  %vm8004_vm14 = vcmp.eq.f32.partialorder %v4372_v6, %v4366_v3  ;;  %v2497_v23 = vadd.f32 %v2239_v24, %v2238_v49 }
 0x379   : > { %vm4730_vm3 = vmand %vm8004_vm14, %vm1909_vm15  ;;  %v2302_v42 = vmul.f32 %v2238_v49, %v4500_v56  ;;  %v4735_v7 = vpop.f32.mrb[26].mxu1  ;;  %v4740_v14 = vadd.s32 128, %v4323_v37  ;;  %v4743_v36 = vadd.s32 88, %v4323_v37  ;;  %v3885_v26 = vpop.eup %3884  ;;  %vm1910_vm15 = vcmp.gt.f32.partialorder %v4583_v25, 0.7  ;;  %2367 = vadd.xlane.f32.xlu0 %v2366_v32 }
 0x37a   : > { %v4747_v10 = vmul.f32 10.0, %v4628_v38  ;;  %v4750_v49 = vadd.s32 128, %v4384_v13  ;;  %v4753_v56 = vadd.s32 136, %v4323_v37  ;;  %2498 = vadd.xlane.f32.xlu1 %v2497_v23  ;;  %vm8011_vm14 = vcmp.eq.f32.partialorder %v4372_v6, %v4375_v8  ;;  %v4764_v61 = vpop.f32.mrb[27].mxu1  ;;  %v4775_v16 = vpop.permute.xlu0 %1814 }
 0x37b   : > { %8007 = vst [vmem:[#allocation19_spill] sm:$0xff] %v4740_v14  ;;  %8008 = vst [vmem:[#allocation20_spill] sm:$0xff] %v4743_v36  ;;  %v2369_v63 = vadd.f32 %v2303_v39, %v2302_v42  ;;  %v1481_v32 = vsel %vm4410_vm12, %v3879_v19, 0.0  ;;  %v1482_v58 = vsel %vm4433_vm2, %v3881_v60, 0.0  ;;  %v4771_v23 = vadd.s32 104, %v4323_v37  ;;  %v4788_v39 = vpop.permute.xlu1 %1729 }
 0x37c   : > { %8009 = vst [vmem:[#allocation21_spill] sm:$0xff] %v4750_v49  ;;  %8010 = vst [vmem:[#allocation22_spill] sm:$0xff] %v4753_v56  ;;  %v1357_v42 = vmul.f32 1.442695, %v4719_v5  ;;  %v4784_v19 = vmul.f32 10.0, %v4706_v59  ;;  %v4786_v60 = vadd.f32 %v1482_v58, %v1481_v32  ;;  %vm8016_vm4 = vcmp.eq.f32.partialorder %v4378_v9, %v4366_v3 }
 0x37d   : > { %vm4760_vm0 = vmand %vm8011_vm14, %vm1911_vm7  ;;  %8014 = vst [vmem:[#allocation23_spill] sm:$0xff] %v4771_v23  ;;  %v4801_v23 = vmul.f32 10.0, %v4723_v40  ;;  %v1483_v58 = vsel %vm4410_vm12, %v3883_v43, 0.0  ;;  %v1484_v32 = vsel %vm4433_vm2, %v3885_v26, 0.0  ;;  %v1359_v3 = vmul.f32 1.442695, %v4747_v10  ;;  %1542 = vadd.xlane.f32.xlu0 %v4600_v18 }
 0x37e   : > { %8015 = vst [vmem:[#allocation24_spill] sm:$0xff] %v4775_v16  ;;  %vm4795_vm5 = vmand %vm8016_vm4, %vm1910_vm15  ;;  %v3887_v57 = vpop.eup %3886  ;;  %v4815_v25 = vadd.f32 %v1484_v32, %v1483_v58  ;;  %v4818_v43 = vadd.s32 144, %v4323_v37  ;;  %v4821_v26 = vadd.s32 152, %v4323_v37  ;;  %vm8021_vm15 = vcmp.gt.f32.partialorder %v4628_v38, 0.7  ;;  %2370 = vadd.xlane.f32.xlu1 %v2369_v63  ;;  %v4883_v36 = vpop.permute.xlu0 %1734 }
 0x37f   : > { %v3889_v56 = vpop.eup %3888  ;;  %vm8022_vm14 = vcmp.eq.f32.partialorder %v4378_v9, %v4375_v8  ;;  %v4833_v18 = vmul.f32 10.0, %v4735_v7  ;;  %v4835_v58 = vpop.f32.mrb[28].mxu1  ;;  %v1485_v32 = vsel %vm4410_vm12, %v3887_v57, 0.0  ;;  %v4843_v38 = vadd.s32 168, %v4323_v37 }
 0x380   : > { %8019 = vst [vmem:[#allocation25_spill] sm:$0xff] %v4818_v43  ;;  %8020 = vst [vmem:[#allocation26_spill] sm:$0xff] %v4821_v26  ;;  %v4840_v26 = vadd.s32 160, %v4323_v37  ;;  %3890 = vpow2.f32 %v1357_v42  ;;  %v1361_v63 = vmul.f32 1.442695, %v4784_v19  ;;  %vm8028_vm4 = vcmp.eq.f32.partialorder %v4372_v6, %v4424_v31  ;;  %v4857_v57 = vpop.f32.mrb[29].mxu1  ;;  %v4909_v47 = vpop.permute.xlu1 %1819 }
 0x381   : > { %vm4828_vm7 = vmand %vm8022_vm14, %vm8021_vm15  ;;  %8026 = vst [vmem:[#allocation28_spill] sm:$0xff] %v4843_v38  ;;  %vm8027_vm15 = vcmp.gt.f32.partialorder %v4706_v59, 0.7  ;;  %v1486_v38 = vsel %vm4433_vm2, %v3889_v56, 0.0  ;;  %v1363_v59 = vmul.f32 1.442695, %v4801_v23  ;;  %3892 = vpow2.f32 %v1359_v3 }
 0x382   : > { %8025 = vst [vmem:[#allocation27_spill] sm:$0xff] %v4840_v26  ;;  %vm4853_vm6 = vmand %vm8028_vm4, %vm8027_vm15  ;;  %v4862_v26 = vadd.s32 176, %v4323_v37  ;;  %v4868_v42 = vmul.f32 10.0, %v4764_v61  ;;  %v4874_v43 = vpop.f32.mrb[30].mxu1  ;;  %v4878_v56 = vadd.f32 %v1486_v38, %v1485_v32  ;;  %vm8033_vm8 = vcmp.ne.s32.totalorder %v4528_v30, %v4384_v13  ;;  %1545 = vadd.xlane.f32.xlu1 %v4708_v1 }
 0x383   : > { %vm8034_vm4 = vmand %vm4730_vm3, %vm4410_vm12  ;;  %v8035_v14 = vmov 0  ;;  %v4904_v32 = vpop.f32.mrb[31].mxu1  ;;  %v4907_v30 = vadd.s32 192, %v4323_v37  ;;  %8039 = vst [vmem:[#allocation32_spill] sm:$0xff] %v4909_v47  ;;  %v1365_v38 = vmul.f32 1.442695, %v4833_v18  ;;  %3894 = vpow2.f32 %v1361_v63 }
 0x384   : > { %8031 = vst [vmem:[#allocation29_spill] sm:$0xff] %v4862_v26  ;;  %v4881_v26 = vadd.s32 184, %v4323_v37  ;;  %vm4894_vm1 = vmand %vm8034_vm4, %vm8033_vm8  ;;  %v8042_v1 = vmov 0  ;;  %3896 = vpow2.f32 %v1363_v59  ;;  %v1367_v24 = vmul.f32 1.442695, %v4868_v42 }
 0x385   : > { %v8036_v14 = vsel %vm4894_vm1, 4294967295, %v8035_v14  ;;  %vm8037_vm15 = vmand %vm4795_vm5, %vm4433_vm2  ;;  %8038 = vst [vmem:[#allocation31_spill] sm:$0xff] %v4907_v30  ;;  %v8048_v30 = vmov 0.0   ;;  %vm8051_vm4 = vcmp.gt.f32.partialorder %v4723_v40, 0.7  ;;  %3898 = vpow2.f32 %v1365_v38 }
 0x386   : > { %8032 = vst [vmem:[#allocation30_spill] sm:$0xff] %v4881_v26  ;;  %v2241_v3 = vsel %vm8037_vm15, %v4439_v4, 0.0  ;;  %v2240_v26 = vsel %vm4894_vm1, %v4437_v33, 0.0  ;;  %vm7871_vm8 = vmand %vm4828_vm7, %vm4433_vm2  ;;  %vm8040_vm15 = vcmp.ne.s32.totalorder %v4603_v0, %v4384_v13  ;;  %vm8044_vm1 = vcmp.gt.f32.partialorder %v4735_v7, 0.7 }
 0x387   : > { %v2305_v49 = vmul.f32 %v2241_v3, %v4596_v12  ;;  %v2500_v47 = vadd.f32 %v2241_v3, %v2240_v26  ;;  %vm8041_vm3 = vmand %vm4760_vm0, %vm4410_vm12  ;;  %v2243_v12 = vsel %vm7871_vm8, %v4439_v4, 0.0  ;;  %v2304_v63 = vmul.f32 %v2240_v26, %v4581_v22 }
 0x388   : > { %vm4932_vm14 = vmand %vm8041_vm3, %vm8040_vm15  ;;  %vm8045_vm0 = vcmp.eq.f32.partialorder %v4372_v6, %v4493_v52  ;;  %v2307_v22 = vmul.f32 %v2243_v12, %v4747_v10  ;;  %vm8052_vm8 = vcmp.eq.f32.partialorder %v4378_v9, %v4424_v31  ;;  %v5000_v31 = vsel %vm4467_vm10, 1.0, %v8048_v30 }
 0x389   : > { %v8043_v1 = vsel %vm4932_vm14, 4294967295, %v8042_v1  ;;  %vm4950_vm3 = vmand %vm8045_vm0, %vm8044_vm1  ;;  %v2242_v3 = vsel %vm4932_vm14, %v4437_v33, 0.0  ;;  %2501 = vadd.xlane.f32.xlu0 %v2500_v47  ;;  %v2372_v26 = vadd.f32 %v2305_v49, %v2304_v63  ;;  %vm1917_vm14 = vcmp.gt.f32.partialorder %v4835_v58, 0.7  ;;  %8058 = vst [vmem:[#allocation37_spill] sm:$0xff] %v5000_v31 }
 0x38a   : > { %v2503_v7 = vadd.f32 %v2243_v12, %v2242_v3  ;;  %v2306_v59 = vmul.f32 %v2242_v3, %v4719_v5  ;;  %vm8049_vm15 = vmand %vm4415_vm13, %vm4433_vm2  ;;  %v4987_v5 = vpop.f32.mrb[32].mxu1  ;;  %v4993_v47 = vadd.s32 208, %v4323_v37  ;;  %v4995_v12 = vpop.permute.xlu0 %1824  ;;  %v5007_v40 = vmul.f32 10.0, %v4835_v58 }
 0x38b   : > { %v4975_v10 = vsel %vm8049_vm15, 1.0, %v8048_v30  ;;  %vm4982_vm1 = vmand %vm8052_vm8, %vm8051_vm4  ;;  %8057 = vst [vmem:[#allocation36_spill] sm:$0xff] %v4995_v12  ;;  %v5009_v3 = vpop.f32.mrb[33].mxu1  ;;  %v5018_v41 = vsel %vm4538_vm11, 1.0, %v8048_v30  ;;  %vm8062_vm4 = vnez %v7992_v21  ;;  %3900 = vpow2.f32 %v1367_v24 }
 0x38c   : > { %8050 = vst [vmem:[#allocation33_spill] sm:$0xff] %v4975_v10  ;;  %8056 = vst [vmem:[#allocation35_spill] sm:$0xff] %v4993_v47  ;;  %2504 = vadd.xlane.f32.xlu1 %v2503_v7  ;;  %v2375_v63 = vadd.f32 %v2307_v22, %v2306_v59  ;;  %v5011_v10 = vpop.permute.xlu1 %1739  ;;  %vm8065_vm11 = vcmp.gt.f32.partialorder %v4764_v61, 0.7  ;;  %vm8066_vm8 = vcmp.eq.f32.partialorder %v4378_v9, %v4493_v52  ;;  %v5045_v15 = vpop.f32.mrb[34].mxu1  ;;  %v5090_v58 = vadd.s32 216, %v4323_v37 }
 0x38d   : > { %8059 = vst [vmem:[#allocation38_spill] sm:$0xff] %v5018_v41  ;;  %vm8060_vm10 = vmand %vm4482_vm9, %vm4433_vm2  ;;  %v3891_v7 = vpop.eup %3890  ;;  %2373 = vadd.xlane.f32.xlu0 %v2372_v26  ;;  %v5093_v24 = vadd.s32 224, %v4323_v37  ;;  %v1369_v59 = vmul.f32 1.442695, %v5007_v40  ;;  %v5148_v31 = vmul.f32 10.0, %v4874_v43 }
 0x38e   : > { %v5026_v38 = vsel %vm8060_vm10, 1.0, %v8048_v30  ;;  %vm8063_vm15 = vmand %vm8062_vm4, %vm4433_vm2  ;;  %vm8069_vm10 = vnez %v7997_v20  ;;  %vm8071_vm4 = vnez %v8003_v17  ;;  %v5077_v17 = vpop.f32.mrb[35].mxu1  ;;  %8079 = vst [vmem:[#allocation44_spill] sm:$0xff] %v5090_v58  ;;  %v3893_v26 = vpop.eup %3892  ;;  %v1487_v16 = vsel %vm4410_vm12, %v3891_v7, 0.0 }
 0x38f   : > { %8061 = vst [vmem:[#allocation39_spill] sm:$0xff] %v5026_v38  ;;  %v5034_v22 = vsel %vm8063_vm15, 1.0, %v8048_v30  ;;  %vm5041_vm13 = vmand %vm8066_vm8, %vm8065_vm11  ;;  %v5052_v21 = vsel %vm8069_vm10, 1.0, %v8048_v30  ;;  %v5057_v61 = vsel %vm8071_vm4, 1.0, %v8048_v30  ;;  %vm8073_vm8 = vnez %v8000_v29 }
 0x390   : > { %8064 = vst [vmem:[#allocation40_spill] sm:$0xff] %v5034_v22  ;;  %v8068_v45 = vsel %vm5041_vm13, 4294967295, %v8067_v45  ;;  %8070 = vst [vmem:[#allocation41_spill] sm:$0xff] %v5052_v21  ;;  %vm8076_vm11 = vcmp.eq.f32.partialorder %v4372_v6, %v4589_v35  ;;  %vm1921_vm4 = vcmp.gt.f32.partialorder %v4987_v5, 0.7  ;;  %v5082_v29 = vmul.f32 10.0, %v4857_v57  ;;  %2376 = vadd.xlane.f32.xlu1 %v2375_v63  ;;  %v5143_v21 = vpop.eup %3894 }
 0x391   : > { %8072 = vst [vmem:[#allocation42_spill] sm:$0xff] %v5057_v61  ;;  %vm8074_vm15 = vmand %vm8073_vm8, %vm4433_vm2  ;;  %vm1919_vm8 = vcmp.gt.f32.partialorder %v4874_v43, 0.7  ;;  %1548 = vadd.xlane.f32.xlu0 %v4786_v60  ;;  %v3897_v12 = vpop.eup %3896  ;;  %v8096_v60 = vmov 0  ;;  %3902 = vpow2.f32 %v1369_v59  ;;  %v5258_v58 = vmul.f32 10.0, %v5009_v3 }
 0x392   : > { %v5065_v52 = vsel %vm8074_vm15, 1.0, %v8048_v30  ;;  %vm5072_vm10 = vmand %vm8076_vm11, %vm1917_vm14  ;;  %8080 = vst [vmem:[#allocation45_spill] sm:$0xff] %v5093_v24  ;;  %vm8081_vm11 = vcmp.ne.s32.totalorder %v4631_v11, %v4384_v13  ;;  %vm1922_vm15 = vcmp.gt.f32.partialorder %v5009_v3, 0.7  ;;  %v5118_v11 = vadd.s32 232, %v4323_v37  ;;  %v5164_v24 = vpop.permute.xlu1 %1829  ;;  %v3899_v0 = vpop.eup %3898 }
 0x393   : > { %8075 = vst [vmem:[#allocation43_spill] sm:$0xff] %v5065_v52  ;;  %vm7874_vm14 = vmand %vm4982_vm1, %vm4433_vm2  ;;  %v1371_v43 = vmul.f32 1.442695, %v5082_v29 }
 0x394   : > { %vm8082_vm9 = vmand %vm4853_vm6, %vm4410_vm12  ;;  %v2245_v61 = vsel %vm7874_vm14, %v4439_v4, 0.0  ;;  %8085 = vst [vmem:[#allocation46_spill] sm:$0xff] %v5118_v11  ;;  %1551 = vadd.xlane.f32.xlu1 %v4815_v25 }
 0x395   : > { %vm5106_vm0 = vmand %vm8082_vm9, %vm8081_vm11  ;;  %vm8088_vm11 = vcmp.eq.f32.partialorder %v4372_v6, %v4788_v39  ;;  %v2309_v11 = vmul.f32 %v2245_v61, %v4801_v23  ;;  %8094 = vst [vmem:[#allocation48_spill] sm:$0xff] %v5164_v24  ;;  %v1174_v23 = vpop.f32.mrb[36].mxu1  ;;  %3904 = vpow2.f32 %v1371_v43 }
 0x396   : > { %vm8086_vm6 = vmand %vm4795_vm5, %vm4433_vm2  ;;  %v2244_v63 = vsel %vm5106_vm0, %v4437_v33, 0.0  ;;  %vm8091_vm5 = vcmp.eq.f32.partialorder %v4372_v6, %v4670_v50  ;;  %v5283_v3 = vpop.permute.xlu1 %1749 }
 0x397   : > { %v5126_v8 = vsel %vm8086_vm6, 1.0, %v8048_v30  ;;  %vm5137_vm14 = vmand %vm8088_vm11, %vm1921_vm4  ;;  %v2506_v41 = vadd.f32 %v2245_v61, %v2244_v63  ;;  %v2308_v7 = vmul.f32 %v2244_v63, %v4784_v19  ;;  %v1488_v19 = vsel %vm4433_vm2, %v3893_v26, 0.0  ;;  %v5189_v63 = vpop.f32.mrb[37].mxu1 }
 0x398   : > { %8087 = vst [vmem:[#allocation47_spill] sm:$0xff] %v5126_v8  ;;  %v5145_v8 = vpop.permute.xlu0 %1744  ;;  %vm5155_vm6 = vmand %vm8091_vm5, %vm1919_vm8  ;;  %vm8095_vm8 = vcmp.eq.f32.partialorder %v4378_v9, %v4788_v39  ;;  %v5182_v61 = vmul.f32 10.0, %v4904_v32  ;;  %v5191_v24 = vadd.f32 %v1488_v19, %v1487_v16  ;;  %v5196_v26 = vmul.f32 10.0, %v4987_v5  ;;  %v5217_v59 = vpop.f32.mrb[38].mxu1 }
 0x399   : > { %vm5172_vm11 = vmand %vm8095_vm8, %vm1922_vm15  ;;  %v2378_v39 = vadd.f32 %v2309_v11, %v2308_v7  ;;  %vm8099_vm4 = vcmp.ne.s32.totalorder %v4646_v34, %v4384_v13  ;;  %v1489_v34 = vsel %vm4410_vm12, %v5143_v21, 0.0  ;;  %2507 = vadd.xlane.f32.xlu0 %v2506_v41  ;;  %v8105_v16 = vmov 0  ;;  %v5237_v7 = vpop.f32.mrb[39].mxu1  ;;  %v3901_v19 = vpop.eup %3900 }
 0x39a   : > { %v8097_v60 = vsel %vm5172_vm11, 4294967295, %v8096_v60  ;;  %vm7879_vm15 = vmand %vm5041_vm13, %vm4433_vm2  ;;  %v1490_v41 = vsel %vm4433_vm2, %v3897_v12, 0.0  ;;  %vm8109_vm11 = vcmp.eq.f32.partialorder %v4378_v9, %v4589_v35  ;;  %v1373_v12 = vmul.f32 1.442695, %v5148_v31 }
 0x39b   : > { %8098 = vst [vmem:[#allocation49_spill] sm:$0xff] %v8097_v60  ;;  %vm8100_vm9 = vmand %vm4950_vm3, %vm4410_vm12  ;;  %v2247_v5 = vsel %vm7879_vm15, %v4439_v4, 0.0  ;;  %vm8113_vm3 = vnez %v8036_v14  ;;  %v5290_v14 = vmul.f32 10.0, %v5077_v17  ;;  %vm8120_vm13 = vcmp.eq.f32.partialorder %v4372_v6, %v5011_v10 }
 0x39c   : > { %vm5206_vm5 = vmand %vm8100_vm9, %vm8099_vm4  ;;  %vm8103_vm9 = vcmp.gt.f32.partialorder %v5045_v15, 0.7  ;;  %vm8104_vm4 = vcmp.eq.f32.partialorder %v4372_v6, %v4883_v36  ;;  %v2311_v21 = vmul.f32 %v2247_v5, %v4868_v42  ;;  %v5263_v60 = vpop.permute.xlu0 %1834  ;;  %v5268_v35 = vsel %vm8113_vm3, 1.0, %v8048_v30 }
 0x39d   : > { %v2246_v11 = vsel %vm5206_vm5, %v4437_v33, 0.0  ;;  %vm5232_vm15 = vmand %vm8104_vm4, %vm8103_vm9  ;;  %vm8108_vm4 = vcmp.gt.f32.partialorder %v4857_v57, 0.7  ;;  %8112 = vst [vmem:[#allocation51_spill] sm:$0xff] %v5263_v60  ;;  %v1375_v57 = vmul.f32 1.442695, %v5182_v61  ;;  %2379 = vadd.xlane.f32.xlu0 %v2378_v39  ;;  %3906 = vpow2.f32 %v1373_v12 }
 0x39e   : > { %v8106_v16 = vsel %vm5232_vm15, 4294967295, %v8105_v16  ;;  %vm5252_vm8 = vmand %vm8109_vm11, %vm8108_vm4  ;;  %v2509_v47 = vadd.f32 %v2247_v5, %v2246_v11  ;;  %v2310_v28 = vmul.f32 %v2246_v11, %v4833_v18  ;;  %8114 = vst [vmem:[#allocation52_spill] sm:$0xff] %v5268_v35  ;;  %vm8115_vm11 = vcmp.gt.f32.partialorder %v5077_v17, 0.7 }
 0x39f   : > { %8107 = vst [vmem:[#allocation50_spill] sm:$0xff] %v8106_v16  ;;  %v5272_v16 = vmul.f32 10.0, %v5045_v15  ;;  %vm8116_vm4 = vcmp.eq.f32.partialorder %v4378_v9, %v4883_v36  ;;  %v8117_v18 = vmov 0  ;;  %vm8119_vm9 = vcmp.gt.f32.partialorder %v1174_v23, 0.7 }
 0x3a0   : > { %vm5279_vm15 = vmand %vm8116_vm4, %vm8115_vm11  ;;  %2510 = vadd.xlane.f32.xlu1 %v2509_v47  ;;  %v2381_v15 = vadd.f32 %v2311_v21, %v2310_v28  ;;  %v5299_v36 = vadd.f32 %v1490_v41, %v1489_v34  ;;  %v1377_v43 = vmul.f32 1.442695, %v5196_v26  ;;  %v1297_v47 = vmul.f32 10.0, %v1174_v23  ;;  %v5317_v23 = vpop.f32.mrb[40].mxu1 }
 0x3a1   : > { %v8118_v18 = vsel %vm5279_vm15, 4294967295, %v8117_v18  ;;  %vm1989_vm11 = vmand %vm8120_vm13, %vm8119_vm9  ;;  %v1491_v28 = vsel %vm4410_vm12, %v3899_v0, 0.0  ;;  %v1492_v17 = vsel %vm4433_vm2, %v3901_v19, 0.0  ;;  %v1379_v5 = vmul.f32 1.442695, %v5258_v58  ;;  %v5341_v21 = vpop.f32.mrb[41].mxu1  ;;  %1554 = vadd.xlane.f32.xlu0 %v4878_v56 }
 0x3a2   : > { %vm2053_vm3 = vmand %vm1989_vm11, %vm4410_vm12  ;;  %vm8121_vm13 = vcmp.ne.s32.totalorder %v4658_v62, %v4384_v13  ;;  %v8122_v34 = vmov 0  ;;  %v5319_v39 = vadd.f32 %v1492_v17, %v1491_v28  ;;  %3908 = vpow2.f32 %v1375_v57  ;;  %v5353_v57 = vpop.eup %3902  ;;  %v5355_v28 = vpop.permute.xlu0 %1754 }
 0x3a3   : > { %vm5312_vm9 = vmand %vm2053_vm3, %vm8121_vm13  ;;  %v1381_v0 = vmul.f32 1.442695, %v5272_v16  ;;  %vm8125_vm3 = vcmp.gt.f32.partialorder %v5189_v63, 0.7  ;;  %vm8126_vm13 = vcmp.eq.f32.partialorder %v4378_v9, %v5011_v10  ;;  %v8127_v11 = vmov 0  ;;  %v5351_v10 = vpop.f32.mrb[42].mxu1 }
 0x3a4   : > { %v8123_v34 = vsel %vm5312_vm9, 4294967295, %v8122_v34  ;;  %v5328_v62 = vsel %vm5312_vm9, %v4437_v33, 0.0  ;;  %vm5335_vm15 = vmand %vm8126_vm13, %vm8125_vm3  ;;  %v1383_v41 = vmul.f32 1.442695, %v5290_v14  ;;  %2382 = vadd.xlane.f32.xlu1 %v2381_v15  ;;  %v1298_v12 = vmul.f32 10.0, %v5189_v63  ;;  %v5378_v56 = vpop.f32.mrb[43].mxu1 }
 0x3a5   : > { %8124 = vst [vmem:[#allocation53_spill] sm:$0xff] %v8123_v34  ;;  %v8128_v11 = vsel %vm5335_vm15, 4294967295, %v8127_v11  ;;  %v2320_v19 = vmul.f32 %v5328_v62, %v1297_v47  ;;  %vm7892_vm3 = vmand %vm5335_vm15, %vm4433_vm2  ;;  %3910 = vpow2.f32 %v1377_v43  ;;  %v1385_v15 = vmul.f32 1.442695, %v1297_v47 }
 0x3a6   : > { %8129 = vst [vmem:[#allocation54_spill] sm:$0xff] %v8128_v11  ;;  %v5364_v63 = vsel %vm7892_vm3, %v4439_v4, 0.0  ;;  %v5367_v17 = vmul.f32 10.0, %v5217_v59  ;;  %vm8131_vm11 = vcmp.gt.f32.partialorder %v5217_v59, 0.7  ;;  %vm8132_vm13 = vcmp.eq.f32.partialorder %v4372_v6, %v5145_v8  ;;  %vm8135_vm3 = vmand %vm4828_vm7, %vm4433_vm2 }
 0x3a7   : > { %vm5374_vm4 = vmand %vm8132_vm13, %vm8131_vm11  ;;  %v5388_v47 = vsel %vm8135_vm3, 1.0, %v8048_v30  ;;  %vm8137_vm15 = vcmp.gt.f32.partialorder %v4904_v32, 0.7  ;;  %vm8138_vm11 = vcmp.eq.f32.partialorder %v4378_v9, %v4670_v50  ;;  %3912 = vpow2.f32 %v1379_v5 }
 0x3a8   : > { %8130 = vst [vmem:[#allocation55_spill] sm:$0xff] %v5367_v17  ;;  %8136 = vst [vmem:[#allocation56_spill] sm:$0xff] %v5388_v47  ;;  %v2321_v34 = vmul.f32 %v5364_v63, %v1298_v12  ;;  %v5401_v11 = vmul.f32 10.0, %v5237_v7  ;;  %vm8142_vm7 = vnez %v8043_v1  ;;  %v5411_v32 = vsel %vm5106_vm0, 1.0, %v8048_v30  ;;  %1557 = vadd.xlane.f32.xlu1 %v5191_v24 }
 0x3a9   : > { %vm5395_vm13 = vmand %vm8138_vm11, %vm8137_vm15  ;;  %v5406_v54 = vsel %vm8142_vm7, 1.0, %v8048_v30  ;;  %8144 = vst [vmem:[#allocation59_spill] sm:$0xff] %v5411_v32  ;;  %3914 = vpow2.f32 %v1381_v0  ;;  %vm8147_vm3 = vcmp.gt.f32.partialorder %v5237_v7, 0.7  ;;  %vm8148_vm11 = vcmp.eq.f32.partialorder %v4378_v9, %v5145_v8  ;;  %v5444_v7 = vpop.eup %3904 }
 0x3aa   : > { %8141 = vst [vmem:[#allocation57_spill] sm:$0xff] %v5401_v11  ;;  %8143 = vst [vmem:[#allocation58_spill] sm:$0xff] %v5406_v54  ;;  %3916 = vpow2.f32 %v1383_v41  ;;  %v1387_v49 = vmul.f32 1.442695, %v1298_v12  ;;  %v5438_v52 = vmul.f32 10.0, %v5317_v23  ;;  %v5442_v8 = vadd.f32 %v2321_v34, %v2320_v19  ;;  %v5476_v19 = vpop.f32.mrb[44].mxu1  ;;  %v5502_v38 = vpop.eup %3906 }
 0x3ab   : > { %vm8145_vm15 = vmand %vm4982_vm1, %vm4433_vm2  ;;  %3918 = vpow2.f32 %v1385_v15  ;;  %v1389_v5 = vmul.f32 1.442695, %v5367_v17  ;;  %v1302_v41 = vmul.f32 10.0, %v5341_v21  ;;  %8159 = vst [vmem:[#allocation61_spill] sm:$0xff] %v5502_v38  ;;  %v5523_v47 = vmul.f32 10.0, %v5351_v10 }
 0x3ac   : > { %v5419_v50 = vsel %vm8145_vm15, 1.0, %v8048_v30  ;;  %vm5426_vm7 = vmand %vm8148_vm11, %vm8147_vm3  ;;  %vm8151_vm3 = vcmp.ne.s32.totalorder %v4649_v46, %v4384_v13  ;;  %vm1929_vm15 = vcmp.gt.f32.partialorder %v5317_v23, 0.7  ;;  %v1391_v46 = vmul.f32 1.442695, %v5401_v11  ;;  %v5529_v35 = vpop.eup %3908 }
 0x3ad   : > { %8146 = vst [vmem:[#allocation60_spill] sm:$0xff] %v5419_v50  ;;  %vm7896_vm1 = vmand %vm5252_vm8, %vm4433_vm2  ;;  %v1393_v32 = vmul.f32 1.442695, %v5438_v52  ;;  %v5537_v38 = vmul.f32 10.0, %v5378_v56  ;;  %v5544_v11 = vsel %vm5206_vm5, 1.0, %v8048_v30  ;;  %3920 = vpow2.f32 %v1387_v49 }
 0x3ae   : > { %vm8152_vm11 = vmand %vm5072_vm10, %vm4410_vm12  ;;  %v2249_v34 = vsel %vm7896_vm1, %v4439_v4, 0.0  ;;  %8163 = vst [vmem:[#allocation62_spill] sm:$0xff] %v5529_v35  ;;  %3922 = vpow2.f32 %v1389_v5  ;;  %v1397_v5 = vmul.f32 1.442695, %v5523_v47  ;;  %v5677_v42 = vadd.f32 %v5364_v63, %v5328_v62  ;;  %v8206_v63 = vld [vmem:[#allocation8_spill] sm:$0xff] }
 0x3af   : > { %vm5455_vm0 = vmand %vm8152_vm11, %vm8151_vm3  ;;  %v2313_v0 = vmul.f32 %v2249_v34, %v5082_v29  ;;  %vm8155_vm11 = vcmp.ne.s32.totalorder %v4661_v51, %v4384_v13  ;;  %v5500_v51 = vpop.f32.mrb[45].mxu1  ;;  %8164 = vst [vmem:[#allocation63_spill] sm:$0xff] %v5544_v11  ;;  %vm1931_vm3 = vcmp.gt.f32.partialorder %v5351_v10, 0.7  ;;  %v5562_v25 = vpop.eup %3910  ;;  %3924 = vpow2.f32 %v1391_v46 }
 0x3b0   : > { %v2248_v20 = vsel %vm5455_vm0, %v4437_v33, 0.0  ;;  %vm7897_vm10 = vmand %vm5395_vm13, %vm4433_vm2  ;;  %v5527_v54 = vpop.f32.mrb[46].mxu1  ;;  %8172 = vst [vmem:[#allocation66_spill] sm:$0xff] %v5562_v25  ;;  %3926 = vpow2.f32 %v1393_v32  ;;  %v8185_v32 = vld [vmem:[#allocation19_spill] sm:$0xff]  ;;  %v5621_v10 = vmul.f32 10.0, %v5476_v19 }
 0x3b1   : > { %v2512_v12 = vadd.f32 %v2249_v34, %v2248_v20  ;;  %vm8156_vm1 = vmand %vm5155_vm6, %vm4410_vm12  ;;  %v2251_v29 = vsel %vm7897_vm10, %v4439_v4, 0.0  ;;  %v2312_v34 = vmul.f32 %v2248_v20, %v5007_v40  ;;  %v5539_v17 = vpop.f32.mrb[47].mxu1 }
 0x3b2   : > { %vm5488_vm9 = vmand %vm8156_vm1, %vm8155_vm11  ;;  %vm8160_vm1 = vcmp.eq.f32.partialorder %v4372_v6, %v5283_v3  ;;  %v2315_v20 = vmul.f32 %v2251_v29, %v5182_v61  ;;  %v5693_v62 = vmul.f32 10.0, %v5539_v17 }
 0x3b3   : > { %v2250_v50 = vsel %vm5488_vm9, %v4437_v33, 0.0  ;;  %vm5517_vm11 = vmand %vm8160_vm1, %vm1929_vm15  ;;  %2513 = vadd.xlane.f32.xlu0 %v2512_v12  ;;  %v2384_v60 = vadd.f32 %v2313_v0, %v2312_v34  ;;  %vm8165_vm1 = vnez %v8068_v45  ;;  %v5578_v12 = vpop.eup %3912  ;;  %v1399_v34 = vmul.f32 1.442695, %v5537_v38 }
 0x3b4   : > { %v2515_v23 = vadd.f32 %v2251_v29, %v2250_v50  ;;  %vm2057_vm15 = vmand %vm5517_vm11, %vm4410_vm12  ;;  %v2314_v61 = vmul.f32 %v2250_v50, %v5148_v31  ;;  %vm8168_vm11 = vcmp.ne.s32.totalorder %v4682_v55, %v4384_v13  ;;  %v8169_v31 = vmov 0  ;;  %8178 = vst [vmem:[#allocation68_spill] sm:$0xff] %v5578_v12  ;;  %v5591_v29 = vpop.eup %3914 }
 0x3b5   : > { %vm8166_vm6 = vmand %vm8165_vm1, %vm4433_vm2  ;;  %v1395_v50 = vmul.f32 1.442695, %v1302_v41  ;;  %v8175_v55 = vmov 0  ;;  %8180 = vst [vmem:[#allocation70_spill] sm:$0xff] %v5591_v29  ;;  %v5614_v40 = vpop.eup %3916  ;;  %v1407_v11 = vmul.f32 1.442695, %v5693_v62 }
 0x3b6   : > { %v5552_v0 = vsel %vm8166_vm6, 1.0, %v8048_v30  ;;  %vm5557_vm10 = vmand %vm2057_vm15, %vm8168_vm11  ;;  %2516 = vadd.xlane.f32.xlu1 %v2515_v23  ;;  %vm8173_vm6 = vcmp.gt.f32.partialorder %v5341_v21, 0.7  ;;  %vm8174_vm15 = vcmp.eq.f32.partialorder %v4378_v9, %v5283_v3  ;;  %v2387_v49 = vadd.f32 %v2315_v20, %v2314_v61  ;;  %v5623_v23 = vpop.f32.mrb[48].mxu1 }
 0x3b7   : > { %8167 = vst [vmem:[#allocation64_spill] sm:$0xff] %v5552_v0  ;;  %v8170_v31 = vsel %vm5557_vm10, 4294967295, %v8169_v31  ;;  %v2260_v45 = vsel %vm5557_vm10, %v4437_v33, 0.0  ;;  %vm5574_vm1 = vmand %vm8174_vm15, %vm8173_vm6  ;;  %v5586_v21 = vadd.s32 240, %v4323_v37  ;;  %v1493_v3 = vsel %vm4410_vm12, %v5353_v57, 0.0  ;;  %2385 = vadd.xlane.f32.xlu0 %v2384_v60  ;;  %v8184_v60 = vld [vmem:[#allocation21_spill] sm:$0xff] }
 0x3b8   : > { %8171 = vst [vmem:[#allocation65_spill] sm:$0xff] %v8170_v31  ;;  %v8176_v55 = vsel %vm5574_vm1, 4294967295, %v8175_v55  ;;  %vm7902_vm11 = vmand %vm5574_vm1, %vm4433_vm2  ;;  %vm8181_vm15 = vcmp.eq.f32.partialorder %v4372_v6, %v5355_v28  ;;  %v1494_v31 = vsel %vm4433_vm2, %v5444_v7, 0.0  ;;  %3928 = vpow2.f32 %v1395_v50  ;;  %v8195_v7 = vld [vmem:[#allocation20_spill] sm:$0xff] }
 0x3b9   : > { %8177 = vst [vmem:[#allocation67_spill] sm:$0xff] %v8176_v55  ;;  %8179 = vst [vmem:[#allocation69_spill] sm:$0xff] %v5586_v21  ;;  %v2261_v46 = vsel %vm7902_vm11, %v4439_v4, 0.0  ;;  %v5630_v55 = vpop.eup %3918  ;;  %v8192_v57 = vmov 0  ;;  %v5651_v0 = vadd.s32 248, %v4323_v37  ;;  %v5653_v50 = vadd.f32 %v1494_v31, %v1493_v3  ;;  %v8209_v3 = vld [vmem:[#allocation49_spill] sm:$0xff] }
 0x3ba   : > { %vm5606_vm5 = vmand %vm8181_vm15, %vm1931_vm3  ;;  %8186 = vst [vmem:[#allocation21_spill] sm:$0xff] %v5614_v40  ;;  %v2325_v20 = vmul.f32 %v2261_v46, %v1302_v41  ;;  %v5625_v61 = vadd.f32 %v2261_v46, %v2260_v45  ;;  %v8189_v41 = vld [vmem:[#allocation50_spill] sm:$0xff]  ;;  %2388 = vadd.xlane.f32.xlu1 %v2387_v49  ;;  %v5644_v46 = vmul.f32 10.0, %v5500_v51  ;;  %3930 = vpow2.f32 %v1397_v5  ;;  %v8270_v40 = vld [vmem:[#allocation11_spill] sm:$0xff] }
 0x3bb   : > { %vm2059_vm11 = vmand %vm5606_vm5, %vm4410_vm12  ;;  %8188 = vst [vmem:[#allocation71_spill] sm:$0xff] %v5630_v55  ;;  %vm8190_vm3 = vnez %v8189_v41  ;;  %vm8191_vm5 = vcmp.ne.s32.totalorder %v4713_v44, %v4384_v13  ;;  %vm8201_vm15 = vcmp.eq.f32.partialorder %v4378_v9, %v5355_v28  ;;  %v8202_v49 = vmov 0  ;;  %1560 = vadd.xlane.f32.xlu0 %v5299_v36 }
 0x3bc   : > { %8187 = vst [vmem:[#allocation19_spill] sm:$0xff] %v5625_v61  ;;  %vm5639_vm10 = vmand %vm2059_vm11, %vm8191_vm5  ;;  %v5648_v61 = vpop.f32.mrb[49].mxu1  ;;  %vm8200_vm5 = vcmp.gt.f32.partialorder %v5378_v56, 0.7  ;;  %v5673_v37 = vmul.f32 10.0, %v5527_v54  ;;  %v5684_v56 = vsel %vm5455_vm0, 1.0, %v8048_v30  ;;  %3932 = vpow2.f32 %v1399_v34 }
 0x3bd   : > { %v8193_v57 = vsel %vm5639_vm10, 4294967295, %v8192_v57  ;;  %8196 = vst [vmem:[#allocation20_spill] sm:$0xff] %v5651_v0  ;;  %8197 = vst [vmem:[#allocation72_spill] sm:$0xff] %v5653_v50  ;;  %v5679_v31 = vpop.f32.mrb[50].mxu1  ;;  %v2324_v24 = vmul.f32 %v2260_v45, %v5438_v52  ;;  %v5703_v5 = vsel %vm5639_vm10, %v4437_v33, 0.0  ;;  %vm8210_vm0 = vnez %v8209_v3  ;;  %v8222_v50 = vld [vmem:[#allocation22_spill] sm:$0xff] }
 0x3be   : > { %8194 = vst [vmem:[#allocation50_spill] sm:$0xff] %v8193_v57  ;;  %vm8198_vm11 = vmand %vm5252_vm8, %vm4433_vm2  ;;  %v5695_v28 = vpop.f32.mrb[51].mxu1  ;;  %v1401_v52 = vmul.f32 1.442695, %v5621_v10  ;;  %1563 = vadd.xlane.f32.xlu1 %v5319_v39  ;;  %v1403_v39 = vmul.f32 1.442695, %v5644_v46 }
 0x3bf   : > { %v5661_v44 = vsel %vm8198_vm11, 1.0, %v8048_v30  ;;  %vm5668_vm6 = vmand %vm8201_vm15, %vm8200_vm5  ;;  %8205 = vst [vmem:[#allocation75_spill] sm:$0xff] %v5684_v56  ;;  %vm8211_vm11 = vcmp.ne.s32.totalorder %v4666_v48, %v4384_v13  ;;  %v5741_v48 = vpop.eup %3920  ;;  %v1405_v59 = vmul.f32 1.442695, %v5673_v37  ;;  %v2326_v56 = vmul.f32 %v5703_v5, %v5523_v47 }
 0x3c0   : > { %8199 = vst [vmem:[#allocation73_spill] sm:$0xff] %v5661_v44  ;;  %v8203_v49 = vsel %vm5668_vm6, 4294967295, %v8202_v49  ;;  %vm7905_vm8 = vmand %vm5668_vm6, %vm4433_vm2  ;;  %v5769_v44 = vpop.eup %3922  ;;  %3934 = vpow2.f32 %v1401_v52  ;;  %v5795_v47 = vmul.f32 10.0, %v5623_v23  ;;  %v5826_v15 = vmul.f32 10.0, %v5648_v61 }
 0x3c1   : > { %8204 = vst [vmem:[#allocation74_spill] sm:$0xff] %v8203_v49  ;;  %8207 = vst [vmem:[#allocation8_spill] sm:$0xff] %v5703_v5  ;;  %v5711_v36 = vsel %vm7905_vm8, %v4439_v4, 0.0  ;;  %v5779_v21 = vpop.eup %3924  ;;  %3936 = vpow2.f32 %v1403_v39  ;;  %v8236_v39 = vld [vmem:[#allocation25_spill] sm:$0xff]  ;;  %vm8252_vm6 = vcmp.eq.f32.partialorder %v4378_v9, %v8206_v63  ;;  %v8265_v49 = vld [vmem:[#allocation26_spill] sm:$0xff] }
 0x3c2   : > { %8208 = vst [vmem:[#allocation76_spill] sm:$0xff] %v5711_v36  ;;  %vm7908_vm5 = vmand %vm8210_vm0, %vm4433_vm2  ;;  %v2327_v45 = vmul.f32 %v5711_v36, %v5537_v38  ;;  %v5801_v52 = vpop.eup %3926  ;;  %3938 = vpow2.f32 %v1405_v59  ;;  %v8303_v36 = vld [vmem:[#allocation14_spill] sm:$0xff] }
 0x3c3   : > { %vm8212_vm8 = vmand %vm5137_vm14, %vm4410_vm12  ;;  %v2253_v38 = vsel %vm7908_vm5, %v4439_v4, 0.0  ;;  %8215 = vst [vmem:[#allocation49_spill] sm:$0xff] %v5741_v48  ;;  %vm8219_vm5 = vcmp.eq.f32.partialorder %v4372_v6, %v4348_v53  ;;  %3940 = vpow2.f32 %v1407_v11  ;;  %v8279_v11 = vld [vmem:[#allocation27_spill] sm:$0xff] }
 0x3c4   : > { %vm5729_vm15 = vmand %vm8212_vm8, %vm8211_vm11  ;;  %vm8218_vm11 = vcmp.gt.f32.partialorder %v5476_v19, 0.7  ;;  %8223 = vst [vmem:[#allocation22_spill] sm:$0xff] %v5769_v44 }
 0x3c5   : > { %vm8216_vm8 = vmand %vm5395_vm13, %vm4433_vm2  ;;  %v2252_v57 = vsel %vm5729_vm15, %v4437_v33, 0.0  ;;  %8224 = vst [vmem:[#allocation78_spill] sm:$0xff] %v5779_v21  ;;  %v5941_v21 = vsel %vm5729_vm15, 1.0, %v8048_v30 }
 0x3c6   : > { %v5751_v22 = vsel %vm8216_vm8, 1.0, %v8048_v30  ;;  %vm5761_vm10 = vmand %vm8219_vm5, %vm8218_vm11  ;;  %v2518_v19 = vadd.f32 %v2253_v38, %v2252_v57  ;;  %v2316_v0 = vmul.f32 %v2252_v57, %v5196_v26  ;;  %vm8225_vm8 = vcmp.gt.f32.partialorder %v5500_v51, 0.7  ;;  %v5799_v57 = vpop.f32.mrb[52].mxu1  ;;  %8227 = vst [vmem:[#allocation79_spill] sm:$0xff] %v5801_v52 }
 0x3c7   : > { %8217 = vst [vmem:[#allocation77_spill] sm:$0xff] %v5751_v22  ;;  %v2317_v22 = vmul.f32 %v2253_v38, %v5258_v58  ;;  %vm7912_vm5 = vmand %vm5761_vm10, %vm4410_vm12  ;;  %vm8226_vm11 = vcmp.eq.f32.partialorder %v4378_v9, %v4348_v53  ;;  %v5797_v26 = vadd.f32 %v2325_v20, %v2324_v24  ;;  %v8228_v38 = vld [vmem:[#allocation9_spill] sm:$0xff]  ;;  %v5808_v51 = vsel %vm5488_vm9, 1.0, %v8048_v30  ;;  %v5814_v24 = vpop.f32.mrb[53].mxu1 }
 0x3c8   : > { %v5787_v58 = vsel %vm7912_vm5, %v4437_v33, 0.0  ;;  %vm1998_vm13 = vmand %vm8226_vm11, %vm8225_vm8  ;;  %8229 = vst [vmem:[#allocation9_spill] sm:$0xff] %v5808_v51  ;;  %2519 = vadd.xlane.f32.xlu0 %v2518_v19  ;;  %vm8230_vm11 = vcmp.ne.s32.totalorder %v8185_v32, %v8184_v60  ;;  %v8231_v52 = vmov 0  ;;  %v5928_v3 = vmul.f32 10.0, %v5814_v24 }
 0x3c9   : > { %v2328_v53 = vmul.f32 %v5787_v58, %v5621_v10  ;;  %vm2062_vm8 = vmand %vm1998_vm13, %vm4433_vm2  ;;  %v2390_v20 = vadd.f32 %v2317_v22, %v2316_v0  ;;  %v5828_v10 = vpop.f32.mrb[54].mxu1  ;;  %v5830_v0 = vpop.eup %3928  ;;  %v5844_v22 = vadd.f32 %v2327_v45, %v2326_v56  ;;  %vm8238_vm13 = vcmp.ne.s32.totalorder %v8195_v7, %v4384_v13 }
 0x3ca   : > { %vm5819_vm14 = vmand %vm2062_vm8, %vm8230_vm11  ;;  %8234 = vst [vmem:[#allocation81_spill] sm:$0xff] %v5830_v0  ;;  %vm8235_vm8 = vnez %v8118_v18  ;;  %v5846_v59 = vpop.f32.mrb[55].mxu1  ;;  %v5848_v19 = vpop.eup %3930  ;;  %v5871_v7 = vmul.f32 10.0, %v5679_v31 }
 0x3cb   : > { %v8232_v52 = vsel %vm5819_vm14, 4294967295, %v8231_v52  ;;  %v2265_v32 = vsel %vm5819_vm14, %v4439_v4, 0.0  ;;  %8237 = vst [vmem:[#allocation25_spill] sm:$0xff] %v5848_v19  ;;  %vm8239_vm11 = vmand %vm8190_vm3, %vm4410_vm12  ;;  %v5873_v41 = vpop.eup %3932  ;;  %v5896_v19 = vmul.f32 10.0, %v5695_v28  ;;  %vm8251_vm3 = vcmp.gt.f32.partialorder %v5539_v17, 0.7 }
 0x3cc   : > { %8233 = vst [vmem:[#allocation80_spill] sm:$0xff] %v8232_v52  ;;  %v2329_v51 = vmul.f32 %v2265_v32, %v5644_v46  ;;  %vm5859_vm5 = vmand %vm8239_vm11, %vm8238_vm13  ;;  %v1409_v46 = vmul.f32 1.442695, %v5795_v47  ;;  %vm8244_vm13 = vcmp.gt.f32.partialorder %v5527_v54, 0.7  ;;  %2391 = vadd.xlane.f32.xlu0 %v2390_v20  ;;  %v5959_v34 = vpop.eup %3934 }
 0x3cd   : > { %vm8242_vm9 = vmand %vm8235_vm8, %vm4433_vm2  ;;  %8243 = vst [vmem:[#allocation82_spill] sm:$0xff] %v5873_v41  ;;  %v2254_v45 = vsel %vm5859_vm5, %v4437_v33, 0.0  ;;  %v8248_v41 = vld [vmem:[#allocation23_spill] sm:$0xff]  ;;  %v1411_v20 = vmul.f32 1.442695, %v5826_v15 }
 0x3ce   : > { %v2255_v56 = vsel %vm8242_vm9, %v4439_v4, 0.0  ;;  %vm8245_vm9 = vcmp.eq.f32.partialorder %v4372_v6, %v8206_v63  ;;  %v2318_v54 = vmul.f32 %v2254_v45, %v5272_v16  ;;  %vm2000_vm1 = vmand %vm8252_vm6, %vm8251_vm3  ;;  %vm1939_vm14 = vcmp.gt.f32.partialorder %v5679_v31, 0.7  ;;  %v5936_v63 = vpop.f32.mrb[56].mxu1  ;;  %v8288_v31 = vld [vmem:[#allocation12_spill] sm:$0xff] }
 0x3cf   : > { %vm5887_vm11 = vmand %vm8245_vm9, %vm8244_vm13  ;;  %v2319_v0 = vmul.f32 %v2255_v56, %v5290_v14  ;;  %v2521_v48 = vadd.f32 %v2255_v56, %v2254_v45  ;;  %v5905_v14 = vmul.f32 10.0, %v5799_v57  ;;  %v8253_v56 = vld [vmem:[#allocation10_spill] sm:$0xff]  ;;  %3942 = vpow2.f32 %v1409_v46 }
 0x3d0   : > { %vm2063_vm13 = vmand %vm5887_vm11, %vm4410_vm12  ;;  %v1413_v17 = vmul.f32 1.442695, %v5871_v7  ;;  %8254 = vst [vmem:[#allocation10_spill] sm:$0xff] %v5941_v21  ;;  %vm8255_vm6 = vcmp.ne.s32.totalorder %v8222_v50, %v8184_v60  ;;  %2525 = vadd.xlane.f32.xlu0 %v5677_v42  ;;  %v5955_v46 = vadd.f32 %v2329_v51, %v2328_v53  ;;  %3944 = vpow2.f32 %v1411_v20  ;;  %v5986_v53 = vpop.eup %3936 }
 0x3d1   : > { %vm8249_vm9 = vmand %vm8210_vm0, %vm4433_vm2  ;;  %v2266_v16 = vsel %vm2063_vm13, %v4437_v33, 0.0  ;;  %2522 = vadd.xlane.f32.xlu1 %v2521_v48  ;;  %v8256_v48 = vmov 0  ;;  %v1417_v51 = vmul.f32 1.442695, %v5905_v14  ;;  %v5995_v21 = vmul.f32 10.0, %v5828_v10 }
 0x3d2   : > { %v5913_v55 = vsel %vm8249_vm9, 1.0, %v8048_v30  ;;  %v2330_v45 = vmul.f32 %v2266_v16, %v5673_v37  ;;  %vm2064_vm9 = vmand %vm2000_vm1, %vm4433_vm2  ;;  %v1415_v37 = vmul.f32 1.442695, %v5896_v19  ;;  %3946 = vpow2.f32 %v1413_v17 }
 0x3d3   : > { %8250 = vst [vmem:[#allocation23_spill] sm:$0xff] %v5913_v55  ;;  %v2393_v55 = vadd.f32 %v2319_v0, %v2318_v54  ;;  %vm5946_vm3 = vmand %vm2064_vm9, %vm8255_vm6  ;;  %v5953_v0 = vadd.f32 %v2265_v32, %v5787_v58  ;;  %v5957_v54 = vpop.f32.mrb[57].mxu1  ;;  %vm8261_vm9 = vcmp.gt.f32.partialorder %v5623_v23, 0.7  ;;  %vm8262_vm6 = vcmp.eq.f32.partialorder %v4372_v6, %v8228_v38 }
 0x3d4   : > { %v8257_v48 = vsel %vm5946_vm3, 4294967295, %v8256_v48  ;;  %vm8259_vm15 = vmand %vm5761_vm10, %vm4410_vm12  ;;  %v2267_v42 = vsel %vm5946_vm3, %v4439_v4, 0.0  ;;  %v1419_v23 = vmul.f32 1.442695, %v5928_v3  ;;  %3948 = vpow2.f32 %v1415_v37  ;;  %2397 = vadd.xlane.f32.xlu0 %v5442_v8 }
 0x3d5   : > { %8258 = vst [vmem:[#allocation83_spill] sm:$0xff] %v8257_v48  ;;  %v5969_v50 = vsel %vm8259_vm15, 1.0, %v8048_v30  ;;  %vm5979_vm0 = vmand %vm8262_vm6, %vm8261_vm9  ;;  %v2331_v32 = vmul.f32 %v2267_v42, %v5693_v62  ;;  %v5997_v20 = vadd.f32 %v2267_v42, %v2266_v16  ;;  %v6001_v48 = vpop.eup %3938  ;;  %2394 = vadd.xlane.f32.xlu1 %v2393_v55  ;;  %vm8266_vm15 = vcmp.gt.f32.partialorder %v5648_v61, 0.7 }
 0x3d6   : > { %8260 = vst [vmem:[#allocation84_spill] sm:$0xff] %v5969_v50  ;;  %vm7918_vm10 = vmand %vm5979_vm0, %vm4410_vm12  ;;  %v5999_v50 = vpop.f32.mrb[58].mxu1  ;;  %vm8267_vm9 = vcmp.eq.f32.partialorder %v4378_v9, %v8228_v38  ;;  %v6020_v55 = vmul.f32 10.0, %v5846_v59  ;;  %v6024_v44 = vpop.eup %3940  ;;  %v6040_v17 = vsel %vm5859_vm5, 1.0, %v8048_v30  ;;  %v8275_v8 = vmov 0 }
 0x3d7   : > { %v2268_v62 = vsel %vm7918_vm10, %v4437_v33, 0.0  ;;  %vm6014_vm6 = vmand %vm8267_vm9, %vm8266_vm15  ;;  %v6022_v42 = vpop.f32.mrb[59].mxu1  ;;  %v6035_v38 = vadd.f32 %v2331_v32, %v2330_v45  ;;  %8271 = vst [vmem:[#allocation26_spill] sm:$0xff] %v6040_v17  ;;  %3950 = vpow2.f32 %v1417_v51  ;;  %vm1942_vm9 = vcmp.gt.f32.partialorder %v5814_v24, 0.7  ;;  %v8310_v24 = vld [vmem:[#allocation29_spill] sm:$0xff] }
 0x3d8   : > { %v2332_v61 = vmul.f32 %v2268_v62, %v5795_v47  ;;  %vm2066_vm15 = vmand %vm6014_vm6, %vm4433_vm2  ;;  %vm8274_vm6 = vcmp.ne.s32.totalorder %v8236_v39, %v8184_v60  ;;  %vm1878_vm5 = vcmp.eq.f32.partialorder %v4378_v9, %v8270_v40  ;;  %v6066_v18 = vsel %vm2063_vm13, 1.0, %v8048_v30  ;;  %2403 = vadd.xlane.f32.xlu0 %v5797_v26 }
 0x3d9   : > { %vm8272_vm10 = vmand %vm8235_vm8, %vm4433_vm2  ;;  %8278 = vst [vmem:[#allocation86_spill] sm:$0xff] %v6066_v18  ;;  %3952 = vpow2.f32 %v1419_v23  ;;  %v1421_v52 = vmul.f32 1.442695, %v5995_v21  ;;  %vm8280_vm11 = vcmp.ne.s32.totalorder %v8248_v41, %v4384_v13  ;;  %v1423_v13 = vmul.f32 1.442695, %v6020_v55  ;;  %v8284_v41 = vld [vmem:[#allocation57_spill] sm:$0xff] }
 0x3da   : > { %v6048_v47 = vsel %vm8272_vm10, 1.0, %v8048_v30  ;;  %vm6053_vm1 = vmand %vm2066_vm15, %vm8274_vm6  ;;  %v6116_v16 = vmul.f32 10.0, %v5936_v63  ;;  %v1512_v1 = vsel %vm4433_vm2, %v6024_v44, 0.0  ;;  %v8329_v23 = vld [vmem:[#allocation30_spill] sm:$0xff] }
 0x3db   : > { %8273 = vst [vmem:[#allocation11_spill] sm:$0xff] %v6048_v47  ;;  %v8276_v8 = vsel %vm6053_vm1, 4294967295, %v8275_v8  ;;  %v2269_v39 = vsel %vm6053_vm1, %v4439_v4, 0.0  ;;  %vm7921_vm8 = vmand %vm5426_vm7, %vm4433_vm2  ;;  %v6119_v47 = vmul.f32 10.0, %v5957_v54  ;;  %3954 = vpow2.f32 %v1421_v52 }
 0x3dc   : > { %8277 = vst [vmem:[#allocation85_spill] sm:$0xff] %v8276_v8  ;;  %v2333_v45 = vmul.f32 %v2269_v39, %v5826_v15  ;;  %vm8281_vm13 = vmand %vm5374_vm4, %vm4410_vm12  ;;  %v2259_v51 = vsel %vm7921_vm8, %v4439_v4, 0.0  ;;  %v6099_v15 = vpop.f32.mrb[60].mxu1  ;;  %vm8285_vm4 = vcmp.eq.f32.partialorder %v4372_v6, %v8253_v56  ;;  %v8289_v8 = vld [vmem:[#allocation55_spill] sm:$0xff]  ;;  %v6132_v26 = vadd.f32 %v2269_v39, %v2268_v62  ;;  %2537 = vadd.xlane.f32.xlu0 %v5953_v0 }
 0x3dd   : > { %vm6087_vm15 = vmand %vm8281_vm13, %vm8280_vm11  ;;  %v2323_v32 = vmul.f32 %v2259_v51, %v8284_v41  ;;  %v6121_v17 = vpop.f32.mrb[61].mxu1  ;;  %v6123_v41 = vpop.eup %3942  ;;  %vm8291_vm13 = vcmp.eq.f32.partialorder %v4378_v9, %v8253_v56  ;;  %v6154_v62 = vmul.f32 10.0, %v5999_v50  ;;  %v1509_v39 = vsel %vm4410_vm12, %v5959_v34, 0.0  ;;  %v8294_v34 = vld [vmem:[#allocation28_spill] sm:$0xff] }
 0x3de   : > { %v2258_v43 = vsel %vm6087_vm15, %v4437_v33, 0.0  ;;  %vm6110_vm11 = vmand %vm8285_vm4, %vm1939_vm14  ;;  %v6134_v12 = vadd.f32 %v2333_v45, %v2332_v61  ;;  %v6136_v25 = vpop.f32.mrb[62].mxu1  ;;  %vm8290_vm4 = vcmp.gt.f32.partialorder %v5695_v28, 0.7  ;;  %v1510_v28 = vsel %vm4433_vm2, %v5986_v53, 0.0  ;;  %v6164_v45 = vpop.eup %3944 }
 0x3df   : > { %v2322_v18 = vmul.f32 %v2258_v43, %v8289_v8  ;;  %v2527_v29 = vadd.f32 %v2259_v51, %v2258_v43  ;;  %vm7920_vm14 = vmand %vm6110_vm11, %vm4410_vm12  ;;  %v6156_v61 = vpop.f32.mrb[63].mxu1  ;;  %v6177_v53 = vmul.f32 10.0, %v6022_v42  ;;  %v6192_v43 = vpop.eup %3946  ;;  %3956 = vpow2.f32 %v1423_v13 }
 0x3e0   : > { %v2270_v35 = vsel %vm7920_vm14, %v4437_v33, 0.0  ;;  %vm6149_vm6 = vmand %vm8291_vm13, %vm8290_vm4  ;;  %vm8295_vm13 = vcmp.ne.s32.totalorder %v8265_v49, %v8184_v60  ;;  %v1427_v52 = vmul.f32 1.442695, %v6119_v47  ;;  %v6209_v8 = vpop.eup %3948  ;;  %v1429_v13 = vmul.f32 1.442695, %v6154_v62  ;;  %2412 = vadd.xlane.f32.xlu0 %v6035_v38 }
 0x3e1   : > { %2528 = vadd.xlane.f32.xlu1 %v2527_v29  ;;  %v2334_v56 = vmul.f32 %v2270_v35, %v5871_v7  ;;  %vm2068_vm4 = vmand %vm6149_vm6, %vm4433_vm2  ;;  %v2399_v51 = vadd.f32 %v2323_v32, %v2322_v18  ;;  %v8296_v29 = vmov 0  ;;  %v1425_v7 = vmul.f32 1.442695, %v6116_v16 }
 0x3e2   : > { %vm6182_vm8 = vmand %vm2068_vm4, %vm8295_vm13  ;;  %v6190_v18 = vmul.f32 10.0, %v6099_v15  ;;  %vm8299_vm13 = vcmp.gt.f32.partialorder %v5799_v57, 0.7  ;;  %vm8300_vm4 = vcmp.eq.f32.partialorder %v4372_v6, %v8270_v40  ;;  %v6207_v32 = vadd.f32 %v1510_v28, %v1509_v39  ;;  %v6230_v28 = vpop.eup %3950 }
 0x3e3   : > { %v8297_v29 = vsel %vm6182_vm8, 4294967295, %v8296_v29  ;;  %v2271_v49 = vsel %vm6182_vm8, %v4439_v4, 0.0  ;;  %vm6202_vm10 = vmand %vm8300_vm4, %vm8299_vm13  ;;  %vm1881_vm6 = vcmp.eq.f32.partialorder %v4372_v6, %v8303_v36  ;;  %8306 = vst [vmem:[#allocation12_spill] sm:$0xff] %v6230_v28  ;;  %v6256_v5 = vpop.eup %3952  ;;  %3958 = vpow2.f32 %v1425_v7 }
 0x3e4   : > { %8298 = vst [vmem:[#allocation27_spill] sm:$0xff] %v8297_v29  ;;  %vm8304_vm14 = vmand %vm5979_vm0, %vm4410_vm12  ;;  %v2335_v29 = vmul.f32 %v2271_v49, %v5896_v19  ;;  %v6228_v39 = vadd.f32 %v2271_v49, %v2270_v35  ;;  %v1431_v35 = vmul.f32 1.442695, %v6177_v53  ;;  %v1511_v49 = vsel %vm4410_vm12, %v6001_v48, 0.0  ;;  %2543 = vadd.xlane.f32.xlu0 %v6132_v26 }
 0x3e5   : > { %v6219_v57 = vsel %vm8304_vm14, 1.0, %v8048_v30  ;;  %vm2069_vm13 = vmand %vm6202_vm10, %vm4410_vm12  ;;  %2400 = vadd.xlane.f32.xlu1 %v2399_v51  ;;  %v6249_v51 = vmul.f32 10.0, %v6121_v17  ;;  %8309 = vst [vmem:[#allocation55_spill] sm:$0xff] %v6256_v5  ;;  %v1433_v48 = vmul.f32 1.442695, %v6190_v18  ;;  %v8314_v38 = vmov 0 }
 0x3e6   : > { %8305 = vst [vmem:[#allocation57_spill] sm:$0xff] %v6219_v57  ;;  %v2272_v19 = vsel %vm2069_vm13, %v4437_v33, 0.0  ;;  %vm6243_vm0 = vmand %vm1878_vm5, %vm1942_vm9  ;;  %v6254_v57 = vpop.f32.mrb[64].mxu1  ;;  %v6269_v28 = vadd.f32 %v2335_v29, %v2334_v56  ;;  %3960 = vpow2.f32 %v1427_v52  ;;  %v6290_v56 = vmul.f32 10.0, %v6136_v25 }
 0x3e7   : > { %v2336_v40 = vmul.f32 %v2272_v19, %v5905_v14  ;;  %vm2070_vm9 = vmand %vm6243_vm0, %vm4433_vm2  ;;  %v6271_v5 = vpop.f32.mrb[65].mxu1  ;;  %vm8313_vm0 = vcmp.ne.s32.totalorder %v8279_v11, %v8184_v60  ;;  %3962 = vpow2.f32 %v1429_v13  ;;  %v6310_v52 = vmul.f32 10.0, %v6156_v61 }
 0x3e8   : > { %vm8311_vm14 = vmand %vm5426_vm7, %vm4433_vm2  ;;  %v6295_v29 = vpop.f32.mrb[66].mxu1  ;;  %vm8317_vm7 = vcmp.gt.f32.partialorder %v5828_v10, 0.7  ;;  %v6312_v44 = vadd.f32 %v1512_v1, %v1511_v49  ;;  %3964 = vpow2.f32 %v1431_v35  ;;  %v1435_v13 = vmul.f32 1.442695, %v6249_v51  ;;  %2415 = vadd.xlane.f32.xlu0 %v6134_v12 }
 0x3e9   : > { %v6279_v14 = vsel %vm8311_vm14, 1.0, %v8048_v30  ;;  %vm6284_vm4 = vmand %vm2070_vm9, %vm8313_vm0  ;;  %vm8318_vm14 = vcmp.eq.f32.partialorder %v4372_v6, %v8288_v31  ;;  %8321 = vst [vmem:[#allocation29_spill] sm:$0xff] %v6310_v52  ;;  %v6314_v58 = vpop.f32.mrb[67].mxu1  ;;  %2406 = vadd.xlane.f32.xlu1 %v5844_v22  ;;  %v6331_v1 = vsel %vm6087_vm15, 1.0, %v8048_v30  ;;  %vm8327_vm15 = vcmp.eq.f32.partialorder %v4378_v9, %v8288_v31 }
 0x3ea   : > { %8312 = vst [vmem:[#allocation28_spill] sm:$0xff] %v6279_v14  ;;  %v8315_v38 = vsel %vm6284_vm4, 4294967295, %v8314_v38  ;;  %v2273_v11 = vsel %vm6284_vm4, %v4439_v4, 0.0  ;;  %vm6305_vm9 = vmand %vm8318_vm14, %vm8317_vm7  ;;  %v8322_v14 = vld [vmem:[#allocation15_spill] sm:$0xff]  ;;  %vm8326_vm14 = vcmp.gt.f32.partialorder %v5846_v59, 0.7  ;;  %3966 = vpow2.f32 %v1433_v48 }
 0x3eb   : > { %8316 = vst [vmem:[#allocation14_spill] sm:$0xff] %v8315_v38  ;;  %v2337_v10 = vmul.f32 %v2273_v11, %v5928_v3  ;;  %vm2071_vm7 = vmand %vm6305_vm9, %vm4410_vm12  ;;  %v6326_v49 = vadd.f32 %v2273_v11, %v2272_v19  ;;  %v6361_v37 = vsel %vm2069_vm13, 1.0, %v8048_v30  ;;  %v1437_v31 = vmul.f32 1.442695, %v6290_v56  ;;  %v6372_v19 = vpop.eup %3954 }
 0x3ec   : > { %8323 = vst [vmem:[#allocation15_spill] sm:$0xff] %v6331_v1  ;;  %vm8324_vm0 = vmand %vm6110_vm11, %vm4410_vm12  ;;  %v2274_v3 = vsel %vm2071_vm7, %v4437_v33, 0.0  ;;  %vm1884_vm11 = vcmp.eq.f32.partialorder %v4378_v9, %v8322_v14  ;;  %v6370_v26 = vmul.f32 10.0, %v6254_v57  ;;  %vm8331_vm10 = vcmp.ne.s32.totalorder %v8294_v34, %v8184_v60  ;;  %v6391_v1 = vpop.eup %3956  ;;  %1590 = vadd.xlane.f32.xlu0 %v6207_v32 }
 0x3ed   : > { %v6339_v22 = vsel %vm8324_vm0, 1.0, %v8048_v30  ;;  %vm2008_vm5 = vmand %vm8327_vm15, %vm8326_vm14  ;;  %8328 = vst [vmem:[#allocation88_spill] sm:$0xff] %v6361_v37  ;;  %v2338_v59 = vmul.f32 %v2274_v3, %v5995_v21  ;;  %v8332_v0 = vmov 0  ;;  %v1439_v21 = vmul.f32 1.442695, %v6310_v52  ;;  %2409 = vadd.xlane.f32.xlu1 %v5955_v46  ;;  %v8340_v46 = vld [vmem:[#allocation16_spill] sm:$0xff] }
 0x3ee   : > { %8325 = vst [vmem:[#allocation87_spill] sm:$0xff] %v6339_v22  ;;  %vm2072_vm0 = vmand %vm2008_vm5, %vm4433_vm2  ;;  %v6384_v35 = vmul.f32 10.0, %v6271_v5  ;;  %v6386_v48 = vadd.f32 %v2337_v10, %v2336_v40  ;;  %v1513_v11 = vsel %vm4410_vm12, %v6123_v41, 0.0  ;;  %vm8336_vm5 = vcmp.gt.f32.partialorder %v5936_v63, 0.7 }
 0x3ef   : > { %8330 = vst [vmem:[#allocation30_spill] sm:$0xff] %v6370_v26  ;;  %vm6377_vm13 = vmand %vm2072_vm0, %vm8331_vm10  ;;  %3968 = vpow2.f32 %v1435_v13  ;;  %v6407_v41 = vmul.f32 10.0, %v6295_v29  ;;  %v1514_v10 = vsel %vm4433_vm2, %v6164_v45, 0.0  ;;  %v6426_v45 = vmul.f32 10.0, %v6314_v58 }
 0x3f0   : > { %v8333_v0 = vsel %vm6377_vm13, 4294967295, %v8332_v0  ;;  %8335 = vst [vmem:[#allocation90_spill] sm:$0xff] %v6384_v35  ;;  %v2275_v34 = vsel %vm6377_vm13, %v4439_v4, 0.0  ;;  %vm6402_vm0 = vmand %vm1881_vm6, %vm8336_vm5  ;;  %v6428_v37 = vadd.f32 %v1514_v10, %v1513_v11  ;;  %vm8341_vm10 = vcmp.gt.f32.partialorder %v5957_v54, 0.7  ;;  %v6453_v10 = vpop.eup %3958  ;;  %2549 = vadd.xlane.f32.xlu0 %v6326_v49 }
 0x3f1   : > { %8334 = vst [vmem:[#allocation89_spill] sm:$0xff] %v8333_v0  ;;  %8339 = vst [vmem:[#allocation91_spill] sm:$0xff] %v6407_v41  ;;  %v6412_v0 = vpop.f32.mrb[68].mxu1  ;;  %v2339_v63 = vmul.f32 %v2275_v34, %v6020_v55  ;;  %v6423_v13 = vadd.f32 %v2275_v34, %v2274_v3  ;;  %vm8342_vm5 = vcmp.eq.f32.partialorder %v4378_v9, %v8303_v36  ;;  %3970 = vpow2.f32 %v1437_v31  ;;  %v8346_v36 = vld [vmem:[#allocation31_spill] sm:$0xff]  ;;  %v6469_v52 = vpop.eup %3960 }
 0x3f2   : > { %vm7927_vm6 = vmand %vm6402_vm0, %vm4410_vm12  ;;  %v6430_v38 = vpop.f32.mrb[69].mxu1  ;;  %v1441_v3 = vmul.f32 1.442695, %v6370_v26  ;;  %v6449_v11 = vmul.f32 10.0, %v6412_v0  ;;  %3972 = vpow2.f32 %v1439_v21  ;;  %v1443_v31 = vmul.f32 1.442695, %v6384_v35  ;;  %2540 = vadd.xlane.f32.xlu1 %v5997_v20  ;;  %v6490_v12 = vpop.eup %3962 }
 0x3f3   : > { %v2276_v55 = vsel %vm7927_vm6, %v4437_v33, 0.0  ;;  %vm6443_vm15 = vmand %vm8342_vm5, %vm8341_vm10  ;;  %v6451_v34 = vpop.f32.mrb[70].mxu1  ;;  %v6465_v22 = vadd.f32 %v2339_v63, %v2338_v59  ;;  %vm8348_vm6 = vcmp.ne.s32.totalorder %v8310_v24, %v8184_v60  ;;  %v1445_v21 = vmul.f32 1.442695, %v6407_v41 }
 0x3f4   : > { %8345 = vst [vmem:[#allocation16_spill] sm:$0xff] %v6449_v11  ;;  %v2340_v54 = vmul.f32 %v2276_v55, %v6116_v16  ;;  %vm2074_vm10 = vmand %vm6443_vm15, %vm4433_vm2  ;;  %v6467_v26 = vpop.f32.mrb[71].mxu1  ;;  %v8349_v16 = vmov 0  ;;  %v6482_v59 = vmul.f32 10.0, %v6430_v38  ;;  %v1515_v63 = vsel %vm4410_vm12, %v6192_v43, 0.0  ;;  %2421 = vadd.xlane.f32.xlu0 %v6386_v48 }
 0x3f5   : > { %8347 = vst [vmem:[#allocation31_spill] sm:$0xff] %v6465_v22  ;;  %vm6474_vm14 = vmand %vm2074_vm10, %vm8348_vm6  ;;  %v1516_v24 = vsel %vm4433_vm2, %v6209_v8, 0.0  ;;  %vm8353_vm6 = vcmp.gt.f32.partialorder %v5999_v50, 0.7  ;;  %vm8354_vm10 = vcmp.eq.f32.partialorder %v4372_v6, %v8322_v14  ;;  %v1447_v43 = vmul.f32 1.442695, %v6426_v45 }
 0x3f6   : > { %v8350_v16 = vsel %vm6474_vm14, 4294967295, %v8349_v16  ;;  %8352 = vst [vmem:[#allocation93_spill] sm:$0xff] %v6482_v59  ;;  %v2277_v20 = vsel %vm6474_vm14, %v4439_v4, 0.0  ;;  %vm6500_vm15 = vmand %vm8354_vm10, %vm8353_vm6  ;;  %v6506_v8 = vadd.f32 %v1516_v24, %v1515_v63  ;;  %v6509_v35 = vmul.f32 10.0, %v6451_v34  ;;  %v8358_v22 = vld [vmem:[#allocation17_spill] sm:$0xff]  ;;  %2546 = vadd.xlane.f32.xlu1 %v6228_v39 }
 0x3f7   : > { %8351 = vst [vmem:[#allocation92_spill] sm:$0xff] %v8350_v16  ;;  %v6511_v16 = vpop.eup %3964  ;;  %v2341_v50 = vmul.f32 %v2277_v20, %v6119_v47  ;;  %vm7934_vm6 = vmand %vm6500_vm15, %vm4410_vm12  ;;  %3974 = vpow2.f32 %v1441_v3  ;;  %v1449_v32 = vmul.f32 1.442695, %v6449_v11  ;;  %v6522_v63 = vmul.f32 10.0, %v6467_v26  ;;  %v6557_v11 = vpop.f32.mrb[72].mxu1 }
 0x3f8   : > { %8357 = vst [vmem:[#allocation94_spill] sm:$0xff] %v6509_v35  ;;  %v6524_v24 = vpop.eup %3966  ;;  %v6532_v47 = vsel %vm2071_vm7, 1.0, %v8048_v30  ;;  %v2278_v3 = vsel %vm7934_vm6, %v4437_v33, 0.0  ;;  %vm8361_vm10 = vcmp.gt.f32.partialorder %v6022_v42, 0.7  ;;  %3976 = vpow2.f32 %v1443_v31  ;;  %1596 = vadd.xlane.f32.xlu0 %v6428_v37 }
 0x3f9   : > { %8359 = vst [vmem:[#allocation17_spill] sm:$0xff] %v6522_v63  ;;  %8360 = vst [vmem:[#allocation95_spill] sm:$0xff] %v6532_v47  ;;  %v2342_v7 = vmul.f32 %v2278_v3, %v6154_v62  ;;  %v8362_v47 = vld [vmem:[#allocation34_spill] sm:$0xff]  ;;  %3978 = vpow2.f32 %v1445_v21  ;;  %v1451_v42 = vmul.f32 1.442695, %v6482_v59  ;;  %v6555_v14 = vadd.f32 %v2277_v20, %v2276_v55  ;;  %v6574_v21 = vpop.f32.mrb[73].mxu1  ;;  %v6576_v20 = vpop.eup %3968 }
 0x3fa   : > { %vm2012_vm5 = vmand %vm1884_vm11, %vm8361_vm10  ;;  %vm8363_vm11 = vcmp.ne.s32.totalorder %v8329_v23, %v8184_v60  ;;  %v8364_v62 = vmov 0  ;;  %3980 = vpow2.f32 %v1447_v43  ;;  %v1453_v39 = vmul.f32 1.442695, %v6509_v35  ;;  %8368 = vst [vmem:[#allocation97_spill] sm:$0xff] %v6574_v21  ;;  %v8374_v35 = vld [vmem:[#allocation18_spill] sm:$0xff]  ;;  %2418 = vadd.xlane.f32.xlu1 %v6269_v28 }
 0x3fb   : > { %vm2076_vm7 = vmand %vm2012_vm5, %vm4433_vm2  ;;  %v6569_v31 = vadd.f32 %v2341_v50, %v2340_v54  ;;  %v6572_v55 = vmul.f32 10.0, %v6557_v11  ;;  %3982 = vpow2.f32 %v1449_v32  ;;  %v1455_v54 = vmul.f32 1.442695, %v6522_v63  ;;  %v6594_v50 = vpop.f32.mrb[74].mxu1 }
 0x3fc   : > { %vm6562_vm10 = vmand %vm2076_vm7, %vm8363_vm11  ;;  %vm8369_vm7 = vcmp.gt.f32.partialorder %v6099_v15, 0.7  ;;  %vm8370_vm11 = vcmp.eq.f32.partialorder %v4372_v6, %v8340_v46  ;;  %v6592_v43 = vmul.f32 10.0, %v6574_v21  ;;  %8373 = vst [vmem:[#allocation98_spill] sm:$0xff] %v6594_v50  ;;  %v6608_v63 = vmul.f32 10.0, %v6594_v50  ;;  %v6610_v59 = vpop.f32.mrb[75].mxu1  ;;  %v6612_v21 = vpop.eup %3970  ;;  %2555 = vadd.xlane.f32.xlu0 %v6555_v14 }
 0x3fd   : > { %v8365_v62 = vsel %vm6562_vm10, 4294967295, %v8364_v62  ;;  %8367 = vst [vmem:[#allocation96_spill] sm:$0xff] %v6572_v55  ;;  %v2279_v23 = vsel %vm6562_vm10, %v4439_v4, 0.0  ;;  %vm6586_vm5 = vmand %vm8370_vm11, %vm8369_vm7  ;;  %vm8376_vm11 = vcmp.gt.f32.partialorder %v6121_v17, 0.7  ;;  %vm8377_vm6 = vcmp.eq.f32.partialorder %v4378_v9, %v8340_v46  ;;  %v8382_v46 = vld [vmem:[#allocation35_spill] sm:$0xff] }
 0x3fe   : > { %8366 = vst [vmem:[#allocation34_spill] sm:$0xff] %v8365_v62  ;;  %v2343_v15 = vmul.f32 %v2279_v23, %v6177_v53  ;;  %vm7945_vm7 = vmand %vm6586_vm5, %vm4410_vm12  ;;  %v6604_v32 = vadd.f32 %v2279_v23, %v2278_v3  ;;  %v1457_v62 = vmul.f32 1.442695, %v6572_v55  ;;  %3984 = vpow2.f32 %v1451_v42  ;;  %v8380_v55 = vld [vmem:[#allocation12_spill] sm:$0xff]  ;;  %1593 = vadd.xlane.f32.xlu1 %v6312_v44 }
 0x3ff   : > { %v2280_v53 = vsel %vm7945_vm7, %v4437_v33, 0.0  ;;  %vm6625_vm9 = vmand %vm8377_vm6, %vm8376_vm11  ;;  %v1459_v23 = vmul.f32 1.442695, %v6592_v43  ;;  %v1517_v50 = vsel %vm4410_vm12, %v8380_v55, 0.0  ;;  %3986 = vpow2.f32 %v1453_v39  ;;  %v8392_v3 = vld [vmem:[#allocation24_spill] sm:$0xff] }
 0x400   : > { %8375 = vst [vmem:[#allocation18_spill] sm:$0xff] %v6604_v32  ;;  %v6634_v32 = vpop.eup %3972  ;;  %vm8381_vm6 = vmand %vm6402_vm0, %vm4410_vm12  ;;  %v2344_v28 = vmul.f32 %v2280_v53, %v6190_v18  ;;  %v6654_v42 = vadd.f32 %v2343_v15, %v2342_v7  ;;  %v8385_v40 = vmov 0  ;;  %3988 = vpow2.f32 %v1455_v54  ;;  %v8387_v7 = vld [vmem:[#allocation55_spill] sm:$0xff]  ;;  %2427 = vadd.xlane.f32.xlu0 %v6569_v31 }
 0x401   : > { %v6644_v17 = vsel %vm8381_vm6, 1.0, %v8048_v30  ;;  %vm2078_vm11 = vmand %vm6625_vm9, %vm4433_vm2  ;;  %vm8384_vm6 = vcmp.ne.s32.totalorder %v8346_v36, %v8184_v60  ;;  %v1461_v48 = vmul.f32 1.442695, %v6608_v63  ;;  %v1518_v41 = vsel %vm4433_vm2, %v8387_v7, 0.0  ;;  %v6693_v15 = vpop.eup %3974  ;;  %v8493_v36 = vld [vmem:[#allocation87_spill] sm:$0xff] }
 0x402   : > { %vm8383_vm0 = vmand %vm6500_vm15, %vm4410_vm12  ;;  %vm8388_vm15 = vcmp.gt.f32.partialorder %v6136_v25, 0.7  ;;  %3990 = vpow2.f32 %v1457_v62  ;;  %v6688_v55 = vadd.f32 %v1518_v41, %v1517_v50  ;;  %v1519_v54 = vsel %vm4410_vm12, %v6372_v19, 0.0  ;;  %v6709_v50 = vpop.eup %3976  ;;  %2552 = vadd.xlane.f32.xlu1 %v6423_v13 }
 0x403   : > { %v6662_v18 = vsel %vm8383_vm0, 1.0, %v8048_v30  ;;  %vm6667_vm9 = vmand %vm2078_vm11, %vm8384_vm6  ;;  %vm8389_vm11 = vcmp.eq.f32.partialorder %v4372_v6, %v8358_v22  ;;  %3992 = vpow2.f32 %v1459_v23  ;;  %v1520_v19 = vsel %vm4433_vm2, %v6391_v1, 0.0  ;;  %v6735_v7 = vpop.eup %3978 }
 0x404   : > { %v8386_v40 = vsel %vm6667_vm9, 4294967295, %v8385_v40  ;;  %v2281_v39 = vsel %vm6667_vm9, %v4439_v4, 0.0  ;;  %vm6684_vm0 = vmand %vm8389_vm11, %vm8388_vm15  ;;  %vm8393_vm6 = vcmp.gt.f32.partialorder %v6156_v61, 0.7  ;;  %vm8394_vm11 = vcmp.eq.f32.partialorder %v4378_v9, %v8358_v22  ;;  %v8397_v22 = vld [vmem:[#allocation44_spill] sm:$0xff]  ;;  %v3981_v41 = vpop.eup %3980  ;;  %1602 = vadd.xlane.f32.xlu0 %v6688_v55  ;;  %v8547_v55 = vld [vmem:[#allocation75_spill] sm:$0xff] }
 0x405   : > { %v2345_v25 = vmul.f32 %v2281_v39, %v6249_v51  ;;  %vm7946_vm15 = vmand %vm6684_vm0, %vm4410_vm12  ;;  %v6707_v62 = vadd.f32 %v2281_v39, %v2280_v53  ;;  %v6728_v1 = vmul.f32 10.0, %v6610_v59  ;;  %v6730_v53 = vadd.f32 %v1520_v19, %v1519_v54  ;;  %v8402_v54 = vld [vmem:[#allocation76_spill] sm:$0xff] }
 0x406   : > { %v2282_v51 = vsel %vm7946_vm15, %v4437_v33, 0.0  ;;  %vm6722_vm14 = vmand %vm8394_vm11, %vm8393_vm6  ;;  %v1521_v23 = vsel %vm4410_vm12, %v6453_v10, 0.0  ;;  %3994 = vpow2.f32 %v1461_v48  ;;  %v1522_v10 = vsel %vm4433_vm2, %v6469_v52, 0.0  ;;  %v8401_v48 = vld [vmem:[#allocation8_spill] sm:$0xff] }
 0x407   : > { %v2346_v61 = vmul.f32 %v2282_v51, %v6290_v56  ;;  %vm2080_vm6 = vmand %vm6722_vm14, %vm4433_vm2  ;;  %v6746_v37 = vadd.f32 %v2345_v25, %v2344_v28  ;;  %vm8398_vm15 = vcmp.ne.s32.totalorder %v8362_v47, %v8184_v60  ;;  %v8399_v56 = vmov 0  ;;  %v6771_v47 = vpop.eup %3982 }
 0x408   : > { %vm6754_vm7 = vmand %vm2080_vm6, %vm8398_vm15  ;;  %v6759_v39 = vadd.f32 %v1522_v10, %v1521_v23  ;;  %v1523_v28 = vsel %vm4410_vm12, %v6490_v12, 0.0  ;;  %v1524_v52 = vsel %vm4433_vm2, %v6511_v16, 0.0  ;;  %v6769_v25 = vadd.f32 %v8402_v54, %v8401_v48  ;;  %v8409_v10 = vld [vmem:[#allocation29_spill] sm:$0xff]  ;;  %2561 = vadd.xlane.f32.xlu0 %v6707_v62  ;;  %v8512_v12 = vld [vmem:[#allocation42_spill] sm:$0xff] }
 0x409   : > { %v8400_v56 = vsel %vm6754_vm7, 4294967295, %v8399_v56  ;;  %v2283_v19 = vsel %vm6754_vm7, %v4439_v4, 0.0  ;;  %vm8404_vm15 = vcmp.gt.f32.partialorder %v6254_v57, 0.7  ;;  %vm8405_vm6 = vcmp.eq.f32.partialorder %v4372_v6, %v8374_v35  ;;  %v8408_v57 = vld [vmem:[#allocation32_spill] sm:$0xff] }
 0x40a   : > { %8403 = vst [vmem:[#allocation12_spill] sm:$0xff] %v6769_v25  ;;  %vm6781_vm14 = vmand %vm8405_vm6, %vm8404_vm15  ;;  %v6786_v16 = vadd.f32 %v1524_v52, %v1523_v28  ;;  %v1525_v44 = vsel %vm4410_vm12, %v6524_v24, 0.0  ;;  %v1526_v23 = vsel %vm4433_vm2, %v6576_v20, 0.0  ;;  %v2347_v48 = vmul.f32 %v2283_v19, %v8409_v10  ;;  %v3985_v28 = vpop.eup %3984  ;;  %v8417_v10 = vld [vmem:[#allocation62_spill] sm:$0xff] }
 0x40b   : > { %vm7948_vm15 = vmand %vm6781_vm14, %vm4410_vm12  ;;  %v6803_v13 = vadd.f32 %v2283_v19, %v2282_v51  ;;  %v6805_v24 = vadd.f32 %v1526_v23, %v1525_v44  ;;  %v1527_v20 = vsel %vm4410_vm12, %v6612_v21, 0.0  ;;  %vm8411_vm6 = vcmp.gt.f32.partialorder %v6271_v5, 0.7  ;;  %v8413_v51 = vld [vmem:[#allocation61_spill] sm:$0xff]  ;;  %v6828_v19 = vpop.eup %3986  ;;  %v8414_v5 = vld [vmem:[#allocation30_spill] sm:$0xff] }
 0x40c   : > { %v2284_v52 = vsel %vm7948_vm15, %v4437_v33, 0.0  ;;  %vm8412_vm11 = vcmp.eq.f32.partialorder %v4378_v9, %v8374_v35  ;;  %v1463_v14 = vmul.f32 1.442695, %v6728_v1  ;;  %v1528_v21 = vsel %vm4433_vm2, %v6634_v32, 0.0  ;;  %v8415_v35 = vld [vmem:[#allocation45_spill] sm:$0xff]  ;;  %v6844_v25 = vpop.eup %3988  ;;  %2433 = vadd.xlane.f32.xlu0 %v6746_v37 }
 0x40d   : > { %8410 = vst [vmem:[#allocation35_spill] sm:$0xff] %v6805_v24  ;;  %vm2018_vm7 = vmand %vm8412_vm11, %vm8411_vm6  ;;  %v1495_v54 = vsel %vm4410_vm12, %v8413_v51, 0.0  ;;  %v2348_v44 = vmul.f32 %v2284_v52, %v8414_v5  ;;  %v6837_v23 = vadd.f32 %v2347_v48, %v2346_v61  ;;  %v6839_v32 = vadd.f32 %v1528_v21, %v1527_v20  ;;  %v8421_v24 = vld [vmem:[#allocation31_spill] sm:$0xff]  ;;  %v6866_v21 = vpop.eup %3990  ;;  %v8498_v37 = vld [vmem:[#allocation57_spill] sm:$0xff] }
 0x40e   : > { %vm2082_vm11 = vmand %vm2018_vm7, %vm4433_vm2  ;;  %v1496_v51 = vsel %vm4433_vm2, %v8417_v10, 0.0  ;;  %vm8418_vm15 = vcmp.ne.s32.totalorder %v8382_v46, %v8184_v60  ;;  %v8419_v5 = vmov 0  ;;  %2424 = vadd.xlane.f32.xlu1 %v8421_v24  ;;  %v1529_v48 = vsel %vm4410_vm12, %v6693_v15, 0.0 }
 0x40f   : > { %8416 = vst [vmem:[#allocation55_spill] sm:$0xff] %v6839_v32  ;;  %vm6849_vm9 = vmand %vm2082_vm11, %vm8418_vm15  ;;  %v6855_v61 = vadd.f32 %v1496_v51, %v1495_v54  ;;  %v1530_v20 = vsel %vm4433_vm2, %v6709_v50, 0.0  ;;  %v1531_v46 = vsel %vm4410_vm12, %v6735_v7, 0.0  ;;  %vm8423_vm15 = vcmp.gt.f32.partialorder %v6295_v29, 0.7  ;;  %v8428_v54 = vld [vmem:[#allocation66_spill] sm:$0xff]  ;;  %v6888_v51 = vpop.eup %3992 }
 0x410   : > { %v8420_v5 = vsel %vm6849_vm9, 4294967295, %v8419_v5  ;;  %v2285_v24 = vsel %vm6849_vm9, %v4439_v4, 0.0  ;;  %vm8424_vm11 = vcmp.eq.f32.partialorder %v4372_v6, %v8392_v3  ;;  %v8425_v15 = vmov 0  ;;  %v8429_v29 = vld [vmem:[#allocation36_spill] sm:$0xff]  ;;  %1608 = vadd.xlane.f32.xlu0 %v6759_v39 }
 0x411   : > { %8422 = vst [vmem:[#allocation24_spill] sm:$0xff] %v6855_v61  ;;  %vm6876_vm7 = vmand %vm8424_vm11, %vm8423_vm15  ;;  %v6881_v50 = vadd.f32 %v1530_v20, %v1529_v48  ;;  %v1532_v7 = vsel %vm4433_vm2, %v3981_v41, 0.0  ;;  %v1497_v10 = vsel %vm4410_vm12, %v8428_v54, 0.0  ;;  %v8430_v61 = vld [vmem:[#allocation90_spill] sm:$0xff]  ;;  %v6898_v31 = vadd.f32 %v2285_v24, %v2284_v52  ;;  %v8432_v48 = vld [vmem:[#allocation68_spill] sm:$0xff] }
 0x412   : > { %v8426_v15 = vsel %vm6876_vm7, 4294967295, %v8425_v15  ;;  %v2349_v32 = vmul.f32 %v2285_v24, %v8430_v61  ;;  %vm7952_vm15 = vmand %vm6876_vm7, %vm4410_vm12  ;;  %v6900_v41 = vadd.f32 %v1532_v7, %v1531_v46  ;;  %v1498_v20 = vsel %vm4433_vm2, %v8432_v48, 0.0  ;;  %v8436_v46 = vld [vmem:[#allocation70_spill] sm:$0xff]  ;;  %v6921_v7 = vpop.eup %3994  ;;  %v8437_v54 = vld [vmem:[#allocation91_spill] sm:$0xff]  ;;  %1599 = vadd.xlane.f32.xlu1 %v6506_v8 }
 0x413   : > { %8427 = vst [vmem:[#allocation44_spill] sm:$0xff] %v6881_v50  ;;  %v2286_v61 = vsel %vm7952_vm15, %v4437_v33, 0.0  ;;  %vm8433_vm6 = vcmp.gt.f32.partialorder %v6314_v58, 0.7  ;;  %vm8434_vm11 = vcmp.eq.f32.partialorder %v4378_v9, %v8392_v3  ;;  %3996 = vpow2.f32 %v1463_v14  ;;  %v8438_v58 = vld [vmem:[#allocation46_spill] sm:$0xff]  ;;  %v8439_v14 = vld [vmem:[#allocation21_spill] sm:$0xff] }
 0x414   : > { %8431 = vst [vmem:[#allocation8_spill] sm:$0xff] %v6900_v41  ;;  %vm2020_vm9 = vmand %vm8434_vm11, %vm8433_vm6  ;;  %v6916_v52 = vadd.f32 %v1498_v20, %v1497_v10  ;;  %v1499_v24 = vsel %vm4410_vm12, %v8436_v46, 0.0  ;;  %v2350_v48 = vmul.f32 %v2286_v61, %v8437_v54  ;;  %v6931_v3 = vadd.f32 %v2349_v32, %v2348_v44  ;;  %v8444_v32 = vld [vmem:[#allocation22_spill] sm:$0xff]  ;;  %v8486_v50 = vld [vmem:[#allocation93_spill] sm:$0xff]  ;;  %2567 = vadd.xlane.f32.xlu0 %v6898_v31 }
 0x415   : > { %vm2084_vm15 = vmand %vm2020_vm9, %vm4433_vm2  ;;  %v1500_v10 = vsel %vm4433_vm2, %v8439_v14, 0.0  ;;  %v1533_v20 = vsel %vm4410_vm12, %v6771_v47, 0.0  ;;  %vm8440_vm11 = vcmp.ne.s32.totalorder %v8397_v22, %v8184_v60  ;;  %v8441_v46 = vmov 0  ;;  %v8445_v54 = vld [vmem:[#allocation78_spill] sm:$0xff] }
 0x416   : > { %8435 = vst [vmem:[#allocation76_spill] sm:$0xff] %v6916_v52  ;;  %vm6942_vm10 = vmand %vm2084_vm15, %vm8440_vm11  ;;  %v6948_v8 = vadd.f32 %v1500_v10, %v1499_v24  ;;  %v1534_v44 = vsel %vm4433_vm2, %v3985_v28, 0.0  ;;  %v1503_v47 = vsel %vm4410_vm12, %v8444_v32, 0.0  ;;  %v1504_v22 = vsel %vm4433_vm2, %v8445_v54, 0.0  ;;  %v8452_v10 = vld [vmem:[#allocation71_spill] sm:$0xff]  ;;  %v8453_v54 = vld [vmem:[#allocation48_spill] sm:$0xff] }
 0x417   : > { %v8442_v46 = vsel %vm6942_vm10, 4294967295, %v8441_v46  ;;  %v2287_v14 = vsel %vm6942_vm10, %v4439_v4, 0.0  ;;  %vm8446_vm15 = vcmp.gt.f32.partialorder %v6412_v0, 0.7  ;;  %vm8447_vm11 = vcmp.eq.f32.partialorder %v4372_v6, %v8408_v57  ;;  %vm8457_vm6 = vmand %vm6586_vm5, %vm4410_vm12 }
 0x418   : > { %8443 = vst [vmem:[#allocation32_spill] sm:$0xff] %v6948_v8  ;;  %vm6966_vm9 = vmand %vm8447_vm11, %vm8446_vm15  ;;  %v6970_v28 = vadd.f32 %v1534_v44, %v1533_v20  ;;  %v6972_v24 = vadd.f32 %v1504_v22, %v1503_v47  ;;  %v1501_v32 = vsel %vm4410_vm12, %v8452_v10, 0.0  ;;  %v2351_v0 = vmul.f32 %v2287_v14, %v6426_v45  ;;  %v8454_v8 = vld [vmem:[#allocation97_spill] sm:$0xff]  ;;  %2439 = vadd.xlane.f32.xlu0 %v6931_v3 }
 0x419   : > { %vm7955_vm15 = vmand %vm6966_vm9, %vm4410_vm12  ;;  %v6985_v20 = vadd.f32 %v2287_v14, %v2286_v61  ;;  %v8455_v44 = vld [vmem:[#allocation49_spill] sm:$0xff]  ;;  %v6999_v45 = vsel %vm8457_vm6, 1.0, %v8048_v30  ;;  %vm8458_vm11 = vcmp.gt.f32.partialorder %v6430_v38, 0.7  ;;  %vm8459_vm10 = vcmp.eq.f32.partialorder %v4378_v9, %v8408_v57  ;;  %v8460_v14 = vld [vmem:[#allocation18_spill] sm:$0xff] }
 0x41a   : > { %8450 = vst [vmem:[#allocation29_spill] sm:$0xff] %v6970_v28  ;;  %8451 = vst [vmem:[#allocation61_spill] sm:$0xff] %v6972_v24  ;;  %v1502_v47 = vsel %vm4433_vm2, %v8455_v44, 0.0  ;;  %v8456_v22 = vld [vmem:[#allocation25_spill] sm:$0xff]  ;;  %v2288_v61 = vsel %vm7955_vm15, %v4437_v33, 0.0  ;;  %2558 = vadd.xlane.f32.xlu1 %v8460_v14  ;;  %v8462_v44 = vld [vmem:[#allocation82_spill] sm:$0xff]  ;;  %vm1898_vm5 = vcmp.eq.f32.partialorder %v4378_v9, %v8453_v54  ;;  %v7026_v57 = vadd.f32 %v2351_v0, %v2350_v48 }
 0x41b   : > { %v1507_v10 = vsel %vm4410_vm12, %v8456_v22, 0.0  ;;  %vm2022_vm7 = vmand %vm8459_vm10, %vm8458_vm11  ;;  %v7013_v49 = vadd.f32 %v1502_v47, %v1501_v32  ;;  %v1508_v22 = vsel %vm4433_vm2, %v8462_v44, 0.0  ;;  %v8463_v24 = vld [vmem:[#allocation16_spill] sm:$0xff]  ;;  %v8464_v38 = vld [vmem:[#allocation69_spill] sm:$0xff]  ;;  %vm8467_vm10 = vcmp.ne.s32.totalorder %v8415_v35, %v8184_v60 }
 0x41c   : > { %v2352_v41 = vmul.f32 %v2288_v61, %v8463_v24  ;;  %vm2086_vm6 = vmand %vm2022_vm7, %vm4433_vm2  ;;  %v7028_v32 = vadd.f32 %v1508_v22, %v1507_v10  ;;  %v8466_v47 = vld [vmem:[#allocation79_spill] sm:$0xff]  ;;  %v8470_v44 = vld [vmem:[#allocation98_spill] sm:$0xff]  ;;  %v3518_v0 = vsel %vm5946_vm3, 1.0, %v8048_v30 }
 0x41d   : > { %8461 = vst [vmem:[#allocation30_spill] sm:$0xff] %v7013_v49  ;;  %v1505_v14 = vsel %vm4410_vm12, %v8466_v47, 0.0  ;;  %vm7036_vm11 = vmand %vm2086_vm6, %vm8467_vm10  ;;  %v8471_v49 = vld [vmem:[#allocation81_spill] sm:$0xff]  ;;  %v8473_v10 = vld [vmem:[#allocation80_spill] sm:$0xff]  ;;  %vm8478_vm6 = vcmp.gt.f32.partialorder %v6451_v34, 0.7  ;;  %vm8479_vm10 = vcmp.eq.f32.partialorder %v4372_v6, %v8429_v29 }
 0x41e   : > { %8465 = vst [vmem:[#allocation45_spill] sm:$0xff] %v7028_v32  ;;  %v1506_v62 = vsel %vm4433_vm2, %v8471_v49, 0.0  ;;  %vm8474_vm15 = vnez %v8473_v10  ;;  %v8475_v47 = vld [vmem:[#allocation38_spill] sm:$0xff]  ;;  %v8476_v35 = vld [vmem:[#allocation39_spill] sm:$0xff]  ;;  %v2289_v28 = vsel %vm7036_vm11, %v4439_v4, 0.0  ;;  %vm7062_vm7 = vmand %vm8479_vm10, %vm8478_vm6  ;;  %2430 = vadd.xlane.f32.xlu1 %v6654_v42 }
 0x41f   : > { %v3516_v22 = vsel %vm8474_vm15, 1.0, %v8048_v30  ;;  %v7052_v32 = vadd.f32 %v8476_v35, %v8475_v47  ;;  %v7066_v48 = vadd.f32 %v1506_v62, %v1505_v14  ;;  %v8482_v10 = vld [vmem:[#allocation86_spill] sm:$0xff]  ;;  %v8484_v47 = vld [vmem:[#allocation84_spill] sm:$0xff]  ;;  %v2353_v34 = vmul.f32 %v2289_v28, %v8486_v50  ;;  %vm7956_vm15 = vmand %vm7062_vm7, %vm4410_vm12  ;;  %v3997_v50 = vpop.eup %3996 }
 0x420   : > { %v7069_v52 = vadd.f32 %v3518_v0, %v8482_v10  ;;  %v7072_v35 = vadd.f32 %v3516_v22, %v8484_v47  ;;  %v7083_v14 = vadd.f32 %v2289_v28, %v2288_v61  ;;  %v8487_v62 = vld [vmem:[#allocation37_spill] sm:$0xff]  ;;  %v3522_v47 = vsel %vm6182_vm8, 1.0, %v8048_v30  ;;  %vm8490_vm10 = vmand %vm6684_vm0, %vm4410_vm12  ;;  %v8496_v10 = vld [vmem:[#allocation94_spill] sm:$0xff] }
 0x421   : > { %8477 = vst [vmem:[#allocation62_spill] sm:$0xff] %v7052_v32  ;;  %v8485_v32 = vld [vmem:[#allocation51_spill] sm:$0xff]  ;;  %v8488_v0 = vld [vmem:[#allocation33_spill] sm:$0xff]  ;;  %v7098_v42 = vsel %vm8490_vm10, 1.0, %v8048_v30  ;;  %v2290_v28 = vsel %vm7956_vm15, %v4437_v33, 0.0  ;;  %vm8492_vm8 = vcmp.eq.f32.partialorder %v4378_v9, %v8429_v29  ;;  %v7113_v61 = vadd.f32 %v3522_v47, %v8493_v36 }
 0x422   : > { %8483 = vst [vmem:[#allocation31_spill] sm:$0xff] %v7069_v52  ;;  %v7087_v22 = vadd.f32 %v8488_v0, %v8487_v62  ;;  %vm8491_vm6 = vcmp.gt.f32.partialorder %v6467_v26, 0.7  ;;  %v3520_v0 = vsel %vm6053_vm1, 1.0, %v8048_v30  ;;  %v2354_v52 = vmul.f32 %v2290_v28, %v8496_v10  ;;  %v8497_v26 = vld [vmem:[#allocation20_spill] sm:$0xff]  ;;  %1605 = vadd.xlane.f32.xlu1 %v6730_v53  ;;  %v8508_v53 = vld [vmem:[#allocation41_spill] sm:$0xff]  ;;  %2573 = vadd.xlane.f32.xlu0 %v7083_v14 }
 0x423   : > { %vm2024_vm3 = vmand %vm8492_vm8, %vm8491_vm6  ;;  %8494 = vst [vmem:[#allocation66_spill] sm:$0xff] %v7113_v61  ;;  %vm1900_vm10 = vcmp.eq.f32.partialorder %v4378_v9, %v8485_v32  ;;  %v7125_v29 = vadd.f32 %v2353_v34, %v2352_v41  ;;  %v7128_v47 = vadd.f32 %v3520_v0, %v8498_v37  ;;  %v1535_v36 = vsel %vm4410_vm12, %v6828_v19, 0.0  ;;  %v8506_v0 = vld [vmem:[#allocation17_spill] sm:$0xff]  ;;  %v8559_v62 = vld [vmem:[#allocation15_spill] sm:$0xff] }
 0x424   : > { %vm2088_vm0 = vmand %vm2024_vm3, %vm4433_vm2  ;;  %vm8499_vm1 = vcmp.ne.s32.totalorder %v8438_v58, %v8184_v60  ;;  %v1536_v10 = vsel %vm4433_vm2, %v6844_v25, 0.0  ;;  %v1537_v41 = vsel %vm4410_vm12, %v6866_v21, 0.0  ;;  %v1538_v34 = vsel %vm4433_vm2, %v6888_v51, 0.0 }
 0x425   : > { %vm7136_vm8 = vmand %vm2088_vm0, %vm8499_vm1  ;;  %v1539_v19 = vsel %vm4410_vm12, %v6921_v7, 0.0  ;;  %vm8502_vm3 = vcmp.gt.f32.partialorder %v6557_v11, 0.7  ;;  %vm8503_vm0 = vcmp.eq.f32.partialorder %v4372_v6, %v8453_v54  ;;  %v7165_v21 = vadd.f32 %v1536_v10, %v1535_v36  ;;  %v8509_v36 = vld [vmem:[#allocation40_spill] sm:$0xff] }
 0x426   : > { %v2291_v58 = vsel %vm7136_vm8, %v4439_v4, 0.0  ;;  %vm7160_vm1 = vmand %vm8503_vm0, %vm8502_vm3  ;;  %v7167_v51 = vadd.f32 %v1538_v34, %v1537_v41  ;;  %v1540_v7 = vsel %vm4433_vm2, %v3997_v50, 0.0  ;;  %v7183_v10 = vadd.f32 %v8509_v36, %v8508_v53  ;;  %v8513_v41 = vld [vmem:[#allocation43_spill] sm:$0xff]  ;;  %v8517_v53 = vld [vmem:[#allocation88_spill] sm:$0xff]  ;;  %2564 = vadd.xlane.f32.xlu1 %v6803_v13  ;;  %2445 = vadd.xlane.f32.xlu0 %v7125_v29 }
 0x427   : > { %v2355_v37 = vmul.f32 %v2291_v58, %v8506_v0  ;;  %vm7957_vm15 = vmand %vm7160_vm1, %vm4410_vm12  ;;  %v7177_v11 = vadd.f32 %v2291_v58, %v2290_v28  ;;  %v7179_v61 = vadd.f32 %v1540_v7, %v1539_v19  ;;  %vm8511_vm0 = vcmp.gt.f32.partialorder %v8454_v8, 0.7  ;;  %v7202_v28 = vpop.xlane.xlu0 %2489  ;;  %v8516_v7 = vld [vmem:[#allocation96_spill] sm:$0xff]  ;;  %v8561_v29 = vld [vmem:[#allocation19_spill] sm:$0xff] }
 0x428   : > { %vm8510_vm3 = vmand %vm6781_vm14, %vm4410_vm12  ;;  %v2292_v39 = vsel %vm7957_vm15, %v4437_v33, 0.0  ;;  %v7206_v34 = vadd.f32 %v8513_v41, %v8512_v12  ;;  %v3524_v58 = vsel %vm6284_vm4, 1.0, %v8048_v30  ;;  %v8523_v41 = vld [vmem:[#allocation95_spill] sm:$0xff]  ;;  %vm8543_vm15 = vnez %v8386_v40  ;;  %v8560_v13 = vld [vmem:[#allocation28_spill] sm:$0xff] }
 0x429   : > { %8507 = vst [vmem:[#allocation36_spill] sm:$0xff] %v7179_v61  ;;  %v3535_v50 = vsel %vm8510_vm3, 1.0, %v8048_v30  ;;  %vm2026_vm6 = vmand %vm1898_vm5, %vm8511_vm0  ;;  %v2356_v0 = vmul.f32 %v2292_v39, %v8516_v7  ;;  %v7214_v8 = vadd.f32 %v2355_v37, %v2354_v52  ;;  %v7217_v54 = vadd.f32 %v3524_v58, %v8517_v53  ;;  %v8524_v52 = vld [vmem:[#allocation52_spill] sm:$0xff]  ;;  %v8525_v37 = vld [vmem:[#allocation47_spill] sm:$0xff] }
 0x42a   : > { %8514 = vst [vmem:[#allocation90_spill] sm:$0xff] %v7206_v34  ;;  %vm2090_vm14 = vmand %vm2026_vm6, %vm4433_vm2  ;;  %v3526_v61 = vsel %vm6377_vm13, 1.0, %v8048_v30  ;;  %vm8520_vm5 = vcmp.ne.s32.totalorder %v8464_v38, %v8184_v60  ;;  %v7235_v58 = vadd.f32 %v8525_v37, %v8524_v52  ;;  %v8526_v7 = vld [vmem:[#allocation58_spill] sm:$0xff]  ;;  %v8527_v53 = vld [vmem:[#allocation56_spill] sm:$0xff]  ;;  %vm8530_vm13 = vcmp.gt.f32.partialorder %v8470_v44, 0.7  ;;  %2436 = vadd.xlane.f32.xlu1 %v6837_v23 }
 0x42b   : > { %8518 = vst [vmem:[#allocation68_spill] sm:$0xff] %v7217_v54  ;;  %vm7225_vm3 = vmand %vm2090_vm14, %vm8520_vm5  ;;  %v7231_v19 = vadd.f32 %v3526_v61, %v8523_v41  ;;  %v7239_v36 = vadd.f32 %v8527_v53, %v8526_v7  ;;  %v8528_v34 = vld [vmem:[#allocation92_spill] sm:$0xff]  ;;  %vm8531_vm6 = vcmp.eq.f32.partialorder %v4372_v6, %v8485_v32  ;;  %v8536_v52 = vld [vmem:[#allocation59_spill] sm:$0xff]  ;;  %v7272_v6 = vpop.xlane.xlu0 %2361  ;;  %v3542_v49 = vsel %vm7136_vm8, 1.0, %v8048_v30 }
 0x42c   : > { %vm8529_vm4 = vnez %v8528_v34  ;;  %v2293_v54 = vsel %vm7225_vm3, %v4439_v4, 0.0  ;;  %vm7252_vm0 = vmand %vm8531_vm6, %vm8530_vm13  ;;  %v8534_v34 = vld [vmem:[#allocation34_spill] sm:$0xff]  ;;  %v8537_v37 = vld [vmem:[#allocation60_spill] sm:$0xff]  ;;  %vm8542_vm6 = vcmp.gt.f32.partialorder %v6610_v59, 0.7  ;;  %v3544_v14 = vsel %vm7225_vm3, 1.0, %v8048_v30 }
 0x42d   : > { %v3528_v38 = vsel %vm8529_vm4, 1.0, %v8048_v30  ;;  %vm8535_vm14 = vnez %v8534_v34  ;;  %v7265_v7 = vadd.f32 %v8537_v37, %v8536_v52  ;;  %v2357_v44 = vmul.f32 %v2293_v54, %v6592_v43  ;;  %vm2091_vm5 = vmand %vm7252_vm0, %vm4410_vm12  ;;  %v8538_v53 = vld [vmem:[#allocation63_spill] sm:$0xff]  ;;  %v8550_v52 = vld [vmem:[#allocation77_spill] sm:$0xff] }
 0x42e   : > { %v7258_v61 = vadd.f32 %v3528_v38, %v6644_v17  ;;  %v3530_v41 = vsel %vm8535_vm14, 1.0, %v8048_v30  ;;  %v2578_v31 = vadd.f32 %v2293_v54, %v2292_v39  ;;  %v8539_v38 = vld [vmem:[#allocation64_spill] sm:$0xff]  ;;  %vm8540_vm4 = vnez %v8426_v15  ;;  %vm2028_vm14 = vmand %vm1900_vm10, %vm8542_vm6  ;;  %1611 = vadd.xlane.f32.xlu1 %v6786_v16 }
 0x42f   : > { %v7275_v17 = vadd.f32 %v3530_v41, %v6662_v18  ;;  %v7279_v34 = vadd.f32 %v8539_v38, %v8538_v53  ;;  %vm8541_vm13 = vmand %vm8540_vm4, %vm4410_vm12  ;;  %v2294_v39 = vsel %vm2091_vm5, %v4437_v33, 0.0  ;;  %v7298_v18 = vpop.xlane.xlu1 %2492  ;;  %v3532_v15 = vsel %vm8543_vm15, 1.0, %v8048_v30  ;;  %v8549_v41 = vld [vmem:[#allocation9_spill] sm:$0xff]  ;;  %v8553_v38 = vld [vmem:[#allocation10_spill] sm:$0xff] }
 0x430   : > { %v3537_v43 = vsel %vm8541_vm13, 1.0, %v8048_v30  ;;  %vm8544_vm4 = vnez %v8400_v56  ;;  %vm8545_vm13 = vmand %vm6966_vm9, %vm4410_vm12  ;;  %v2358_v9 = vmul.f32 %v2294_v39, %v6608_v63  ;;  %v2450_v59 = vadd.f32 %v2357_v44, %v2356_v0  ;;  %v8548_v63 = vld [vmem:[#allocation73_spill] sm:$0xff]  ;;  %2579 = vadd.xlane.f32.xlu0 %v2578_v31 }
 0x431   : > { %v3534_v54 = vsel %vm8544_vm4, 1.0, %v8048_v30  ;;  %v3539_v33 = vsel %vm8545_vm13, 1.0, %v8048_v30  ;;  %vm2092_vm10 = vmand %vm2028_vm14, %vm4433_vm2  ;;  %v7317_v40 = vadd.f32 %v3532_v15, %v6999_v45  ;;  %vm8546_vm15 = vcmp.ne.s32.totalorder %v8497_v26, %v8184_v60 }
 0x432   : > { %vm2223_vm6 = vmand %vm2092_vm10, %vm8546_vm15  ;;  %v7324_v56 = vadd.f32 %v3534_v54, %v7098_v42  ;;  %v7328_v32 = vadd.f32 %v8548_v63, %v8547_v55  ;;  %v7332_v23 = vadd.f32 %v8550_v52, %v8549_v41  ;;  %vm8551_vm9 = vnez %v8420_v5  ;;  %v8554_v5 = vld [vmem:[#allocation23_spill] sm:$0xff]  ;;  %2570 = vadd.xlane.f32.xlu1 %v6985_v20 }
 0x433   : > { %v3536_v45 = vsel %vm8551_vm9, 1.0, %v8048_v30  ;;  %v2295_v60 = vsel %vm2223_vm6, %v4439_v4, 0.0  ;;  %v3546_v26 = vsel %vm2223_vm6, 1.0, %v8048_v30  ;;  %vm8552_vm14 = vnez %v8442_v46  ;;  %v7345_v37 = vpop.xlane.xlu1 %2364  ;;  %vm8555_vm4 = vmand %vm7062_vm7, %vm4410_vm12  ;;  %v7360_v46 = vpop.xlane.xlu0 %2495 }
 0x434   : > { %v7339_v3 = vadd.f32 %v3536_v45, %v3535_v50  ;;  %v3538_v42 = vsel %vm8552_vm14, 1.0, %v8048_v30  ;;  %v2359_v0 = vmul.f32 %v2295_v60, %v6728_v1  ;;  %v2581_v44 = vadd.f32 %v2295_v60, %v2294_v39  ;;  %v8556_v1 = vld [vmem:[#allocation26_spill] sm:$0xff]  ;;  %v8557_v50 = vld [vmem:[#allocation11_spill] sm:$0xff]  ;;  %2451 = vadd.xlane.f32.xlu0 %v2450_v59  ;;  %v8563_v59 = vld [vmem:[#allocation72_spill] sm:$0xff] }
 0x435   : > { %v7347_v53 = vadd.f32 %v3538_v42, %v3537_v43  ;;  %v7351_v15 = vadd.f32 %v8554_v5, %v8553_v38  ;;  %v3541_v4 = vsel %vm8555_vm4, 1.0, %v8048_v30  ;;  %v7364_v39 = vadd.f32 %v8557_v50, %v8556_v1  ;;  %v8562_v42 = vld [vmem:[#allocation35_spill] sm:$0xff]  ;;  %v8565_v50 = vld [vmem:[#allocation44_spill] sm:$0xff] }
 0x436   : > { %v3540_v43 = vsel %vm7036_vm11, 1.0, %v8048_v30  ;;  %v3545_v16 = vsel %vm2091_vm5, 1.0, %v8048_v30  ;;  %v2453_v54 = vadd.f32 %v2359_v0, %v2358_v9  ;;  %v7381_v63 = vadd.f32 %v3542_v49, %v3541_v4  ;;  %vm8558_vm11 = vmand %vm7160_vm1, %vm4410_vm12  ;;  %2442 = vadd.xlane.f32.xlu1 %v7026_v57  ;;  %v8566_v49 = vld [vmem:[#allocation55_spill] sm:$0xff] }
 0x437   : > { %v7379_v55 = vadd.f32 %v3540_v43, %v3539_v33  ;;  %v3543_v24 = vsel %vm8558_vm11, 1.0, %v8048_v30  ;;  %v7391_v41 = vadd.f32 %v8560_v13, %v8559_v62  ;;  %v7396_v9 = vadd.f32 %v3546_v26, %v3545_v16  ;;  %v7401_v52 = vpop.xlane.xlu0 %2367  ;;  %v7404_v27 = vpop.xlane.xlu1 %2498  ;;  %v8568_v62 = vld [vmem:[#allocation24_spill] sm:$0xff] }
 0x438   : > { %v7398_v33 = vadd.f32 %v3544_v14, %v3543_v24  ;;  %2531 = vadd.xlane.f32.xlu0 %v8561_v29 }
 0x43a   : > { %2576 = vadd.xlane.f32.xlu1 %v7177_v11 }
 0x43b   : > { %v1543_v25 = vpop.xlane.xlu0 %1542  ;;  %v7407_v45 = vpop.xlane.xlu1 %2370 }
 0x43c   : > { %v2872_v12 = vmax.f32 %v1543_v25, 1e-30  ;;  %1614 = vadd.xlane.f32.xlu0 %v8562_v42  ;;  %v8569_v25 = vld [vmem:[#allocation29_spill] sm:$0xff]  ;;  %v8570_v42 = vld [vmem:[#allocation8_spill] sm:$0xff] }
 0x43e   : > { %3998 = vlog2.f32 %v2872_v12  ;;  %2448 = vadd.xlane.f32.xlu1 %v7214_v8 }
 0x43f   : > { %v7410_v60 = vpop.xlane.xlu1 %1545  ;;  %v7413_v20 = vpop.xlane.xlu0 %2501 }
 0x440   : > { %1566 = vadd.xlane.f32.xlu0 %v8563_v59  ;;  %v8572_v59 = vld [vmem:[#allocation32_spill] sm:$0xff] }
 0x442   : > { %2582 = vadd.xlane.f32.xlu1 %v2581_v44  ;;  %v8564_v44 = vld [vmem:[#allocation12_spill] sm:$0xff] }
 0x443   : > { %v7416_v26 = vpop.xlane.xlu1 %2504  ;;  %v7418_v57 = vpop.xlane.xlu0 %2373 }
 0x444   : > { %1620 = vadd.xlane.f32.xlu0 %v8565_v50  ;;  %v8573_v50 = vld [vmem:[#allocation61_spill] sm:$0xff] }
 0x446   : > { %2454 = vadd.xlane.f32.xlu1 %v2453_v54  ;;  %v8567_v54 = vld [vmem:[#allocation76_spill] sm:$0xff] }
 0x447   : > { %v7421_v38 = vpop.xlane.xlu1 %2376  ;;  %v1549_v8 = vpop.xlane.xlu0 %1548 }
 0x448   : > { %v3999_v31 = vpop.eup %3998  ;;  %v2874_v5 = vmax.f32 %v1549_v8, 1e-30  ;;  %1572 = vadd.xlane.f32.xlu0 %v8567_v54 }
 0x449   : > { %v2905_v0 = vmul.f32 0.6931472, %v3999_v31 }
 0x44a   : > { %4000 = vlog2.f32 %v2874_v5  ;;  %2534 = vadd.xlane.f32.xlu1 %v8564_v44 }
 0x44b   : > { %v7424_v11 = vmul.f32 %v2905_v0, %v7202_v28  ;;  %v7427_v4 = vpop.xlane.xlu1 %1551  ;;  %v7430_v1 = vpop.xlane.xlu0 %2507  ;;  %v8571_v0 = vld [vmem:[#allocation30_spill] sm:$0xff] }
 0x44c   : > { %1626 = vadd.xlane.f32.xlu0 %v8569_v25 }
 0x44e   : > { %1617 = vadd.xlane.f32.xlu1 %v8566_v49 }
 0x44f   : > { %v7433_v43 = vpop.xlane.xlu1 %2510  ;;  %v7436_v16 = vpop.xlane.xlu0 %2379 }
 0x450   : > { %1578 = vadd.xlane.f32.xlu0 %v8571_v0  ;;  %v8576_v0 = vld [vmem:[#allocation62_spill] sm:$0xff] }
 0x452   : > { %1569 = vadd.xlane.f32.xlu1 %v8568_v62 }
 0x453   : > { %v7439_v24 = vpop.xlane.xlu1 %2382  ;;  %v1555_v13 = vpop.xlane.xlu0 %1554 }
 0x454   : > { %v4001_v14 = vpop.eup %4000  ;;  %v2876_v12 = vmax.f32 %v1555_v13, 1e-30  ;;  %1584 = vadd.xlane.f32.xlu0 %v7066_v48 }
 0x455   : > { %v2909_v29 = vmul.f32 0.6931472, %v4001_v14  ;;  %v8574_v14 = vld [vmem:[#allocation45_spill] sm:$0xff] }
 0x456   : > { %4002 = vlog2.f32 %v2876_v12  ;;  %1623 = vadd.xlane.f32.xlu1 %v8570_v42 }
 0x457   : > { %v7444_v31 = vmul.f32 %v2909_v29, %v7360_v46  ;;  %v7448_v8 = vpop.xlane.xlu1 %1557  ;;  %v7451_v5 = vpop.xlane.xlu0 %2513  ;;  %v8575_v29 = vld [vmem:[#allocation31_spill] sm:$0xff] }
 0x458   : > { %2793 = vadd.xlane.f32.xlu0 %v7072_v35 }
 0x45a   : > { %1575 = vadd.xlane.f32.xlu1 %v8572_v59 }
 0x45b   : > { %v7454_v44 = vpop.xlane.xlu1 %2516  ;;  %v7457_v49 = vpop.xlane.xlu0 %2385 }
 0x45c   : > { %2745 = vadd.xlane.f32.xlu0 %v7087_v22 }
 0x45e   : > { %1581 = vadd.xlane.f32.xlu1 %v8573_v50  ;;  %v8577_v50 = vld [vmem:[#allocation66_spill] sm:$0xff] }
 0x45f   : > { %v1561_v25 = vpop.xlane.xlu0 %1560  ;;  %v7464_v12 = vpop.xlane.xlu1 %2388 }
 0x460   : > { %v4003_v54 = vpop.eup %4002  ;;  %v2878_v48 = vmax.f32 %v1561_v25, 1e-30  ;;  %2799 = vadd.xlane.f32.xlu0 %v7128_v47 }
 0x461   : > { %v2913_v62 = vmul.f32 0.6931472, %v4003_v54 }
 0x462   : > { %1587 = vadd.xlane.f32.xlu1 %v8574_v14  ;;  %4004 = vlog2.f32 %v2878_v48 }
 0x463   : > { %v7461_v13 = vmul.f32 %v2913_v62, %v7413_v20  ;;  %v7469_v42 = vpop.xlane.xlu0 %2519  ;;  %v7471_v35 = vpop.xlane.xlu1 %1563 }
 0x464   : > { %1632 = vadd.xlane.f32.xlu0 %v7167_v51  ;;  %v8578_v51 = vld [vmem:[#allocation68_spill] sm:$0xff] }
 0x466   : > { %2796 = vadd.xlane.f32.xlu1 %v8575_v29 }
 0x467   : > { %v7475_v59 = vpop.xlane.xlu0 %2391  ;;  %v7478_v22 = vpop.xlane.xlu1 %2522 }
 0x468   : > { %2751 = vadd.xlane.f32.xlu0 %v7183_v10 }
 0x46a   : > { %2748 = vadd.xlane.f32.xlu1 %v8576_v0  ;;  %v8579_v0 = vld [vmem:[#allocation36_spill] sm:$0xff] }
 0x46b   : > { %v7481_v14 = vpop.xlane.xlu0 %2525  ;;  %v7487_v25 = vpop.xlane.xlu1 %2394 }
 0x46c   : > { %v4005_v54 = vpop.eup %4004  ;;  %2805 = vadd.xlane.f32.xlu0 %v8578_v51  ;;  %v3693_v51 = vpack.c.bf16 %v7345_v37, %v7272_v6  ;;  %v8581_v37 = vld [vmem:[#allocation54_spill] sm:$0xff] }
 0x46d   : > { %v2917_v62 = vmul.f32 0.6931472, %v4005_v54  ;;  %vm8582_vm12 = vnez %v8581_v37 }
 0x46e   : > { %2802 = vadd.xlane.f32.xlu1 %v8577_v50  ;;  %v8580_v50 = vld [vmem:[#allocation90_spill] sm:$0xff]  ;;  %vm8583_vm7 = vmand %vm8582_vm12, %vm4433_vm2 }
 0x46f   : > { %v7484_v47 = vmul.f32 %v2917_v62, %v7430_v1  ;;  %v7492_v29 = vpop.xlane.xlu0 %2397  ;;  %v7499_v54 = vpop.xlane.xlu1 %2528 }
 0x470   : > { %2757 = vadd.xlane.f32.xlu0 %v7235_v58 }
 0x472   : > { %1629 = vadd.xlane.f32.xlu1 %v7165_v21 }
 0x473   : > { %v7496_v10 = vpop.xlane.xlu0 %2403  ;;  %v7505_v62 = vpop.xlane.xlu1 %2400 }
 0x474   : > { %2811 = vadd.xlane.f32.xlu0 %v7258_v61 }
 0x476   : > { %1635 = vadd.xlane.f32.xlu1 %v8579_v0 }
 0x477   : > { %v7502_v21 = vpop.xlane.xlu0 %2537  ;;  %v7511_v0 = vpop.xlane.xlu1 %2406 }
 0x478   : > { %2763 = vadd.xlane.f32.xlu0 %v7265_v7 }
 0x47a   : > { %2754 = vadd.xlane.f32.xlu1 %v8580_v50 }
 0x47b   : > { %v2413_v58 = vpop.xlane.xlu0 %2412 }
 0x47c   : > { %2817 = vadd.xlane.f32.xlu0 %v7317_v40  ;;  %v8586_v40 = vld [vmem:[#allocation67_spill] sm:$0xff] }
 0x47d   : > { %vm8587_vm1 = vnez %v8586_v40 }
 0x47e   : > { %2808 = vadd.xlane.f32.xlu1 %v7231_v19  ;;  %v2410_v19 = vpop.xlane.xlu1 %2409  ;;  %vm8588_vm3 = vmand %vm8587_vm1, %vm4433_vm2 }
 0x47f   : > { %v7516_v50 = vpop.xlane.xlu0 %2543  ;;  %v3691_v7 = vpack.c.bf16 %v2413_v58, %v2410_v19  ;;  %v3697_v19 = vpack.c.bf16 %v7407_v45, %v7401_v52 }
 0x480   : > { %2769 = vadd.xlane.f32.xlu0 %v7328_v32 }
 0x481   : > { %3692 = vmatprep.subr.bf16.mxu0 %v3691_v7 }
 0x482   : > { %2760 = vadd.xlane.f32.xlu1 %v7239_v36  ;;  %v7523_v36 = vpop.xlane.xlu1 %2540  ;;  %3694 = vmatpush3.bf16.msra.mxu0 %v3693_v51 }
 0x483   : > { %v2416_v48 = vpop.xlane.xlu0 %2415 }
 0x484   : > { %2823 = vadd.xlane.f32.xlu0 %v7339_v3  ;;  %v3508_v3 = vsel %vm8583_vm7, 1.0, %v8048_v30 }
 0x486   : > { %2814 = vadd.xlane.f32.xlu1 %v7275_v17  ;;  %v7529_v32 = vpop.xlane.xlu1 %2546 }
 0x487   : > { %v1591_v17 = vpop.xlane.xlu0 %1590 }
 0x488   : > { %v2888_v61 = vmax.f32 %v1591_v17, 1e-30  ;;  %2775 = vadd.xlane.f32.xlu0 %v7351_v15 }
 0x48a   : > { %2766 = vadd.xlane.f32.xlu1 %v7279_v34  ;;  %4006 = vlog2.f32 %v2888_v61  ;;  %v2419_v58 = vpop.xlane.xlu1 %2418 }
 0x48b   : > { %v7534_v34 = vpop.xlane.xlu0 %2549  ;;  %v3695_v15 = vpack.c.bf16 %v2419_v58, %v2416_v48 }
 0x48c   : > { %2829 = vadd.xlane.f32.xlu0 %v7379_v55  ;;  %v3512_v55 = vsel %vm8588_vm3, 1.0, %v8048_v30 }
 0x48d   : > { %3696 = vmatprep.subr.bf16.mxu0 %v3695_v15 }
 0x48e   : > { %2820 = vadd.xlane.f32.xlu1 %v7324_v56  ;;  %v8584_v56 = vld [vmem:[#allocation53_spill] sm:$0xff]  ;;  %3698 = vmatpush3.bf16.msra.mxu0 %v3697_v19  ;;  %v1594_v17 = vpop.xlane.xlu1 %1593  ;;  %v3701_v19 = vpack.c.bf16 %v7421_v38, %v7418_v57 }
 0x48f   : > { %vm8585_vm8 = vnez %v8584_v56  ;;  %v2422_v61 = vpop.xlane.xlu0 %2421 }
 0x490   : > { %v3507_v51 = vsel %vm8585_vm8, 1.0, %v8048_v30 }
 0x491   : > { %v2780_v7 = vadd.f32 %v3508_v3, %v3507_v51 }
 0x492   : > { %2772 = vadd.xlane.f32.xlu1 %v7332_v23  ;;  %v2889_v23 = vmax.f32 %v1594_v17, 1e-30  ;;  %v7560_v45 = vpop.xlane.xlu1 %2552 }
 0x493   : > { %2781 = vadd.xlane.f32.xlu0 %v2780_v7  ;;  %v1597_v37 = vpop.xlane.xlu0 %1596  ;;  %v3731_v40 = vpack.c.bf16 %v7560_v45, %v7534_v34 }
 0x494   : > { %v4007_v6 = vpop.eup %4006  ;;  %v2890_v56 = vmax.f32 %v1597_v37, 1e-30  ;;  %4008 = vlog2.f32 %v2889_v23 }
 0x495   : > { %v2937_v48 = vmul.f32 0.6931472, %v4007_v6 }
 0x496   : > { %2826 = vadd.xlane.f32.xlu1 %v7347_v53  ;;  %v8589_v53 = vld [vmem:[#allocation65_spill] sm:$0xff]  ;;  %4010 = vlog2.f32 %v2890_v56  ;;  %v8591_v56 = vld [vmem:[#allocation74_spill] sm:$0xff] }
 0x497   : > { %vm8590_vm0 = vnez %v8589_v53  ;;  %2835 = vadd.xlane.f32.xlu0 %v7398_v33  ;;  %v7564_v3 = vmul.f32 %v2937_v48, %v7502_v21  ;;  %v7568_v51 = vpop.xlane.xlu0 %2555  ;;  %vm8592_vm5 = vnez %v8591_v56 }
 0x498   : > { %v3511_v52 = vsel %vm8590_vm0, 1.0, %v8048_v30  ;;  %vm8593_vm13 = vmand %vm8592_vm5, %vm4433_vm2  ;;  %vm3317_vm2 = vcmask 0  }
 0x499   : > { %v2786_v6 = vadd.f32 %v3512_v55, %v3511_v52  ;;  %v8594_v55 = vld [vmem:[#allocation50_spill] sm:$0xff] }
 0x49a   : > { %2778 = vadd.xlane.f32.xlu1 %v7364_v39  ;;  %vm8595_vm10 = vnez %v8594_v55 }
 0x49b   : > { %v2425_v39 = vpop.xlane.xlu1 %2424  ;;  %2787 = vadd.xlane.f32.xlu0 %v2786_v6  ;;  %v2428_v15 = vpop.xlane.xlu0 %2427  ;;  %v3513_v57 = vsel %vm8595_vm10, 1.0, %v8048_v30 }
 0x49c   : > { %v3699_v58 = vpack.c.bf16 %v2425_v39, %v2422_v61 }
 0x49e   : > { %2832 = vadd.xlane.f32.xlu1 %v7381_v63  ;;  %3700 = vmatprep.subr.bf16.mxu0 %v3699_v58  ;;  %v4009_v7 = vpop.eup %4008  ;;  %v3514_v63 = vsel %vm8593_vm13, 1.0, %v8048_v30 }
 0x49f   : > { %3702 = vmatpush3.bf16.msra.mxu0 %v3701_v19  ;;  %v1600_v33 = vpop.xlane.xlu1 %1599  ;;  %v1603_v23 = vpop.xlane.xlu0 %1602  ;;  %v2939_v61 = vmul.f32 0.6931472, %v4009_v7  ;;  %v2789_v2 = vadd.f32 %v3514_v63, %v3513_v57 }
 0x4a0   : > { %v2891_v17 = vmax.f32 %v1600_v33, 1e-30  ;;  %v4011_v37 = vpop.eup %4010  ;;  %v2892_v30 = vmax.f32 %v1603_v23, 1e-30 }
 0x4a1   : > { %v2941_v38 = vmul.f32 0.6931472, %v4011_v37 }
 0x4a2   : > { %2784 = vadd.xlane.f32.xlu1 %v7391_v41  ;;  %4012 = vlog2.f32 %v2891_v17  ;;  %v7585_v41 = vmul.f32 %v2939_v61, %v7523_v36 }
 0x4a3   : > { %v7590_v53 = vmul.f32 %v2941_v38, %v7516_v50  ;;  %v7592_v52 = vpop.xlane.xlu0 %2561  ;;  %4014 = vlog2.f32 %v2892_v30 }
 0x4a6   : > { %2838 = vadd.xlane.f32.xlu1 %v7396_v9  ;;  %v3705_v9 = vpack.c.bf16 %v7439_v24, %v7436_v16 }
 0x4a7   : > { %v7587_v48 = vpop.xlane.xlu1 %2558  ;;  %v2434_v19 = vpop.xlane.xlu0 %2433 }
 0x4aa   : > { %2790 = vadd.xlane.f32.xlu1 %v2789_v2  ;;  %v3709_v2 = vpack.c.bf16 %v7464_v12, %v7457_v49 }
 0x4ab   : > { %v2431_v39 = vpop.xlane.xlu1 %2430  ;;  %v1609_v37 = vpop.xlane.xlu0 %1608 }
 0x4ac   : > { %v3703_v58 = vpack.c.bf16 %v2431_v39, %v2428_v15  ;;  %v4013_v7 = vpop.eup %4012  ;;  %v2894_v16 = vmax.f32 %v1609_v37, 1e-30 }
 0x4ad   : > { %v2943_v56 = vmul.f32 0.6931472, %v4013_v7  ;;  %v4015_v55 = vpop.eup %4014 }
 0x4ae   : > { %3704 = vmatprep.subr.bf16.mxu0 %v3703_v58  ;;  %v2945_v30 = vmul.f32 0.6931472, %v4015_v55 }
 0x4af   : > { %3706 = vmatpush3.bf16.msra.mxu0 %v3705_v9  ;;  %v1606_v33 = vpop.xlane.xlu1 %1605  ;;  %v7599_v63 = vmul.f32 %v2943_v56, %v7529_v32  ;;  %v7603_v23 = vpop.xlane.xlu0 %2567 }
 0x4b0   : > { %v2893_v17 = vmax.f32 %v1606_v33, 1e-30 }
 0x4b2   : > { %4016 = vlog2.f32 %v2893_v17  ;;  %v7612_v17 = vmul.f32 %v2945_v30, %v7534_v34  ;;  %v3737_v34 = vpack.c.bf16 %v7433_v43, %v7430_v1 }
 0x4b3   : > { %v7601_v61 = vpop.xlane.xlu1 %2564  ;;  %v2440_v38 = vpop.xlane.xlu0 %2439  ;;  %4018 = vlog2.f32 %v2894_v16 }
 0x4b7   : > { %v2437_v24 = vpop.xlane.xlu1 %2436  ;;  %v7609_v33 = vpop.xlane.xlu0 %2573 }
 0x4b8   : > { %v3707_v57 = vpack.c.bf16 %v2437_v24, %v2434_v19 }
 0x4ba   : > { %3708 = vmatprep.subr.bf16.mxu0 %v3707_v57 }
 0x4bb   : > { %3710 = vmatpush3.bf16.msra.mxu0 %v3709_v2  ;;  %v1612_v39 = vpop.xlane.xlu1 %1611  ;;  %v2446_v49 = vpop.xlane.xlu0 %2445  ;;  %v8596_v2 = vpack.c.bf16 %v7487_v25, %v7475_v59  ;;  %v8597_v59 = vpack.c.bf16 %v7505_v62, %v7492_v29  ;;  %v8601_v29 = vpack.c.bf16 %v7523_v36, %v7502_v21  ;;  %v3729_v21 = vpack.c.bf16 %v7404_v27, %v7360_v46 }
 0x4bc   : > { %v4017_v58 = vpop.eup %4016  ;;  %v2895_v9 = vmax.f32 %v1612_v39, 1e-30  ;;  %v2875_v46 = vmax.f32 %v7427_v4, 1e-30 }
 0x4bd   : > { %v2947_v7 = vmul.f32 0.6931472, %v4017_v58  ;;  %v4019_v16 = vpop.eup %4018 }
 0x4be   : > { %4020 = vlog2.f32 %v2895_v9  ;;  %v2949_v57 = vmul.f32 0.6931472, %v4019_v16  ;;  %v8600_v16 = vld [vmem:[#allocation6_spill] sm:$0xff] }
 0x4bf   : > { %v7615_v19 = vmul.f32 %v2947_v7, %v7560_v45  ;;  %v7617_v37 = vpop.xlane.xlu1 %2570  ;;  %v7621_v55 = vpop.xlane.xlu0 %2579 }
 0x4c0   : > { %v7629_v7 = vmul.f32 %v2949_v57, %v7568_v51  ;;  %v3743_v1 = vpack.c.bf16 %v7617_v37, %v7603_v23 }
 0x4c3   : > { %v2443_v56 = vpop.xlane.xlu1 %2442  ;;  %v2452_v58 = vpop.xlane.xlu0 %2451 }
 0x4c4   : > { %v3711_v24 = vpack.c.bf16 %v2443_v56, %v2440_v38 }
 0x4c6   : > { %3712 = vmatprep.subr.bf16.mxu0 %v3711_v24 }
 0x4c7   : > { %3714 = vmatpush3.bf16.msra.mxu0 %v8596_v2  ;;  %v7626_v30 = vpop.xlane.xlu1 %2576  ;;  %v7634_v15 = vpop.xlane.xlu0 %2531 }
 0x4c8   : > { %v4021_v39 = vpop.eup %4020 }
 0x4c9   : > { %v2951_v9 = vmul.f32 0.6931472, %v4021_v39 }
 0x4cb   : > { %v7632_v12 = vmul.f32 %v2951_v9, %v7587_v48  ;;  %v2449_v38 = vpop.xlane.xlu1 %2448  ;;  %v1615_v24 = vpop.xlane.xlu0 %1614 }
 0x4cc   : > { %v3715_v56 = vpack.c.bf16 %v2449_v38, %v2446_v49  ;;  %v2896_v9 = vmax.f32 %v1615_v24, 1e-30  ;;  %v8598_v49 = vpack.c.bf16 %v7511_v0, %v7496_v10  ;;  %v8602_v10 = vld [vmem:[#allocation7_spill] sm:$0xff] }
 0x4ce   : > { %3716 = vmatprep.subr.bf16.mxu0 %v3715_v56  ;;  %v8599_v56 = vld [vmem:[#allocation13_spill] sm:$0xff]  ;;  %4022 = vlog2.f32 %v2896_v9 }
 0x4cf   : > { %3718 = vmatpush3.bf16.msra.mxu0 %v8597_v59  ;;  %v7641_v25 = vpop.xlane.xlu1 %2582  ;;  %v7643_v39 = vpop.xlane.xlu0 %1566  ;;  %v7652_v6 = vrot.slane %v8600_v16, %v8599_v56  ;;  %v8603_v16 = vpack.c.bf16 %v7529_v32, %v7516_v50  ;;  %v3733_v50 = vpack.c.bf16 %v7416_v26, %v7413_v20  ;;  %v3735_v32 = vpack.c.bf16 %v7587_v48, %v7568_v51 }
 0x4d0   : > { %v3739_v20 = vpack.c.bf16 %v7601_v61, %v7592_v52  ;;  %v2877_v51 = vmax.f32 %v7448_v8, 1e-30 }
 0x4d3   : > { %v2455_v57 = vpop.xlane.xlu1 %2454  ;;  %v1621_v62 = vpop.xlane.xlu0 %1620 }
 0x4d4   : > { %v3719_v2 = vpack.c.bf16 %v2455_v57, %v2452_v58  ;;  %v3725_v58 = vpack.c.bf16 %v7298_v18, %v7202_v28  ;;  %v2898_v36 = vmax.f32 %v1621_v62, 1e-30  ;;  %v2873_v57 = vmax.f32 %v7410_v60, 1e-30 }
 0x4d5   : > { %v3741_v62 = vpack.c.bf16 %v7454_v44, %v7451_v5 }
 0x4d6   : > { %3720 = vmatprep.subr.bf16.mxu0 %v3719_v2 }
 0x4d7   : > { %3722 = vmatpush3.bf16.msra.mxu0 %v8598_v49  ;;  %v7648_v38 = vpop.xlane.xlu1 %2534  ;;  %v7664_v24 = vpop.xlane.xlu0 %1572 }
 0x4d8   : > { %3724 = vmatprep.subr.bf16.mxu0 %v8601_v29  ;;  %v4023_v49 = vpop.eup %4022 }
 0x4d9   : > { %v2953_v45 = vmul.f32 0.6931472, %v4023_v49 }
 0x4da   : > { %3045 = vmatmul.mubr.f32.vlgmr.msra.gmra.mrb[24].mxu0 %v7652_v6 }
 0x4db   : > { %3726 = vmatpush3.bf16.msra.mxu0 %v3725_v58  ;;  %3115 = vmatprep.mubr.f32.mxu0 %v8602_v10  ;;  %v1618_v0 = vpop.xlane.xlu1 %1617  ;;  %v7672_v2 = vpop.xlane.xlu0 %1626 }
 0x4dc   : > { %v2897_v59 = vmax.f32 %v1618_v0, 1e-30  ;;  %3728 = vmatprep.subr.bf16.mxu0 %v8603_v16  ;;  %v7693_v0 = vmul.f32 %v2953_v45, %v7592_v52 }
 0x4de   : > { %4024 = vlog2.f32 %v2897_v59 }
 0x4df   : > { %3730 = vmatpush3.bf16.msra.mxu0 %v3729_v21  ;;  %v1570_v28 = vpop.xlane.xlu1 %1569  ;;  %4026 = vlog2.f32 %v2898_v36  ;;  %v7679_v29 = vpop.xlane.xlu0 %1578  ;;  %v2879_v21 = vmax.f32 %v7471_v35, 1e-30 }
 0x4e0   : > { %3732 = vmatprep.subr.bf16.mxu0 %v3731_v40  ;;  %4028 = vlog2.f32 %v2873_v57  ;;  %v3745_v57 = vpack.c.bf16 %v7478_v22, %v7469_v42  ;;  %v2881_v35 = vmax.f32 %v1570_v28, 1e-30 }
 0x4e3   : > { %3734 = vmatpush3.bf16.msra.mxu0 %v3733_v50  ;;  %v1624_v9 = vpop.xlane.xlu1 %1623  ;;  %v7686_v48 = vpop.xlane.xlu0 %1584 }
 0x4e4   : > { %v2899_v60 = vmax.f32 %v1624_v9, 1e-30  ;;  %3736 = vmatprep.subr.bf16.mxu0 %v3735_v32 }
 0x4e6   : > { %4030 = vlog2.f32 %v2899_v60 }
 0x4e7   : > { %4032 = vlog2.f32 %v2875_v46  ;;  %3738 = vmatpush3.bf16.msra.mxu0 %v3737_v34  ;;  %v1576_v40 = vpop.xlane.xlu1 %1575  ;;  %v7701_v36 = vpop.xlane.xlu0 %2793 }
 0x4e8   : > { %v4025_v4 = vpop.eup %4024  ;;  %3740 = vmatprep.subr.bf16.mxu0 %v3739_v20  ;;  %4034 = vlog2.f32 %v2877_v51  ;;  %v3749_v20 = vpack.c.bf16 %v7499_v54, %v7481_v14  ;;  %v2880_v51 = vmax.f32 %v7643_v39, 1e-30  ;;  %v3753_v39 = vpack.c.bf16 %v7648_v38, %v7634_v15 }
 0x4e9   : > { %v2955_v58 = vmul.f32 0.6931472, %v4025_v4  ;;  %v4027_v8 = vpop.eup %4026  ;;  %4036 = vlog2.f32 %v2879_v21  ;;  %v3751_v4 = vpack.c.bf16 %v7641_v25, %v7621_v55 }
 0x4ea   : > { %v4029_v50 = vpop.eup %4028  ;;  %v2957_v32 = vmul.f32 0.6931472, %v4027_v8  ;;  %4038 = vlog2.f32 %v2881_v35  ;;  %v2883_v8 = vmax.f32 %v1576_v40, 1e-30  ;;  %v2884_v35 = vmax.f32 %v7679_v29, 1e-30 }
 0x4eb   : > { %v7696_v59 = vmul.f32 %v2955_v58, %v7601_v61  ;;  %3742 = vmatpush3.bf16.msra.mxu0 %v3741_v62  ;;  %v7698_v16 = vpop.xlane.xlu1 %1581  ;;  %v3747_v61 = vpack.c.bf16 %v7626_v30, %v7609_v33  ;;  %v7711_v49 = vpop.xlane.xlu0 %2745  ;;  %v2907_v34 = vmul.f32 0.6931472, %v4029_v50  ;;  %4040 = vlog2.f32 %v2880_v51 }
 0x4ec   : > { %3744 = vmatprep.subr.bf16.mxu0 %v3743_v1  ;;  %v7719_v62 = vmul.f32 %v2957_v32, %v7603_v23  ;;  %4042 = vlog2.f32 %v2883_v8  ;;  %v8604_v32 = vpack.c.bf16 %v7585_v41, %v7564_v3  ;;  %v2886_v3 = vmax.f32 %v7686_v48, 1e-30 }
 0x4ed   : > { %v3771_v52 = vpack.c.bf16 %v7696_v59, %v7693_v0  ;;  %v8605_v41 = vpack.c.bf16 %v7599_v63, %v7590_v53 }
 0x4ef   : > { %3746 = vmatpush3.bf16.msra.mxu0 %v3745_v57  ;;  %v7709_v46 = vpop.xlane.xlu1 %1587  ;;  %v7726_v21 = vpop.xlane.xlu0 %2799  ;;  %v3123_v57 = vmul.f32 %v2907_v34, %v7298_v18 }
 0x4f0   : > { %v4031_v9 = vpop.eup %4030  ;;  %3748 = vmatprep.subr.bf16.mxu0 %v3747_v61 }
 0x4f1   : > { %v4033_v60 = vpop.eup %4032  ;;  %v2959_v45 = vmul.f32 0.6931472, %v4031_v9 }
 0x4f2   : > { %v2911_v1 = vmul.f32 0.6931472, %v4033_v60  ;;  %v4035_v50 = vpop.eup %4034  ;;  %v3757_v60 = vpack.c.bf16 %v3123_v57, %v7424_v11 }
 0x4f3   : > { %v7722_v58 = vmul.f32 %v2959_v45, %v7617_v37  ;;  %3750 = vmatpush3.bf16.msra.mxu0 %v3749_v20  ;;  %v7724_v28 = vpop.xlane.xlu1 %2796  ;;  %v2882_v37 = vmax.f32 %v7664_v24, 1e-30  ;;  %v1633_v18 = vpop.xlane.xlu0 %1632  ;;  %v2915_v9 = vmul.f32 0.6931472, %v4035_v50  ;;  %v2900_v24 = vmax.f32 %v7672_v2, 1e-30 }
 0x4f4   : > { %3752 = vmatprep.subr.bf16.mxu0 %v3751_v4  ;;  %v3125_v40 = vmul.f32 %v2911_v1, %v7404_v27  ;;  %v4037_v34 = vpop.eup %4036  ;;  %v2885_v20 = vmax.f32 %v7698_v16, 1e-30  ;;  %v2902_v16 = vmax.f32 %v1633_v18, 1e-30 }
 0x4f5   : > { %v3775_v23 = vpack.c.bf16 %v7722_v58, %v7719_v62  ;;  %4044 = vlog2.f32 %v2882_v37  ;;  %v3127_v2 = vmul.f32 %v2915_v9, %v7416_v26  ;;  %v2919_v45 = vmul.f32 0.6931472, %v4037_v34  ;;  %v4039_v4 = vpop.eup %4038 }
 0x4f6   : > { %v3761_v11 = vpack.c.bf16 %v3125_v40, %v7444_v31  ;;  %4046 = vlog2.f32 %v2884_v35  ;;  %v4041_v51 = vpop.eup %4040  ;;  %v8606_v31 = vpack.c.bf16 %v7615_v19, %v7612_v17  ;;  %v2923_v1 = vmul.f32 0.6931472, %v4039_v4 }
 0x4f7   : > { %3754 = vmatpush3.bf16.msra.mxu0 %v3753_v39  ;;  %v7734_v61 = vpop.xlane.xlu1 %2748  ;;  %v7753_v29 = vpop.xlane.xlu0 %2751  ;;  %4048 = vlog2.f32 %v2900_v24  ;;  %v3129_v26 = vmul.f32 %v2919_v45, %v7433_v43  ;;  %v3765_v8 = vpack.c.bf16 %v3127_v2, %v7461_v13  ;;  %v8607_v17 = vpack.c.bf16 %v7632_v12, %v7629_v7 }
 0x4f8   : > { %3756 = vmatprep.subr.bf16.mxu0 %v8604_v32  ;;  %4050 = vlog2.f32 %v2885_v20  ;;  %v4043_v57 = vpop.eup %4042  ;;  %v3131_v43 = vmul.f32 %v2923_v1, %v7454_v44 }
 0x4f9   : > { %4052 = vlog2.f32 %v2886_v3  ;;  %v2927_v40 = vmul.f32 0.6931472, %v4043_v57  ;;  %v3769_v32 = vpack.c.bf16 %v3129_v26, %v7484_v47 }
 0x4fa   : > { %3116 = vmatmul.mubr.f32.vlgmr.msra.gmra.mrb[26].mxu0 %v7652_v6  ;;  %4054 = vlog2.f32 %v2902_v16 }
 0x4fb   : > { %3758 = vmatpush3.bf16.msra.mxu0 %v3757_v60  ;;  %3218 = vmatprep.mubr.f32.mxu0 %v8602_v10  ;;  %v7746_v27 = vpop.xlane.xlu1 %2802  ;;  %v2887_v10 = vmax.f32 %v7709_v46, 1e-30  ;;  %v7760_v63 = vpop.xlane.xlu0 %2805  ;;  %v2921_v46 = vmul.f32 0.6931472, %v4041_v51  ;;  %v3133_v44 = vmul.f32 %v2927_v40, %v7478_v22 }
 0x4fc   : > { %3760 = vmatprep.subr.bf16.mxu0 %v8605_v41 }
 0x4fd   : > { %v3130_v18 = vmul.f32 %v2921_v46, %v7451_v5 }
 0x4ff   : > { %3762 = vmatpush3.bf16.msra.mxu0 %v3761_v11  ;;  %v1630_v48 = vpop.xlane.xlu1 %1629  ;;  %v4045_v50 = vpop.eup %4044  ;;  %v3773_v34 = vpack.c.bf16 %v3131_v43, %v3130_v18 }
 0x500   : > { %v2901_v53 = vmax.f32 %v1630_v48, 1e-30  ;;  %3764 = vmatprep.subr.bf16.mxu0 %v8606_v31  ;;  %v7767_v19 = vpop.xlane.xlu0 %2757  ;;  %v4047_v13 = vpop.eup %4046  ;;  %v2925_v9 = vmul.f32 0.6931472, %v4045_v50 }
 0x501   : > { %v4049_v60 = vpop.eup %4048  ;;  %v2929_v24 = vmul.f32 0.6931472, %v4047_v13 }
 0x502   : > { %4056 = vlog2.f32 %v2901_v53  ;;  %v4051_v7 = vpop.eup %4050  ;;  %v3132_v5 = vmul.f32 %v2925_v9, %v7469_v42  ;;  %v2961_v3 = vmul.f32 0.6931472, %v4049_v60 }
 0x503   : > { %4058 = vlog2.f32 %v2887_v10  ;;  %3766 = vmatpush3.bf16.msra.mxu0 %v3765_v8  ;;  %v1636_v39 = vpop.xlane.xlu1 %1635  ;;  %v4053_v47 = vpop.eup %4052  ;;  %v2931_v2 = vmul.f32 0.6931472, %v4051_v7  ;;  %v3134_v22 = vmul.f32 %v2929_v24, %v7481_v14 }
 0x504   : > { %v2903_v37 = vmax.f32 %v1636_v39, 1e-30  ;;  %3768 = vmatprep.subr.bf16.mxu0 %v8607_v17  ;;  %v7777_v12 = vpop.xlane.xlu0 %2811  ;;  %v4055_v20 = vpop.eup %4054  ;;  %v3777_v45 = vpack.c.bf16 %v3133_v44, %v3132_v5  ;;  %v2933_v16 = vmul.f32 0.6931472, %v4053_v47  ;;  %v3150_v4 = vmul.f32 %v2961_v3, %v7609_v33 }
 0x505   : > { %v2965_v10 = vmul.f32 0.6931472, %v4055_v20  ;;  %v3135_v53 = vmul.f32 %v2931_v2, %v7499_v54  ;;  %v3787_v54 = vpack.c.bf16 %v7724_v28, %v7701_v36 }
 0x506   : > { %4060 = vlog2.f32 %v2903_v37  ;;  %v3136_v26 = vmul.f32 %v2933_v16, %v7634_v15  ;;  %v8608_v15 = vld [vmem:[#allocation5_spill] sm:$0xff]  ;;  %v8609_v37 = vld [vmem:[#allocation4_spill] sm:$0xff] }
 0x507   : > { %3770 = vmatpush3.bf16.msra.mxu0 %v3769_v32  ;;  %v7772_v35 = vpop.xlane.xlu1 %2754  ;;  %v3781_v1 = vpack.c.bf16 %v3135_v53, %v3134_v22  ;;  %v3152_v14 = vmul.f32 %v2965_v10, %v7621_v55  ;;  %v3233_v17 = vrot.slane %v8609_v37, %v8608_v15  ;;  %v3229_v3 = vrot.slane %v8609_v37, %v8599_v56 }
 0x508   : > { %3772 = vmatprep.subr.bf16.mxu0 %v3771_v52  ;;  %v2764_v0 = vpop.xlane.xlu0 %2763  ;;  %v3793_v36 = vpack.c.bf16 %v7772_v35, %v7753_v29 }
 0x50b   : > { %3774 = vmatpush3.bf16.msra.mxu0 %v3773_v34  ;;  %v2809_v41 = vpop.xlane.xlu1 %2808 }
 0x50c   : > { %v4057_v11 = vpop.eup %4056  ;;  %3776 = vmatprep.subr.bf16.mxu0 %v3775_v23  ;;  %v2818_v62 = vpop.xlane.xlu0 %2817  ;;  %v3795_v28 = vpack.c.bf16 %v2809_v41, %v7760_v63 }
 0x50d   : > { %v4059_v59 = vpop.eup %4058  ;;  %v2963_v52 = vmul.f32 0.6931472, %v4057_v11 }
 0x50e   : > { %v2935_v31 = vmul.f32 0.6931472, %v4059_v59 }
 0x50f   : > { %v3151_v42 = vmul.f32 %v2963_v52, %v7626_v30  ;;  %3778 = vmatpush3.bf16.msra.mxu0 %v3777_v45  ;;  %v2761_v48 = vpop.xlane.xlu1 %2760 }
 0x510   : > { %v4061_v51 = vpop.eup %4060  ;;  %v3137_v30 = vmul.f32 %v2935_v31, %v7648_v38  ;;  %v2770_v57 = vpop.xlane.xlu0 %2769  ;;  %v3791_v38 = vpack.c.bf16 %v7746_v27, %v7726_v21 }
 0x511   : > { %v2967_v58 = vmul.f32 0.6931472, %v4061_v51  ;;  %v3779_v23 = vpack.c.bf16 %v3151_v42, %v3150_v4 }
 0x512   : > { %v3785_v39 = vpack.c.bf16 %v3137_v30, %v3136_v26 }
 0x513   : > { %v3153_v8 = vmul.f32 %v2967_v58, %v7641_v25  ;;  %3780 = vmatprep.subr.bf16.mxu0 %v3779_v23  ;;  %v2815_v33 = vpop.xlane.xlu1 %2814  ;;  %v3789_v25 = vpack.c.bf16 %v7734_v61, %v7711_v49  ;;  %v3797_v49 = vpack.c.bf16 %v2761_v48, %v7767_v19 }
 0x514   : > { %3782 = vmatpush3.bf16.msra.mxu0 %v3781_v1  ;;  %v2824_v55 = vpop.xlane.xlu0 %2823  ;;  %v3799_v61 = vpack.c.bf16 %v2815_v33, %v7777_v12 }
 0x515   : > { %v3783_v46 = vpack.c.bf16 %v3153_v8, %v3152_v14 }
 0x517   : > { %3784 = vmatprep.subr.bf16.mxu0 %v3783_v46  ;;  %v2767_v50 = vpop.xlane.xlu1 %2766 }
 0x518   : > { %3786 = vmatpush3.bf16.msra.mxu0 %v3785_v39  ;;  %v2776_v32 = vpop.xlane.xlu0 %2775  ;;  %v3801_v27 = vpack.c.bf16 %v2767_v50, %v2764_v0 }
 0x519   : > { %3788 = vmatprep.subr.bf16.mxu0 %v3787_v54 }
 0x51b   : > { %3219 = vmatmul.mubr.f32.vlgmr.msra.gmra.mrb[28].mxu0 %v7652_v6  ;;  %v2821_v43 = vpop.xlane.xlu1 %2820 }
 0x51c   : > { %3790 = vmatpush3.bf16.msra.mxu0 %v3789_v25  ;;  %3300 = vmatprep.mubr.f32.mxu0 %v3233_v17  ;;  %v2830_v6 = vpop.xlane.xlu0 %2829  ;;  %v3803_v13 = vpack.c.bf16 %v2821_v43, %v2818_v62 }
 0x51d   : > { %3792 = vmatprep.subr.bf16.mxu0 %v3791_v38 }
 0x51f   : > { %v2773_v40 = vpop.xlane.xlu1 %2772 }
 0x520   : > { %3794 = vmatpush3.bf16.msra.mxu0 %v3793_v36  ;;  %v3805_v29 = vpack.c.bf16 %v2773_v40, %v2770_v57  ;;  %v2782_v35 = vpop.xlane.xlu0 %2781 }
 0x521   : > { %3796 = vmatprep.subr.bf16.mxu0 %v3795_v28 }
 0x523   : > { %v2827_v21 = vpop.xlane.xlu1 %2826 }
 0x524   : > { %3798 = vmatpush3.bf16.msra.mxu0 %v3797_v49  ;;  %v3807_v9 = vpack.c.bf16 %v2827_v21, %v2824_v55  ;;  %v2836_v12 = vpop.xlane.xlu0 %2835 }
 0x525   : > { %3800 = vmatprep.subr.bf16.mxu0 %v3799_v61 }
 0x527   : > { %v2779_v18 = vpop.xlane.xlu1 %2778 }
 0x528   : > { %3802 = vmatpush3.bf16.msra.mxu0 %v3801_v27  ;;  %v3809_v60 = vpack.c.bf16 %v2779_v18, %v2776_v32  ;;  %v2788_v24 = vpop.xlane.xlu0 %2787 }
 0x529   : > { %3804 = vmatprep.subr.bf16.mxu0 %v3803_v13 }
 0x52b   : > { %v2833_v63 = vpop.xlane.xlu1 %2832 }
 0x52c   : > { %3806 = vmatpush3.bf16.msra.mxu0 %v3805_v29  ;;  %v3811_v7 = vpack.c.bf16 %v2833_v63, %v2830_v6 }
 0x52d   : > { %3808 = vmatprep.subr.bf16.mxu0 %v3807_v9 }
 0x52f   : > { %v2785_v19 = vpop.xlane.xlu1 %2784 }
 0x530   : > { %3810 = vmatpush3.bf16.msra.mxu0 %v3809_v60  ;;  %v3813_v44 = vpack.c.bf16 %v2785_v19, %v2782_v35 }
 0x531   : > { %3812 = vmatprep.subr.bf16.mxu0 %v3811_v7 }
 0x533   : > { %v2839_v34 = vpop.xlane.xlu1 %2838 }
 0x534   : > { %v3815_v47 = vpack.c.bf16 %v2839_v34, %v2836_v12  ;;  %3814 = vmatpush3.bf16.msra.mxu0 %v3813_v44 }
 0x536   : > { %3816 = vmatprep.subr.bf16.mxu0 %v3815_v47 }
 0x537   : > { %v2791_v20 = vpop.xlane.xlu1 %2790 }
 0x538   : > { %v3817_v5 = vpack.c.bf16 %v2791_v20, %v2788_v24 }
 0x53a   : > { %3818 = vmatpush3.bf16.msra.mxu0 %v3817_v5 }
 0x53d   : > { %3301 = vmatmul.mubr.f32.vlgmr.msra.gmra.mrb[30].mxu0 %v3229_v3 }
 0x5ad   : > { %v3583_v41 = vpop.f32.mrb[24].mxu0 }
 0x5ae   : > { %v3584_v11 = vpop.f32.mrb[25].mxu0 }
 0x5af   : > { %v3585_v2 = vadd.f32 %v3584_v11, %v3583_v41 }
 0x5b1   : > { %3819 = vpush %v3585_v2 }
 0x5cd   : > { %v3618_v0 = vpop.f32.mrb[26].mxu0 }
 0x5ce   : > { %v3619_v59 = vpop.f32.mrb[27].mxu0 }
 0x5cf   : > { %v3620_v52 = vadd.f32 %v3619_v59, %v3618_v0 }
 0x5d1   : > { %3821 = vpush %v3620_v52 }
 0x5e2   : > { %s3820_s21 = spop %3819 }
 0x5ee   : > { %v3653_v45 = vpop.f32.mrb[28].mxu0 }
 0x5ef   : > { %v3654_v22 = vpop.f32.mrb[29].mxu0 }
 0x5f0   : > { %v3655_v16 = vadd.f32 %v3654_v22, %v3653_v45 }
 0x5f2   : > { %3823 = vpush %v3655_v16 }
 0x602   : > { %s3822_s22 = spop %3821 }
 0x603   : > { %s3310_s24 = smax.f32 %s4075_s23, %s3822_s22 }
 0x604   : > { %v3311_v56 = vstv %s3310_s24 }
 0x605   : > { %4062 = vrcp.f32 %v3311_v56 }
 0x60f   : > { %v4063_v48 = vpop.eup %4062 }
 0x610   : > { %v3688_v4 = vpop.f32.mrb[30].mxu0 }
 0x611   : > { %v3689_v42 = vpop.f32.mrb[31].mxu0 }
 0x612   : > { %v3690_v10 = vadd.f32 %v3689_v42, %v3688_v4 }
 0x614   : > { %3825 = vpush %v3690_v10 }
 0x615   : > { %3827 = vpush %v4063_v48 }
 0x623   : > { %s3824_s25 = spop %3823 }
 0x624   : > { %s3308_s26 = ssub.f32 %s3820_s21, %s3824_s25 }
 0x626   : > { %s3309_s27 = smul.f32 -1.4285715, %s3308_s26 }
 0x645   : > { %s3826_s28 = spop %3825 }
 0x646   : > { %p3307_p4 = scmp.gt.f32.partialorder %s3826_s28, 0.0  ;;  %s3828_s29 = spop %3827 }
 0x647   : > { %s3314_s14 = smul.f32 %s3828_s29, %s3309_s27 }
 0x648   : > { %s3319_s15 = scalar_select %p3307_p4, 1, 0 }
 0x649   : > { %s8613_s14 = smov (!%p3307_p4, %s3314_s14), 0.0 }
 0x64a   : > { %s3320_s19 = scvt.s32.f32 %s3319_s15  ;;  %v3316_v51 = vstv %s8613_s14 }
 0x64b   : > { %3318 = vst.msk [vmem:[%s388_s13] sm:$0x1] %vm3317_vm2, %v3316_v51 }
 0x64c   : > { %v3321_v53 = vstv %s3320_s19 }
 0x64d   : > { %3322 = vst.msk [vmem:[%s391_s18] sm:$0x1] %vm3317_vm2, %v3321_v53 }
 0x64e PF: > { %s20_s30 = sadd.s32 1, %s4070_s30  }
 0x64f   : > { %p17_p5 = scmp.ge.s32.totalorder %s20_s30, 4  }
 0x651   :  { %19 = sbr.rel (!%p17_p5) target bundleno = 1 (0x1), region = 105 }

</bundles_post_ra>
